<compile_context>
chip_gen: v7x
topology: tpu7x:2x2x1
jax: 0.10.0
libtpu: 0.0.40
codegen_flags: <defaults>
</compile_context>

<pallas_src>
import functools

import numpy as np
import jax
import jax.numpy as jnp
from jax import lax
from jax.experimental import pallas as pl
from jax.experimental.pallas import tpu as pltpu

EPS = 1e-12          # matches F.normalize eps / clamp(min=1e-12)
NEG_BIG = -1e30      # softmax mask for padded phoneme columns
TILE_N = 512         # frames per grid step (perf feedback: 512-1024)


def _round_up(x, m):
    return ((x + m - 1) // m) * m


def _l2norm(x):
    # F.normalize(dim=1): x / max(||x||, 1e-12), via EUP rsqrt.
    s = jnp.sum(x * x, axis=1, keepdims=True)
    return x * lax.rsqrt(jnp.maximum(s, EPS * EPS))


# ----------------------------------------------------------------------------
# Pallas kernel: grid = (phase, n_tiles)
# ----------------------------------------------------------------------------
def _conpco_kernel(idxr_ref, idxc_ref, gt_ref, msk_ref, f_ref, ft_ref,   # inputs
                   out_ref,                                              # output
                   agg_a, agg_t, cnt, ca_bf, ts, ms, clap_s, ent_s,      # scratch
                   *, lam_clap, margin):
    phase = pl.program_id(0)
    k = pl.program_id(1)
    nk = pl.num_programs(1)
    P = agg_a.shape[0]
    tn = f_ref.shape[0]

    # ---- init accumulators (first grid step) --------------------------------
    @pl.when((phase == 0) & (k == 0))
    def _init():
        agg_a[...] = jnp.zeros_like(agg_a)
        agg_t[...] = jnp.zeros_like(agg_t)
        cnt[...] = jnp.zeros_like(cnt)
        ts[...] = jnp.zeros_like(ts)
        ms[...] = jnp.zeros_like(ms)
        clap_s[...] = jnp.zeros_like(clap_s)
        ent_s[...] = jnp.zeros_like(ent_s)
        out_ref[...] = jnp.zeros_like(out_ref)

    # ---- phase 0: center aggregation over N tiles (index_add == one-hot GEMM)
    @pl.when(phase == 0)
    def _accumulate():
        idr = idxr_ref[...]                                    # [1, tn] int32
        piota = lax.broadcasted_iota(jnp.int32, (P, tn), 0)
        A_f = (piota == idr).astype(jnp.float32)               # one-hot built in-kernel
        A_bf = A_f.astype(jnp.bfloat16)                        # exact in bf16
        agg_a[...] += jnp.dot(A_bf, f_ref[...],
                              preferred_element_type=jnp.float32)   # [P, C]
        agg_t[...] += jnp.dot(A_bf, ft_ref[...],
                              preferred_element_type=jnp.float32)   # [P, C]
        cnt[...] += jnp.sum(A_f, axis=1, keepdims=True)             # [P, 1]

    # ---- end of phase 0: centers, CLAP, diversity (all [P,*] -> tiny) -------
    @pl.when((phase == 0) & (k == nk - 1))
    def _finalize_centers():
        counts = cnt[...]
        phon_valid = (counts > 0.5).astype(jnp.float32)             # [P, 1]
        p_real = jnp.sum(phon_valid, axis=(0, 1), keepdims=True)    # (1, 1)
        p_real_safe = jnp.maximum(p_real, 1.0)
        # approx reciprocal is fine: the per-row scale cancels in l2norm.
        inv_counts = pl.reciprocal(jnp.maximum(counts, 1.0), approx=True)

        c_a = _l2norm(agg_a[...] * inv_counts)                      # center_f_phn
        c_t = _l2norm(agg_t[...] * inv_counts)                      # center_f_phn_text
        ca = c_a.astype(jnp.bfloat16)                               # hoisted casts
        ct = c_t.astype(jnp.bfloat16)
        ca_bf[...] = ca                                             # persist for phase 1

        ri = lax.broadcasted_iota(jnp.int32, (P, P), 0).astype(jnp.float32)
        ci = lax.broadcasted_iota(jnp.int32, (P, P), 1).astype(jnp.float32)
        eye = (ri == ci).astype(jnp.float32)
        upper = (ci > ri).astype(jnp.float32)
        row_valid = (ri < p_real).astype(jnp.float32)
        col_valid = (ci < p_real).astype(jnp.float32)

        # CLAP-style contrastive center loss (log_softmax over real columns).
        cos = lax.dot_general(ca, ct, (((1,), (1,)), ((), ())),
                              preferred_element_type=jnp.float32)   # [P, P]
        cos_m = cos + (1.0 - col_valid) * NEG_BIG
        row_max = jnp.max(cos_m, axis=1, keepdims=True)
        lse = row_max + jnp.log(jnp.sum(jnp.exp(cos_m - row_max),
                                        axis=1, keepdims=True))
        logsm = cos_m - lse
        diag_mean = (jnp.sum(logsm * eye * col_valid, axis=(0, 1), keepdims=True)
                     / p_real_safe)
        loss_audio = -diag_mean
        loss_text = -diag_mean          # diag(transpose(logsm)) is the same diag
        clap_s[...] = lam_clap * loss_audio + (1.0 - lam_clap) * loss_text

        # Diversity: mean upper-triangular pairwise center distance.
        # Centers are unit norm, so d^2 = 2 - 2*gram.
        gram = lax.dot_general(ca, ca, (((1,), (1,)), ((), ())),
                               preferred_element_type=jnp.float32)  # [P, P]
        dist = jnp.sqrt(jnp.maximum(2.0 - 2.0 * gram, EPS))
        pair_mask = upper * row_valid * col_valid
        n_pairs = p_real * (p_real - 1.0) * 0.5
        # NOTE: torch yields NaN when P_real < 2; we return 0 instead.
        ent_s[...] = (jnp.sum(dist * pair_mask, axis=(0, 1), keepdims=True)
                      / jnp.maximum(n_pairs, 1.0))

    # ---- phase 1: tightness over N tiles (bf16 gather GEMM, post-hoc norm) --
    @pl.when(phase == 1)
    def _tightness():
        idc = idxc_ref[...]                                    # [tn, 1] int32
        piota = lax.broadcasted_iota(jnp.int32, (tn, P), 1)
        At_bf = (piota == idc).astype(jnp.float32).astype(jnp.bfloat16)  # [tn, P]
        # Exact gather of the frame's (bf16) center via one-hot matmul.
        fc = jnp.dot(At_bf, ca_bf[...],
                     preferred_element_type=jnp.float32)        # [tn, C]
        xf = f_ref[...].astype(jnp.float32)
        dotn = jnp.sum(xf * fc, axis=1, keepdims=True)          # [tn, 1]
        nsq = jnp.sum(xf * xf, axis=1, keepdims=True)           # [tn, 1]
        # t = ||f/||f|| - p||^2 = 2 - 2 <f, p> / max(||f||, eps)   (unit p)
        t = 2.0 - 2.0 * dotn * lax.rsqrt(jnp.maximum(nsq, EPS * EPS))
        w = 2.0 - gt_ref[...] + margin                          # ordinal weight
        msk = msk_ref[...]                                      # counts-based t>0 mask
        vals = jnp.sqrt(jnp.maximum(t, 0.0)) * w * msk
        ts[...] += jnp.sum(vals, axis=(0, 1), keepdims=True)
        ms[...] += jnp.sum(msk, axis=(0, 1), keepdims=True)

    # ---- last step: pack the three scalars into one lane-aligned output -----
    @pl.when((phase == 1) & (k == nk - 1))
    def _write_out():
        # NOTE: torch yields NaN when no frame passes the mask; we return 0.
        tight = ts[...] / jnp.maximum(ms[...], 1.0)
        lane = lax.broadcasted_iota(jnp.int32, (1, 128), 1)
        out_ref[...] = (jnp.where(lane == 0, clap_s[...], 0.0)
                        + jnp.where(lane == 1, ent_s[...], 0.0)
                        + jnp.where(lane == 2, tight, 0.0))


def _vmem_limit_bytes(P_pad, C_pad, tn):
    need = (4 * tn * C_pad * 2          # feats+featst double-buffered bf16 tiles
            + 16 * tn * 4               # idx / gt / msk tiles
            + 2 * P_pad * C_pad * 4     # agg_a, agg_t
            + P_pad * C_pad * 2         # ca_bf
            + P_pad * 512               # counts (padded)
            + 3 * tn * C_pad * 4        # phase-1 f32 temps (xf, fc, products)
            + 2 * P_pad * tn * 4        # phase-0 one-hot temps
            + 6 * P_pad * P_pad * 4     # [P,P] matrices
            + (1 << 20))                # small-scratch / misc slack
    cap = 64 * 1024 * 1024              # safe default (v7x physical VMEM per TC)
    try:
        cap = int(pltpu.get_tpu_info().vmem_capacity_bytes)
    except Exception:
        pass
    return int(min(max(2 * need, 32 * 1024 * 1024), cap - (8 * 1024 * 1024)))


def _pallas_losses(idx_row, idx_col, gt_col, msk_col, feats_bf, featst_bf,
                   P_pad, lam_clap, margin):
    N_pad, C_pad = feats_bf.shape
    n_tiles = N_pad // TILE_N
    kernel = functools.partial(_conpco_kernel,
                               lam_clap=float(lam_clap), margin=float(margin))

    in_specs = [
        # idx_row: only needed in phase 0 (stays on block 0 during phase 1)
        pl.BlockSpec((1, TILE_N), lambda p, k: (0, k * (1 - p))),
        # idx_col / gt_col / msk_col: only needed in phase 1
        pl.BlockSpec((TILE_N, 1), lambda p, k: (k * p, 0)),
        pl.BlockSpec((TILE_N, 1), lambda p, k: (k * p, 0)),
        pl.BlockSpec((TILE_N, 1), lambda p, k: (k * p, 0)),
        # feats: needed in both phases
        pl.BlockSpec((TILE_N, C_pad), lambda p, k: (k, 0)),
        # featst: only needed in phase 0
        pl.BlockSpec((TILE_N, C_pad), lambda p, k: (k * (1 - p), 0)),
    ]
    out_specs = pl.BlockSpec((1, 128), lambda p, k: (0, 0))
    scratch = [
        pltpu.VMEM((P_pad, C_pad), jnp.float32),   # agg_a
        pltpu.VMEM((P_pad, C_pad), jnp.float32),   # agg_t
        pltpu.VMEM((P_pad, 1), jnp.float32),       # counts
        pltpu.VMEM((P_pad, C_pad), jnp.bfloat16),  # normalized audio centers
        pltpu.VMEM((1, 1), jnp.float32),           # tightness numerator
        pltpu.VMEM((1, 1), jnp.float32),           # tightness denominator
        pltpu.VMEM((1, 1), jnp.float32),           # loss_clap
        pltpu.VMEM((1, 1), jnp.float32),           # entropy (diversity)
    ]

    out = pl.pallas_call(
        kernel,
        out_shape=jax.ShapeDtypeStruct((1, 128), jnp.float32),
        grid_spec=pltpu.PrefetchScalarGridSpec(
            num_scalar_prefetch=0,
            grid=(2, n_tiles),
            in_specs=in_specs,
            out_specs=out_specs,
            scratch_shapes=scratch),
        compiler_params=pltpu.CompilerParams(
            dimension_semantics=("arbitrary", "arbitrary"),
            vmem_limit_bytes=_vmem_limit_bytes(P_pad, C_pad, TILE_N)),
    )(idx_row, idx_col, gt_col, msk_col, feats_bf, featst_bf)
    return out[0, 0], out[0, 1], out[0, 2]


# ----------------------------------------------------------------------------
# Host-side glue: boolean masking / unique (data-dependent shapes -> NumPy)
# ----------------------------------------------------------------------------
def _host_prepare(features, features_text, gt, phn_id):
    f = np.asarray(features, dtype=np.float32)
    ft = np.asarray(features_text, dtype=np.float32)
    g = np.asarray(gt, dtype=np.float32).reshape(-1)
    pid = np.asarray(phn_id).reshape(-1)
    f_c = f.shape[-1]
    f2 = f.reshape(-1, f_c)
    ft2 = ft.reshape(-1, f_c)

    mask_norm = g > 0
    gt_norm = g[mask_norm]
    mask_high = g == 2
    pid_norm = pid[mask_norm]
    pid_high = pid[mask_high]
    u_norm = np.unique(pid_norm)
    u_high = np.unique(pid_high)
    skip_phns = np.array([v not in u_high for v in u_norm], dtype=bool)

    if skip_phns.sum() != 0:
        # Faithful to torch: membership of a phoneme id against the *boolean*
        # skip tensor (its elements are {0, 1}).
        skip_vals = skip_phns.astype(np.int64)
        mask_phn = np.array([not np.any(skip_vals == v) for v in pid_norm],
                            dtype=bool)
        gt_sel = gt_norm[mask_phn]
        feats_sel = f2[mask_norm][mask_phn]
        featst_sel = ft2[mask_norm][mask_phn]
        pid_sel = pid_norm[mask_phn]
    else:
        gt_sel = gt_norm
        feats_sel = f2[mask_norm]
        featst_sel = ft2[mask_norm]
        pid_sel = pid_norm

    u_value, u_index, u_counts = np.unique(pid_sel, return_inverse=True,
                                           return_counts=True)
    P, N = len(u_value), len(pid_sel)

    # Fixed buckets: P minimal (round to 8, per v5e feedback), N to TILE_N,
    # C to the lane width -> compile-cache reuse + full tiles.
    P_pad = max(_round_up(P, 8), 8)
    N_pad = max(_round_up(N, TILE_N), TILE_N)
    C_pad = max(_round_up(f_c, 128), 128)

    idx = np.full((N_pad,), -1, dtype=np.int32)
    idx[:N] = u_index.astype(np.int32)
    gt_col = np.zeros((N_pad, 1), dtype=np.float32)
    gt_col[:N, 0] = gt_sel
    # torch masks tightness with `t > 0`; in exact arithmetic that excludes
    # exactly the frames that equal their own center (singleton phonemes), so
    # we derive the mask from the host-known unique counts instead of a float
    # threshold (robust to bf16 MXU feeds).
    msk_col = np.zeros((N_pad, 1), dtype=np.float32)
    msk_col[:N, 0] = (u_counts[u_index] > 1).astype(np.float32)

    feats_pad = np.zeros((N_pad, C_pad), dtype=np.float32)
    feats_pad[:N, :f_c] = feats_sel
    featst_pad = np.zeros((N_pad, C_pad), dtype=np.float32)
    featst_pad[:N, :f_c] = featst_sel

    return {
        "idx_row": np.ascontiguousarray(idx.reshape(1, N_pad)),
        "idx_col": np.ascontiguousarray(idx.reshape(N_pad, 1)),
        "gt_col": gt_col, "msk_col": msk_col,
        "feats_pad": feats_pad, "featst_pad": featst_pad, "P_pad": P_pad,
        "feats_sel": feats_sel, "featst_sel": featst_sel, "gt_sel": gt_sel,
        "u_index": u_index, "counts": u_counts.astype(np.float64),
    }


def conpco_forward(features, features_text, gt, phn_id, *,
                   lambda_d_phn, lambda_t_phn, lambda_clap_t2a, margin):
    prep = _host_prepare(features, features_text, gt, phn_id)
    # bf16 MXU feeds for the N-scaling matmuls (halves HBM/VMEM bytes).
    feats_bf = jnp.asarray(prep["feats_pad"], dtype=jnp.bfloat16)
    featst_bf = jnp.asarray(prep["featst_pad"], dtype=jnp.bfloat16)
    clap, ent, tight = _pallas_losses(
        jnp.asarray(prep["idx_row"]), jnp.asarray(prep["idx_col"]),
        jnp.asarray(prep["gt_col"]), jnp.asarray(prep["msk_col"]),
        feats_bf, featst_bf, prep["P_pad"], lambda_clap_t2a, margin)
    loss_oe = lambda_t_phn * tight - lambda_d_phn * ent
    return loss_oe, clap


# ----------------------------------------------------------------------------
# NumPy reference mirroring the PyTorch math (shares the documented deviations
# with the kernel: bf16 rounding of MXU operands, unit-norm center assumption,
# counts-based `t > 0` mask).
# ----------------------------------------------------------------------------
def _bf16_round(x):
    return np.asarray(
        jnp.asarray(np.asarray(x, np.float32)).astype(jnp.bfloat16)
        .astype(jnp.float32))


def _reference(prep, *, lambda_d_phn, lambda_t_phn, lambda_clap_t2a, margin):
    feats = _bf16_round(prep["feats_sel"]).astype(np.float64)
    featst = _bf16_round(prep["featst_sel"]).astype(np.float64)
    gt_sel = prep["gt_sel"].astype(np.float64)
    u_index = prep["u_index"]
    counts = prep["counts"][:, None]
    P = counts.shape[0]
    C = feats.shape[1]

    def l2n(x):
        n = np.sqrt((x * x).sum(axis=1, keepdims=True))
        return x / np.maximum(n, EPS)

    center = np.zeros((P, C)); np.add.at(center, u_index, feats)
    center_t = np.zeros((P, C)); np.add.at(center_t, u_index, featst)
    c_a = l2n(center / counts)
    c_t = l2n(center_t / counts)
    ca_bf = _bf16_round(c_a)
    ct_bf = _bf16_round(c_t)

    cos = ca_bf @ ct_bf.T
    m = cos.max(axis=1, keepdims=True)
    logsm = cos - (m + np.log(np.exp(cos - m).sum(axis=1, keepdims=True)))
    loss_audio = -np.mean(np.diag(logsm))
    loss_text = -np.mean(np.diag(logsm.T))          # same diagonal, as in torch
    loss_clap = lambda_clap_t2a * loss_audio + (1 - lambda_clap_t2a) * loss_text

    gram = ca_bf @ ca_bf.T                           # centers unit-norm -> 2-2*gram
    d = np.sqrt(np.clip(2.0 - 2.0 * gram, EPS, None))
    iu = np.triu_indices(P, k=1)
    entropy = d[iu].mean()

    p_f = ca_bf[u_index]                             # frame's phoneme center
    norms = np.maximum(np.sqrt((feats * feats).sum(axis=1)), EPS)
    dotn = (feats * p_f).sum(axis=1) / norms
    t = 2.0 - 2.0 * dotn
    msk = counts[u_index, 0] > 1                     # counts-based `t > 0`
    w = 2.0 - gt_sel[msk] + margin
    tight = (np.sqrt(np.clip(t[msk], 0.0, None)) * w).mean()

    loss_oe = lambda_t_phn * tight - lambda_d_phn * entropy
    return float(loss_oe), float(loss_clap)


# ----------------------------------------------------------------------------
if __name__ == "__main__":
    lambda_d_phn, lambda_t_phn, lambda_clap_t2a, margin = 0.1, 1.0, 0.5, 0.2

    # Small shapes: batch=2, seq=8, hidden=32.
    B, L, C = 2, 8, 32
    key = jax.random.PRNGKey(0)
    k1, k2 = jax.random.split(key)
    features = jax.random.normal(k1, (B, L, C), dtype=jnp.float32)
    features_text = jax.random.normal(k2, (B, L, C), dtype=jnp.float32)

    # Deterministic gt / phoneme ids (gt in {0,1,2}); includes one singleton
    # phoneme (id 6) to exercise the `t > 0` exclusion path.
    gt = jnp.array([[0, 1, 2, 1, 2, 0, 1, 2],
                    [2, 1, 0, 2, 1, 2, 0, 2]], dtype=jnp.float32)
    phn_id = jnp.array([[3, 1, 1, 2, 2, 0, 3, 3],
                        [4, 4, 5, 1, 3, 2, 2, 6]], dtype=jnp.int32)

    loss_oe, loss_clap = conpco_forward(
        features, features_text, gt, phn_id,
        lambda_d_phn=lambda_d_phn, lambda_t_phn=lambda_t_phn,
        lambda_clap_t2a=lambda_clap_t2a, margin=margin)
    loss_oe = jax.block_until_ready(loss_oe)
    loss_clap = jax.block_until_ready(loss_clap)

    prep = _host_prepare(features, features_text, gt, phn_id)
    ref_oe, ref_clap = _reference(
        prep, lambda_d_phn=lambda_d_phn, lambda_t_phn=lambda_t_phn,
        lambda_clap_t2a=lambda_clap_t2a, margin=margin)

    assert np.allclose(float(loss_oe), ref_oe, rtol=1e-3, atol=1e-3), \
        (float(loss_oe), ref_oe)
    assert np.allclose(float(loss_clap), ref_clap, rtol=1e-3, atol=1e-3), \
        (float(loss_clap), ref_clap)

    print("KERNEL_OK")
</pallas_src>

<mosaic_0001>
module attributes {stable_mosaic.version = 11 : i64} {
  func.func @_conpco_kernel(%arg0: i32, %arg1: i32, %arg2: memref<1x512xi32, #tpu.memory_space<vmem>>, %arg3: memref<512x1xi32, #tpu.memory_space<vmem>>, %arg4: memref<512x1xf32, #tpu.memory_space<vmem>>, %arg5: memref<512x1xf32, #tpu.memory_space<vmem>>, %arg6: memref<512x128xbf16, #tpu.memory_space<vmem>>, %arg7: memref<512x128xbf16, #tpu.memory_space<vmem>>, %arg8: memref<1x128xf32, #tpu.memory_space<vmem>>, %arg9: memref<8x128xf32, #tpu.memory_space<vmem>>, %arg10: memref<8x128xf32, #tpu.memory_space<vmem>>, %arg11: memref<8x1xf32, #tpu.memory_space<vmem>>, %arg12: memref<8x128xbf16, #tpu.memory_space<vmem>>, %arg13: memref<1x1xf32, #tpu.memory_space<vmem>>, %arg14: memref<1x1xf32, #tpu.memory_space<vmem>>, %arg15: memref<1x1xf32, #tpu.memory_space<vmem>>, %arg16: memref<1x1xf32, #tpu.memory_space<vmem>>) attributes {dimension_semantics = [#tpu.dimension_semantics<arbitrary>, #tpu.dimension_semantics<arbitrary>], iteration_bounds = array<i64: 2, 1>, scalar_prefetch = 0 : i64, scratch_operands = 8 : i64, tpu.core_type = #tpu.core_type<tc>, window_params = [{transform_indices = @transform_0, window_bounds = array<i64: 1, 512>}, {transform_indices = @transform_1, window_bounds = array<i64: 512, 1>}, {transform_indices = @transform_2, window_bounds = array<i64: 512, 1>}, {transform_indices = @transform_3, window_bounds = array<i64: 512, 1>}, {transform_indices = @transform_4, window_bounds = array<i64: 512, 128>}, {transform_indices = @transform_5, window_bounds = array<i64: 512, 128>}, {pipeline_mode = #tpu.pipeline_mode<synchronous>, transform_indices = @transform_6, window_bounds = array<i64: 1, 128>}]} {
    %c0_i32 = arith.constant 0 : i32
    %0 = arith.cmpi eq, %arg0, %c0_i32 : i32
    %c0_i32_0 = arith.constant 0 : i32
    %1 = arith.cmpi eq, %arg1, %c0_i32_0 : i32
    %2 = arith.andi %0, %1 : i1
    %3 = arith.extui %2 : i1 to i32
    %c0_i32_1 = arith.constant 0 : i32
    %4 = arith.cmpi ne, %3, %c0_i32_1 : i32
    scf.if %4 {
      %cst = arith.constant 0.000000e+00 : f32
      %21 = vector.broadcast %cst : f32 to vector<8x128xf32>
      %c0 = arith.constant 0 : index
      %c0_11 = arith.constant 0 : index
      %22 = vector.load %arg9[%c0, %c0_11] : memref<8x128xf32, #tpu.memory_space<vmem>>, vector<8x128xf32>
      tpu.vector_store %arg9[%c0, %c0_11], %21 {strides = array<i32>} : memref<8x128xf32, #tpu.memory_space<vmem>>, vector<8x128xf32>,
      %cst_12 = arith.constant 0.000000e+00 : f32
      %23 = vector.broadcast %cst_12 : f32 to vector<8x128xf32>
      %c0_13 = arith.constant 0 : index
      %c0_14 = arith.constant 0 : index
      %24 = vector.load %arg10[%c0_13, %c0_14] : memref<8x128xf32, #tpu.memory_space<vmem>>, vector<8x128xf32>
      tpu.vector_store %arg10[%c0_13, %c0_14], %23 {strides = array<i32>} : memref<8x128xf32, #tpu.memory_space<vmem>>, vector<8x128xf32>,
      %cst_15 = arith.constant 0.000000e+00 : f32
      %25 = vector.broadcast %cst_15 : f32 to vector<8x1xf32>
      %c0_16 = arith.constant 0 : index
      %c0_17 = arith.constant 0 : index
      %26 = vector.load %arg11[%c0_16, %c0_17] : memref<8x1xf32, #tpu.memory_space<vmem>>, vector<8x1xf32>
      tpu.vector_store %arg11[%c0_16, %c0_17], %25 {strides = array<i32>} : memref<8x1xf32, #tpu.memory_space<vmem>>, vector<8x1xf32>,
      %cst_18 = arith.constant 0.000000e+00 : f32
      %27 = vector.broadcast %cst_18 : f32 to vector<1x1xf32>
      %c0_19 = arith.constant 0 : index
      %c0_20 = arith.constant 0 : index
      %28 = vector.load %arg13[%c0_19, %c0_20] : memref<1x1xf32, #tpu.memory_space<vmem>>, vector<1x1xf32>
      tpu.vector_store %arg13[%c0_19, %c0_20], %27 {strides = array<i32>} : memref<1x1xf32, #tpu.memory_space<vmem>>, vector<1x1xf32>,
      %cst_21 = arith.constant 0.000000e+00 : f32
      %29 = vector.broadcast %cst_21 : f32 to vector<1x1xf32>
      %c0_22 = arith.constant 0 : index
      %c0_23 = arith.constant 0 : index
      %30 = vector.load %arg14[%c0_22, %c0_23] : memref<1x1xf32, #tpu.memory_space<vmem>>, vector<1x1xf32>
      tpu.vector_store %arg14[%c0_22, %c0_23], %29 {strides = array<i32>} : memref<1x1xf32, #tpu.memory_space<vmem>>, vector<1x1xf32>,
      %cst_24 = arith.constant 0.000000e+00 : f32
      %31 = vector.broadcast %cst_24 : f32 to vector<1x1xf32>
      %c0_25 = arith.constant 0 : index
      %c0_26 = arith.constant 0 : index
      %32 = vector.load %arg15[%c0_25, %c0_26] : memref<1x1xf32, #tpu.memory_space<vmem>>, vector<1x1xf32>
      tpu.vector_store %arg15[%c0_25, %c0_26], %31 {strides = array<i32>} : memref<1x1xf32, #tpu.memory_space<vmem>>, vector<1x1xf32>,
      %cst_27 = arith.constant 0.000000e+00 : f32
      %33 = vector.broadcast %cst_27 : f32 to vector<1x1xf32>
      %c0_28 = arith.constant 0 : index
      %c0_29 = arith.constant 0 : index
      %34 = vector.load %arg16[%c0_28, %c0_29] : memref<1x1xf32, #tpu.memory_space<vmem>>, vector<1x1xf32>
      tpu.vector_store %arg16[%c0_28, %c0_29], %33 {strides = array<i32>} : memref<1x1xf32, #tpu.memory_space<vmem>>, vector<1x1xf32>,
      %cst_30 = arith.constant 0.000000e+00 : f32
      %35 = vector.broadcast %cst_30 : f32 to vector<1x128xf32>
      %c0_31 = arith.constant 0 : index
      %c0_32 = arith.constant 0 : index
      %36 = vector.load %arg8[%c0_31, %c0_32] : memref<1x128xf32, #tpu.memory_space<vmem>>, vector<1x128xf32>
      tpu.vector_store %arg8[%c0_31, %c0_32], %35 {strides = array<i32>} : memref<1x128xf32, #tpu.memory_space<vmem>>, vector<1x128xf32>,
    } else {
    }
    %c0_i32_2 = arith.constant 0 : i32
    %5 = arith.cmpi eq, %arg0, %c0_i32_2 : i32
    %6 = arith.extui %5 : i1 to i32
    %c0_i32_3 = arith.constant 0 : i32
    %7 = arith.cmpi ne, %6, %c0_i32_3 : i32
    scf.if %7 {
      %c0 = arith.constant 0 : index
      %c0_11 = arith.constant 0 : index
      %21 = vector.load %arg2[%c0, %c0_11] : memref<1x512xi32, #tpu.memory_space<vmem>>, vector<1x512xi32>
      %22 = tpu.iota {dimensions = array<i32: 0>} : vector<8x512xi32>
      %23 = vector.broadcast %21 : vector<1x512xi32> to vector<8x512xi32>
      %24 = arith.cmpi eq, %22, %23 : vector<8x512xi32>
      %25 = arith.extui %24 : vector<8x512xi1> to vector<8x512xi32>
      %26 = arith.sitofp %25 : vector<8x512xi32> to vector<8x512xf32>
      %27 = arith.truncf %26 : vector<8x512xf32> to vector<8x512xbf16>
      %c0_12 = arith.constant 0 : index
      %c0_13 = arith.constant 0 : index
      %28 = vector.load %arg9[%c0_12, %c0_13] : memref<8x128xf32, #tpu.memory_space<vmem>>, vector<8x128xf32>
      %c0_14 = arith.constant 0 : index
      %c0_15 = arith.constant 0 : index
      %29 = vector.load %arg6[%c0_14, %c0_15] : memref<512x128xbf16, #tpu.memory_space<vmem>>, vector<512x128xbf16>
      %cst = arith.constant dense<0.000000e+00> : vector<8x128xf32>
      %30 = tpu.matmul %27, %29, %cst {dimension_numbers = #tpu.dot_dimension_numbers<[1], [0], [0], [1], [0, 0, 1, 1], [], []>} : vector<8x512xbf16>, vector<512x128xbf16>, vector<8x128xf32> -> vector<8x128xf32>
      %31 = arith.addf %28, %30 : vector<8x128xf32>
      %c0_16 = arith.constant 0 : index
      %c0_17 = arith.constant 0 : index
      %32 = vector.load %arg9[%c0_16, %c0_17] : memref<8x128xf32, #tpu.memory_space<vmem>>, vector<8x128xf32>
      tpu.vector_store %arg9[%c0_16, %c0_17], %31 {strides = array<i32>} : memref<8x128xf32, #tpu.memory_space<vmem>>, vector<8x128xf32>,
      %c0_18 = arith.constant 0 : index
      %c0_19 = arith.constant 0 : index
      %33 = vector.load %arg10[%c0_18, %c0_19] : memref<8x128xf32, #tpu.memory_space<vmem>>, vector<8x128xf32>
      %c0_20 = arith.constant 0 : index
      %c0_21 = arith.constant 0 : index
      %34 = vector.load %arg7[%c0_20, %c0_21] : memref<512x128xbf16, #tpu.memory_space<vmem>>, vector<512x128xbf16>
      %cst_22 = arith.constant dense<0.000000e+00> : vector<8x128xf32>
      %35 = tpu.matmul %27, %34, %cst_22 {dimension_numbers = #tpu.dot_dimension_numbers<[1], [0], [0], [1], [0, 0, 1, 1], [], []>} : vector<8x512xbf16>, vector<512x128xbf16>, vector<8x128xf32> -> vector<8x128xf32>
      %36 = arith.addf %33, %35 : vector<8x128xf32>
      %c0_23 = arith.constant 0 : index
      %c0_24 = arith.constant 0 : index
      %37 = vector.load %arg10[%c0_23, %c0_24] : memref<8x128xf32, #tpu.memory_space<vmem>>, vector<8x128xf32>
      tpu.vector_store %arg10[%c0_23, %c0_24], %36 {strides = array<i32>} : memref<8x128xf32, #tpu.memory_space<vmem>>, vector<8x128xf32>,
      %c0_25 = arith.constant 0 : index
      %c0_26 = arith.constant 0 : index
      %38 = vector.load %arg11[%c0_25, %c0_26] : memref<8x1xf32, #tpu.memory_space<vmem>>, vector<8x1xf32>
      %cst_27 = arith.constant dense<0.000000e+00> : vector<8xf32>
      %39 = vector.multi_reduction <add>, %26, %cst_27 [1] : vector<8x512xf32> to vector<8xf32>
      %40 = vector.shape_cast %39 : vector<8xf32> to vector<8x1xf32>
      %41 = arith.addf %38, %40 : vector<8x1xf32>
      %c0_28 = arith.constant 0 : index
      %c0_29 = arith.constant 0 : index
      %42 = vector.load %arg11[%c0_28, %c0_29] : memref<8x1xf32, #tpu.memory_space<vmem>>, vector<8x1xf32>
      tpu.vector_store %arg11[%c0_28, %c0_29], %41 {strides = array<i32>} : memref<8x1xf32, #tpu.memory_space<vmem>>, vector<8x1xf32>,
    } else {
    }
    %c0_i32_4 = arith.constant 0 : i32
    %8 = arith.cmpi eq, %arg0, %c0_i32_4 : i32
    %c0_i32_5 = arith.constant 0 : i32
    %9 = arith.cmpi eq, %arg1, %c0_i32_5 : i32
    %10 = arith.andi %8, %9 : i1
    %11 = arith.extui %10 : i1 to i32
    %c0_i32_6 = arith.constant 0 : i32
    %12 = arith.cmpi ne, %11, %c0_i32_6 : i32
    scf.if %12 {
      %c0 = arith.constant 0 : index
      %c0_11 = arith.constant 0 : index
      %21 = vector.load %arg11[%c0, %c0_11] : memref<8x1xf32, #tpu.memory_space<vmem>>, vector<8x1xf32>
      %cst = arith.constant 5.000000e-01 : f32
      %22 = vector.broadcast %cst : f32 to vector<8x1xf32>
      %23 = arith.cmpf ogt, %21, %22 : vector<8x1xf32>
      %24 = arith.extui %23 : vector<8x1xi1> to vector<8x1xi32>
      %25 = arith.sitofp %24 : vector<8x1xi32> to vector<8x1xf32>
      %26 = vector.shape_cast %25 : vector<8x1xf32> to vector<1x8x1xf32>
      %cst_12 = arith.constant dense<0.000000e+00> : vector<1xf32>
      %27 = vector.multi_reduction <add>, %26, %cst_12 [1, 2] : vector<1x8x1xf32> to vector<1xf32>
      %28 = vector.shape_cast %27 : vector<1xf32> to vector<1x1x1xf32>
      %29 = vector.extract %28[0, 0, 0] : f32 from vector<1x1x1xf32>
      %30 = vector.broadcast %29 : f32 to vector<1x1xf32>
      %cst_13 = arith.constant 1.000000e+00 : f32
      %31 = vector.broadcast %cst_13 : f32 to vector<1x1xf32>
      %32 = arith.maximumf %30, %31 : vector<1x1xf32>
      %cst_14 = arith.constant 1.000000e+00 : f32
      %33 = vector.broadcast %cst_14 : f32 to vector<8x1xf32>
      %34 = arith.maximumf %21, %33 : vector<8x1xf32>
      %35 = tpu.reciprocal %34 {approx = true} : vector<8x1xf32> -> vector<8x1xf32>
      %c0_15 = arith.constant 0 : index
      %c0_16 = arith.constant 0 : index
      %36 = vector.load %arg9[%c0_15, %c0_16] : memref<8x128xf32, #tpu.memory_space<vmem>>, vector<8x128xf32>
      %37 = vector.broadcast %35 : vector<8x1xf32> to vector<8x128xf32>
      %38 = arith.mulf %36, %37 : vector<8x128xf32>
      %39 = arith.mulf %38, %38 : vector<8x128xf32>
      %cst_17 = arith.constant dense<0.000000e+00> : vector<8xf32>
      %40 = vector.multi_reduction <add>, %39, %cst_17 [1] : vector<8x128xf32> to vector<8xf32>
      %41 = vector.shape_cast %40 : vector<8xf32> to vector<8x1xf32>
      %cst_18 = arith.constant 1.000000e-24 : f32
      %42 = vector.broadcast %cst_18 : f32 to vector<8x1xf32>
      %43 = arith.maximumf %41, %42 : vector<8x1xf32>
      %44 = math.rsqrt %43 : vector<8x1xf32>
      %45 = vector.broadcast %44 : vector<8x1xf32> to vector<8x128xf32>
      %46 = arith.mulf %38, %45 : vector<8x128xf32>
      %c0_19 = arith.constant 0 : index
      %c0_20 = arith.constant 0 : index
      %47 = vector.load %arg10[%c0_19, %c0_20] : memref<8x128xf32, #tpu.memory_space<vmem>>, vector<8x128xf32>
      %48 = vector.broadcast %35 : vector<8x1xf32> to vector<8x128xf32>
      %49 = arith.mulf %47, %48 : vector<8x128xf32>
      %50 = arith.mulf %49, %49 : vector<8x128xf32>
      %cst_21 = arith.constant dense<0.000000e+00> : vector<8xf32>
      %51 = vector.multi_reduction <add>, %50, %cst_21 [1] : vector<8x128xf32> to vector<8xf32>
      %52 = vector.shape_cast %51 : vector<8xf32> to vector<8x1xf32>
      %cst_22 = arith.constant 1.000000e-24 : f32
      %53 = vector.broadcast %cst_22 : f32 to vector<8x1xf32>
      %54 = arith.maximumf %52, %53 : vector<8x1xf32>
      %55 = math.rsqrt %54 : vector<8x1xf32>
      %56 = vector.broadcast %55 : vector<8x1xf32> to vector<8x128xf32>
      %57 = arith.mulf %49, %56 : vector<8x128xf32>
      %58 = arith.truncf %46 : vector<8x128xf32> to vector<8x128xbf16>
      %59 = arith.truncf %57 : vector<8x128xf32> to vector<8x128xbf16>
      %c0_23 = arith.constant 0 : index
      %c0_24 = arith.constant 0 : index
      %60 = vector.load %arg12[%c0_23, %c0_24] : memref<8x128xbf16, #tpu.memory_space<vmem>>, vector<8x128xbf16>
      tpu.vector_store %arg12[%c0_23, %c0_24], %58 {strides = array<i32>} : memref<8x128xbf16, #tpu.memory_space<vmem>>, vector<8x128xbf16>,
      %61 = tpu.iota {dimensions = array<i32: 0>} : vector<8x8xi32>
      %62 = arith.sitofp %61 : vector<8x8xi32> to vector<8x8xf32>
      %63 = tpu.iota {dimensions = array<i32: 1>} : vector<8x8xi32>
      %64 = arith.sitofp %63 : vector<8x8xi32> to vector<8x8xf32>
      %65 = arith.cmpf oeq, %62, %64 : vector<8x8xf32>
      %66 = arith.extui %65 : vector<8x8xi1> to vector<8x8xi32>
      %67 = arith.sitofp %66 : vector<8x8xi32> to vector<8x8xf32>
      %68 = arith.cmpf ogt, %64, %62 : vector<8x8xf32>
      %69 = arith.extui %68 : vector<8x8xi1> to vector<8x8xi32>
      %70 = arith.sitofp %69 : vector<8x8xi32> to vector<8x8xf32>
      %71 = vector.broadcast %30 : vector<1x1xf32> to vector<8x8xf32>
      %72 = arith.cmpf olt, %62, %71 : vector<8x8xf32>
      %73 = arith.extui %72 : vector<8x8xi1> to vector<8x8xi32>
      %74 = arith.sitofp %73 : vector<8x8xi32> to vector<8x8xf32>
      %75 = vector.broadcast %30 : vector<1x1xf32> to vector<8x8xf32>
      %76 = arith.cmpf olt, %64, %75 : vector<8x8xf32>
      %77 = arith.extui %76 : vector<8x8xi1> to vector<8x8xi32>
      %78 = arith.sitofp %77 : vector<8x8xi32> to vector<8x8xf32>
      %cst_25 = arith.constant dense<0.000000e+00> : vector<8x8xf32>
      %79 = tpu.matmul %58, %59, %cst_25 {dimension_numbers = #tpu.dot_dimension_numbers<[1], [1], [0], [0], [0, 0, 1, 0], [], []>} : vector<8x128xbf16>, vector<8x128xbf16>, vector<8x8xf32> -> vector<8x8xf32>
      %cst_26 = arith.constant 1.000000e+00 : f32
      %80 = vector.broadcast %cst_26 : f32 to vector<8x8xf32>
      %81 = arith.subf %80, %78 : vector<8x8xf32>
      %cst_27 = arith.constant -1.000000e+30 : f32
      %82 = vector.broadcast %cst_27 : f32 to vector<8x8xf32>
      %83 = arith.mulf %81, %82 : vector<8x8xf32>
      %84 = arith.addf %79, %83 : vector<8x8xf32>
      %cst_28 = arith.constant dense<0xFF800000> : vector<8xf32>
      %85 = vector.multi_reduction <maximumf>, %84, %cst_28 [1] : vector<8x8xf32> to vector<8xf32>
      %86 = vector.shape_cast %85 : vector<8xf32> to vector<8x1xf32>
      %87 = vector.broadcast %86 : vector<8x1xf32> to vector<8x8xf32>
      %88 = arith.subf %84, %87 : vector<8x8xf32>
      %89 = math.exp %88 : vector<8x8xf32>
      %cst_29 = arith.constant dense<0.000000e+00> : vector<8xf32>
      %90 = vector.multi_reduction <add>, %89, %cst_29 [1] : vector<8x8xf32> to vector<8xf32>
      %91 = vector.shape_cast %90 : vector<8xf32> to vector<8x1xf32>
      %92 = math.log %91 : vector<8x1xf32>
      %93 = arith.addf %86, %92 : vector<8x1xf32>
      %94 = vector.broadcast %93 : vector<8x1xf32> to vector<8x8xf32>
      %95 = arith.subf %84, %94 : vector<8x8xf32>
      %96 = arith.mulf %95, %67 : vector<8x8xf32>
      %97 = arith.mulf %96, %78 : vector<8x8xf32>
      %98 = vector.shape_cast %97 : vector<8x8xf32> to vector<1x8x8xf32>
      %cst_30 = arith.constant dense<0.000000e+00> : vector<1xf32>
      %99 = vector.multi_reduction <add>, %98, %cst_30 [1, 2] : vector<1x8x8xf32> to vector<1xf32>
      %100 = vector.shape_cast %99 : vector<1xf32> to vector<1x1x1xf32>
      %101 = vector.extract %100[0, 0, 0] : f32 from vector<1x1x1xf32>
      %102 = vector.broadcast %101 : f32 to vector<1x1xf32>
      %103 = arith.divf %102, %32 : vector<1x1xf32>
      %cst_31 = arith.constant 0.000000e+00 : f32
      %104 = vector.broadcast %cst_31 : f32 to vector<1x1xf32>
      %105 = arith.subf %104, %103 : vector<1x1xf32>
      %cst_32 = arith.constant 0.000000e+00 : f32
      %106 = vector.broadcast %cst_32 : f32 to vector<1x1xf32>
      %107 = arith.subf %106, %103 : vector<1x1xf32>
      %cst_33 = arith.constant 5.000000e-01 : f32
      %108 = vector.broadcast %cst_33 : f32 to vector<1x1xf32>
      %109 = arith.mulf %108, %105 : vector<1x1xf32>
      %cst_34 = arith.constant 5.000000e-01 : f32
      %110 = vector.broadcast %cst_34 : f32 to vector<1x1xf32>
      %111 = arith.mulf %110, %107 : vector<1x1xf32>
      %112 = arith.addf %109, %111 : vector<1x1xf32>
      %c0_35 = arith.constant 0 : index
      %c0_36 = arith.constant 0 : index
      %113 = vector.load %arg15[%c0_35, %c0_36] : memref<1x1xf32, #tpu.memory_space<vmem>>, vector<1x1xf32>
      tpu.vector_store %arg15[%c0_35, %c0_36], %112 {strides = array<i32>} : memref<1x1xf32, #tpu.memory_space<vmem>>, vector<1x1xf32>,
      %cst_37 = arith.constant dense<0.000000e+00> : vector<8x8xf32>
      %114 = tpu.matmul %58, %58, %cst_37 {dimension_numbers = #tpu.dot_dimension_numbers<[1], [1], [0], [0], [0, 0, 1, 0], [], []>} : vector<8x128xbf16>, vector<8x128xbf16>, vector<8x8xf32> -> vector<8x8xf32>
      %cst_38 = arith.constant 2.000000e+00 : f32
      %115 = vector.broadcast %cst_38 : f32 to vector<8x8xf32>
      %116 = arith.mulf %115, %114 : vector<8x8xf32>
      %cst_39 = arith.constant 2.000000e+00 : f32
      %117 = vector.broadcast %cst_39 : f32 to vector<8x8xf32>
      %118 = arith.subf %117, %116 : vector<8x8xf32>
      %cst_40 = arith.constant 9.99999996E-13 : f32
      %119 = vector.broadcast %cst_40 : f32 to vector<8x8xf32>
      %120 = arith.maximumf %118, %119 : vector<8x8xf32>
      %121 = math.sqrt %120 : vector<8x8xf32>
      %122 = arith.mulf %70, %74 : vector<8x8xf32>
      %123 = arith.mulf %122, %78 : vector<8x8xf32>
      %cst_41 = arith.constant 1.000000e+00 : f32
      %124 = vector.broadcast %cst_41 : f32 to vector<1x1xf32>
      %125 = arith.subf %30, %124 : vector<1x1xf32>
      %126 = arith.mulf %30, %125 : vector<1x1xf32>
      %cst_42 = arith.constant 5.000000e-01 : f32
      %127 = vector.broadcast %cst_42 : f32 to vector<1x1xf32>
      %128 = arith.mulf %126, %127 : vector<1x1xf32>
      %129 = arith.mulf %121, %123 : vector<8x8xf32>
      %130 = vector.shape_cast %129 : vector<8x8xf32> to vector<1x8x8xf32>
      %cst_43 = arith.constant dense<0.000000e+00> : vector<1xf32>
      %131 = vector.multi_reduction <add>, %130, %cst_43 [1, 2] : vector<1x8x8xf32> to vector<1xf32>
      %132 = vector.shape_cast %131 : vector<1xf32> to vector<1x1x1xf32>
      %133 = vector.extract %132[0, 0, 0] : f32 from vector<1x1x1xf32>
      %134 = vector.broadcast %133 : f32 to vector<1x1xf32>
      %cst_44 = arith.constant 1.000000e+00 : f32
      %135 = vector.broadcast %cst_44 : f32 to vector<1x1xf32>
      %136 = arith.maximumf %128, %135 : vector<1x1xf32>
      %137 = arith.divf %134, %136 : vector<1x1xf32>
      %c0_45 = arith.constant 0 : index
      %c0_46 = arith.constant 0 : index
      %138 = vector.load %arg16[%c0_45, %c0_46] : memref<1x1xf32, #tpu.memory_space<vmem>>, vector<1x1xf32>
      tpu.vector_store %arg16[%c0_45, %c0_46], %137 {strides = array<i32>} : memref<1x1xf32, #tpu.memory_space<vmem>>, vector<1x1xf32>,
    } else {
    }
    %c1_i32 = arith.constant 1 : i32
    %13 = arith.cmpi eq, %arg0, %c1_i32 : i32
    %14 = arith.extui %13 : i1 to i32
    %c0_i32_7 = arith.constant 0 : i32
    %15 = arith.cmpi ne, %14, %c0_i32_7 : i32
    scf.if %15 {
      %c0 = arith.constant 0 : index
      %c0_11 = arith.constant 0 : index
      %21 = vector.load %arg3[%c0, %c0_11] : memref<512x1xi32, #tpu.memory_space<vmem>>, vector<512x1xi32>
      %22 = tpu.iota {dimensions = array<i32: 1>} : vector<512x8xi32>
      %23 = vector.broadcast %21 : vector<512x1xi32> to vector<512x8xi32>
      %24 = arith.cmpi eq, %22, %23 : vector<512x8xi32>
      %25 = arith.extui %24 : vector<512x8xi1> to vector<512x8xi32>
      %26 = arith.sitofp %25 : vector<512x8xi32> to vector<512x8xf32>
      %27 = arith.truncf %26 : vector<512x8xf32> to vector<512x8xbf16>
      %c0_12 = arith.constant 0 : index
      %c0_13 = arith.constant 0 : index
      %28 = vector.load %arg12[%c0_12, %c0_13] : memref<8x128xbf16, #tpu.memory_space<vmem>>, vector<8x128xbf16>
      %cst = arith.constant dense<0.000000e+00> : vector<512x128xf32>
      %29 = tpu.matmul %27, %28, %cst {dimension_numbers = #tpu.dot_dimension_numbers<[1], [0], [0], [1], [0, 0, 1, 1], [], []>} : vector<512x8xbf16>, vector<8x128xbf16>, vector<512x128xf32> -> vector<512x128xf32>
      %c0_14 = arith.constant 0 : index
      %c0_15 = arith.constant 0 : index
      %30 = vector.load %arg6[%c0_14, %c0_15] : memref<512x128xbf16, #tpu.memory_space<vmem>>, vector<512x128xbf16>
      %31 = arith.extf %30 : vector<512x128xbf16> to vector<512x128xf32>
      %32 = arith.mulf %31, %29 : vector<512x128xf32>
      %cst_16 = arith.constant dense<0.000000e+00> : vector<512xf32>
      %33 = vector.multi_reduction <add>, %32, %cst_16 [1] : vector<512x128xf32> to vector<512xf32>
      %34 = vector.shape_cast %33 : vector<512xf32> to vector<512x1xf32>
      %35 = arith.mulf %31, %31 : vector<512x128xf32>
      %cst_17 = arith.constant dense<0.000000e+00> : vector<512xf32>
      %36 = vector.multi_reduction <add>, %35, %cst_17 [1] : vector<512x128xf32> to vector<512xf32>
      %37 = vector.shape_cast %36 : vector<512xf32> to vector<512x1xf32>
      %cst_18 = arith.constant 2.000000e+00 : f32
      %38 = vector.broadcast %cst_18 : f32 to vector<512x1xf32>
      %39 = arith.mulf %38, %34 : vector<512x1xf32>
      %cst_19 = arith.constant 1.000000e-24 : f32
      %40 = vector.broadcast %cst_19 : f32 to vector<512x1xf32>
      %41 = arith.maximumf %37, %40 : vector<512x1xf32>
      %42 = math.rsqrt %41 : vector<512x1xf32>
      %43 = arith.mulf %39, %42 : vector<512x1xf32>
      %cst_20 = arith.constant 2.000000e+00 : f32
      %44 = vector.broadcast %cst_20 : f32 to vector<512x1xf32>
      %45 = arith.subf %44, %43 : vector<512x1xf32>
      %c0_21 = arith.constant 0 : index
      %c0_22 = arith.constant 0 : index
      %46 = vector.load %arg4[%c0_21, %c0_22] : memref<512x1xf32, #tpu.memory_space<vmem>>, vector<512x1xf32>
      %cst_23 = arith.constant 2.000000e+00 : f32
      %47 = vector.broadcast %cst_23 : f32 to vector<512x1xf32>
      %48 = arith.subf %47, %46 : vector<512x1xf32>
      %cst_24 = arith.constant 2.000000e-01 : f32
      %49 = vector.broadcast %cst_24 : f32 to vector<512x1xf32>
      %50 = arith.addf %48, %49 : vector<512x1xf32>
      %c0_25 = arith.constant 0 : index
      %c0_26 = arith.constant 0 : index
      %51 = vector.load %arg5[%c0_25, %c0_26] : memref<512x1xf32, #tpu.memory_space<vmem>>, vector<512x1xf32>
      %cst_27 = arith.constant 0.000000e+00 : f32
      %52 = vector.broadcast %cst_27 : f32 to vector<512x1xf32>
      %53 = arith.maximumf %45, %52 : vector<512x1xf32>
      %54 = math.sqrt %53 : vector<512x1xf32>
      %55 = arith.mulf %54, %50 : vector<512x1xf32>
      %56 = arith.mulf %55, %51 : vector<512x1xf32>
      %c0_28 = arith.constant 0 : index
      %c0_29 = arith.constant 0 : index
      %57 = vector.load %arg13[%c0_28, %c0_29] : memref<1x1xf32, #tpu.memory_space<vmem>>, vector<1x1xf32>
      %58 = vector.shape_cast %56 : vector<512x1xf32> to vector<1x512x1xf32>
      %cst_30 = arith.constant dense<0.000000e+00> : vector<1xf32>
      %59 = vector.multi_reduction <add>, %58, %cst_30 [1, 2] : vector<1x512x1xf32> to vector<1xf32>
      %60 = vector.shape_cast %59 : vector<1xf32> to vector<1x1x1xf32>
      %61 = vector.extract %60[0, 0, 0] : f32 from vector<1x1x1xf32>
      %62 = vector.broadcast %61 : f32 to vector<1x1xf32>
      %63 = arith.addf %57, %62 : vector<1x1xf32>
      %c0_31 = arith.constant 0 : index
      %c0_32 = arith.constant 0 : index
      %64 = vector.load %arg13[%c0_31, %c0_32] : memref<1x1xf32, #tpu.memory_space<vmem>>, vector<1x1xf32>
      tpu.vector_store %arg13[%c0_31, %c0_32], %63 {strides = array<i32>} : memref<1x1xf32, #tpu.memory_space<vmem>>, vector<1x1xf32>,
      %c0_33 = arith.constant 0 : index
      %c0_34 = arith.constant 0 : index
      %65 = vector.load %arg14[%c0_33, %c0_34] : memref<1x1xf32, #tpu.memory_space<vmem>>, vector<1x1xf32>
      %66 = vector.shape_cast %51 : vector<512x1xf32> to vector<1x512x1xf32>
      %cst_35 = arith.constant dense<0.000000e+00> : vector<1xf32>
      %67 = vector.multi_reduction <add>, %66, %cst_35 [1, 2] : vector<1x512x1xf32> to vector<1xf32>
      %68 = vector.shape_cast %67 : vector<1xf32> to vector<1x1x1xf32>
      %69 = vector.extract %68[0, 0, 0] : f32 from vector<1x1x1xf32>
      %70 = vector.broadcast %69 : f32 to vector<1x1xf32>
      %71 = arith.addf %65, %70 : vector<1x1xf32>
      %c0_36 = arith.constant 0 : index
      %c0_37 = arith.constant 0 : index
      %72 = vector.load %arg14[%c0_36, %c0_37] : memref<1x1xf32, #tpu.memory_space<vmem>>, vector<1x1xf32>
      tpu.vector_store %arg14[%c0_36, %c0_37], %71 {strides = array<i32>} : memref<1x1xf32, #tpu.memory_space<vmem>>, vector<1x1xf32>,
    } else {
    }
    %c1_i32_8 = arith.constant 1 : i32
    %16 = arith.cmpi eq, %arg0, %c1_i32_8 : i32
    %c0_i32_9 = arith.constant 0 : i32
    %17 = arith.cmpi eq, %arg1, %c0_i32_9 : i32
    %18 = arith.andi %16, %17 : i1
    %19 = arith.extui %18 : i1 to i32
    %c0_i32_10 = arith.constant 0 : i32
    %20 = arith.cmpi ne, %19, %c0_i32_10 : i32
    scf.if %20 {
      %c0 = arith.constant 0 : index
      %c0_11 = arith.constant 0 : index
      %21 = vector.load %arg13[%c0, %c0_11] : memref<1x1xf32, #tpu.memory_space<vmem>>, vector<1x1xf32>
      %c0_12 = arith.constant 0 : index
      %c0_13 = arith.constant 0 : index
      %22 = vector.load %arg14[%c0_12, %c0_13] : memref<1x1xf32, #tpu.memory_space<vmem>>, vector<1x1xf32>
      %cst = arith.constant 1.000000e+00 : f32
      %23 = vector.broadcast %cst : f32 to vector<1x1xf32>
      %24 = arith.maximumf %22, %23 : vector<1x1xf32>
      %25 = arith.divf %21, %24 : vector<1x1xf32>
      %26 = tpu.iota {dimensions = array<i32: 1>} : vector<1x128xi32>
      %c0_i32_14 = arith.constant 0 : i32
      %27 = vector.broadcast %c0_i32_14 : i32 to vector<1x128xi32>
      %28 = arith.cmpi eq, %26, %27 : vector<1x128xi32>
      %c0_15 = arith.constant 0 : index
      %c0_16 = arith.constant 0 : index
      %29 = vector.load %arg15[%c0_15, %c0_16] : memref<1x1xf32, #tpu.memory_space<vmem>>, vector<1x1xf32>
      %cst_17 = arith.constant 0.000000e+00 : f32
      %30 = vector.shape_cast %29 : vector<1x1xf32> to vector<1x1xf32>
      %31 = vector.broadcast %30 : vector<1x1xf32> to vector<1x128xf32>
      %32 = vector.broadcast %cst_17 : f32 to vector<1x128xf32>
      %33 = arith.select %28, %31, %32 : vector<1x128xi1>, vector<1x128xf32>
      %c1_i32_18 = arith.constant 1 : i32
      %34 = vector.broadcast %c1_i32_18 : i32 to vector<1x128xi32>
      %35 = arith.cmpi eq, %26, %34 : vector<1x128xi32>
      %c0_19 = arith.constant 0 : index
      %c0_20 = arith.constant 0 : index
      %36 = vector.load %arg16[%c0_19, %c0_20] : memref<1x1xf32, #tpu.memory_space<vmem>>, vector<1x1xf32>
      %cst_21 = arith.constant 0.000000e+00 : f32
      %37 = vector.shape_cast %36 : vector<1x1xf32> to vector<1x1xf32>
      %38 = vector.broadcast %37 : vector<1x1xf32> to vector<1x128xf32>
      %39 = vector.broadcast %cst_21 : f32 to vector<1x128xf32>
      %40 = arith.select %35, %38, %39 : vector<1x128xi1>, vector<1x128xf32>
      %41 = arith.addf %33, %40 : vector<1x128xf32>
      %c2_i32 = arith.constant 2 : i32
      %42 = vector.broadcast %c2_i32 : i32 to vector<1x128xi32>
      %43 = arith.cmpi eq, %26, %42 : vector<1x128xi32>
      %cst_22 = arith.constant 0.000000e+00 : f32
      %44 = vector.shape_cast %25 : vector<1x1xf32> to vector<1x1xf32>
      %45 = vector.broadcast %44 : vector<1x1xf32> to vector<1x128xf32>
      %46 = vector.broadcast %cst_22 : f32 to vector<1x128xf32>
      %47 = arith.select %43, %45, %46 : vector<1x128xi1>, vector<1x128xf32>
      %48 = arith.addf %41, %47 : vector<1x128xf32>
      %c0_23 = arith.constant 0 : index
      %c0_24 = arith.constant 0 : index
      %49 = vector.load %arg8[%c0_23, %c0_24] : memref<1x128xf32, #tpu.memory_space<vmem>>, vector<1x128xf32>
      tpu.vector_store %arg8[%c0_23, %c0_24], %48 {strides = array<i32>} : memref<1x128xf32, #tpu.memory_space<vmem>>, vector<1x128xf32>,
    } else {
    }
    return
  }
  func.func @transform_0(%arg0: i32, %arg1: i32) -> (i32, i32) {
    %c1_i32 = arith.constant 1 : i32
    %0 = arith.subi %c1_i32, %arg0 : i32
    %1 = arith.muli %arg1, %0 : i32
    %c0_i32 = arith.constant 0 : i32
    %c0_i32_0 = arith.constant 0 : i32
    return %c0_i32, %1 : i32, i32
  }
  func.func @transform_1(%arg0: i32, %arg1: i32) -> (i32, i32) {
    %0 = arith.muli %arg1, %arg0 : i32
    %c0_i32 = arith.constant 0 : i32
    %c0_i32_0 = arith.constant 0 : i32
    return %0, %c0_i32 : i32, i32
  }
  func.func @transform_2(%arg0: i32, %arg1: i32) -> (i32, i32) {
    %0 = arith.muli %arg1, %arg0 : i32
    %c0_i32 = arith.constant 0 : i32
    %c0_i32_0 = arith.constant 0 : i32
    return %0, %c0_i32 : i32, i32
  }
  func.func @transform_3(%arg0: i32, %arg1: i32) -> (i32, i32) {
    %0 = arith.muli %arg1, %arg0 : i32
    %c0_i32 = arith.constant 0 : i32
    %c0_i32_0 = arith.constant 0 : i32
    return %0, %c0_i32 : i32, i32
  }
  func.func @transform_4(%arg0: i32, %arg1: i32) -> (i32, i32) {
    %c0_i32 = arith.constant 0 : i32
    %c0_i32_0 = arith.constant 0 : i32
    return %arg1, %c0_i32 : i32, i32
  }
  func.func @transform_5(%arg0: i32, %arg1: i32) -> (i32, i32) {
    %c1_i32 = arith.constant 1 : i32
    %0 = arith.subi %c1_i32, %arg0 : i32
    %1 = arith.muli %arg1, %0 : i32
    %c0_i32 = arith.constant 0 : i32
    %c0_i32_0 = arith.constant 0 : i32
    return %1, %c0_i32 : i32, i32
  }
  func.func @transform_6(%arg0: i32, %arg1: i32) -> (i32, i32) {
    %c0_i32 = arith.constant 0 : i32
    %c0_i32_0 = arith.constant 0 : i32
    %c0_i32_1 = arith.constant 0 : i32
    return %c0_i32, %c0_i32_0 : i32, i32
  }
}

</mosaic_0001>

<bundles_post_ra>
// kernel: tpu_custom_call.1
= control target key start
LH: loop header
LB: loop body
LE: loop exit
PB: predicated region body
PF: predicated region fallthrough
CT: control target
= control target key end

     0   :  { %11 = vsyncpa [#allocation11], 0  ;;  %s5495_s21 = smov 0   ;;  %s5497_s22 = smov 0   ;;  %s8956_s0 = inlined_call_operand.vmem [shape: s32[1,512], index: 0, kind: input, shape index: {}]   ;;  %s8957_s1 = inlined_call_operand.vmem [shape: s32[512,1], index: 1, kind: input, shape index: {}]   ;;  %s8958_s2 = inlined_call_operand.vmem [shape: f32[512,1], index: 2, kind: input, shape index: {}]   ;;  %s8959_s3 = inlined_call_operand.vmem [shape: f32[512,1], index: 3, kind: input, shape index: {}]   ;;  %s8960_s4 = inlined_call_operand.vmem [shape: bf16[512,128], index: 4, kind: input, shape index: {}]   ;;  %s8961_s5 = inlined_call_operand.vmem [shape: bf16[512,128], index: 5, kind: input, shape index: {}]   ;;  %s8962_s6 = inlined_call_operand.hbm [shape: f32[1,128], index: 6, kind: output, shape index: {}]  }
   0x1   :  { %s5499_s23 = smov 0  }
   0x2 LB: > { %s4411_s24 = sadd.s32 4294967295, %s5448_s23   ;;  %s29_s25 = sadd.s32 1, %s5444_s22  ;;  %s5448_s23 = sphi %s5499_s23, %s17_s23   ;;  %s5444_s22 = sphi %s5497_s22, %s9342_s22   ;;  %s5440_s21 = sphi %s5495_s21, %s9341_s21  }
   0x3   : > { %p31_p0 = scmp.ge.s32.totalorder %s29_s25, 2  ;;  %p4420_p1 = scmp.ge.s32.totalorder %s5448_s23, 1 }
   0x4   : > { %p303_p2 = scmp.lt.s32.totalorder %s5448_s23, 3 }
   0x5   : > { %s9344_s25 = smov (%p31_p0, %s29_s25), 0 }
   0x6   : > { %p304_p3 = pnand %p4420_p1, %p303_p2 }
   0x7   : > { %p409_p4 = scmp.eq.s32.totalorder (!%p304_p3), %s5440_s21, 0 }
   0x8   : > { %307 = sbr.rel (%p304_p3) target bundleno = 2640 (0xa50), region = 44 }
   0xf   : > { %414 = sbr.rel (!%p409_p4) target bundleno = 22 (0x16), region = 48  ;;  %vm417_vm0 = vcmask (%p409_p4), 7168   ;;  %vm419_vm1 = vcmask (%p409_p4), 0   ;;  %v5450_v0 = vmov (%p409_p4), 0.0  }
  0x10   : > { %415 = vst [vmem:[#allocation2] sm:$0xff] (%p409_p4), %v5450_v0  ;;  %416 = vst [vmem:[#allocation3] sm:$0xff] (%p409_p4), %v5450_v0 }
  0x11   : > { %424 = vst [vmem:[#allocation10] sm:$0x1] (%p409_p4), %v5450_v0  ;;  %418 = vst.msk [vmem:[#allocation4] sm:$0xff] (%p409_p4), %vm417_vm0, %v5450_v0 }
  0x12   : > { %420 = vst.msk [vmem:[#allocation6] sm:$0x1] (%p409_p4), %vm419_vm1, %v5450_v0  ;;  %421 = vst.msk [vmem:[#allocation7] sm:$0x1] (%p409_p4), %vm419_vm1, %v5450_v0 }
  0x13   : > { %422 = vst.msk [vmem:[#allocation8] sm:$0x1] (%p409_p4), %vm419_vm1, %v5450_v0  ;;  %423 = vst.msk [vmem:[#allocation9] sm:$0x1] (%p409_p4), %vm419_vm1, %v5450_v0 }
  0x16 PF: > { %p4422_p5 = scmp.ne.s32.totalorder %s5440_s21, 0 }
  0x17   : > { %v5033_v1 = vld [vmem:[%s8960_s4 + $0x40] sm:$0xff] (!%p4422_p5)   ;;  %v5037_v5 = vld [vmem:[%s8960_s4 + $0x48] sm:$0xff] (!%p4422_p5)   ;;  %v5041_v9 = vld [vmem:[%s8960_s4 + $0x50] sm:$0xff] (!%p4422_p5)   ;;  %v429_v20 = vlaneseq (!%p4422_p5)  ;;  %v5451_v47 = vmov (!%p4422_p5), 0.0   ;;  %v5452_v53 = vmov (!%p4422_p5), 1.0|1.0  }
  0x18   : > { %427 = sbr.rel (%p4422_p5) target bundleno = 310 (0x136), region = 52  ;;  %v5034_v2 = vld [vmem:[%s8960_s4 + $0xc0] sm:$0xff] (!%p4422_p5)   ;;  %4776 = vmatprep.subr.bf16.mxu0 (!%p4422_p5), %v5033_v1  ;;  %v5038_v6 = vld [vmem:[%s8960_s4 + $0xc8] sm:$0xff] (!%p4422_p5)   ;;  %v5042_v10 = vld [vmem:[%s8960_s4 + $0xd0] sm:$0xff] (!%p4422_p5)   ;;  %vm1148_vm10 = vcmask (!%p4422_p5), 7168  }
  0x19   : > { %v5035_v3 = vld [vmem:[%s8960_s4] sm:$0xff] (!%p4422_p5)   ;;  %4798 = vmatprep.subr.bf16.mxu1 (!%p4422_p5), %v5034_v2  ;;  %v5039_v7 = vld [vmem:[%s8960_s4 + $0x8] sm:$0xff] (!%p4422_p5)   ;;  %v5043_v11 = vld [vmem:[%s8960_s4 + $0x10] sm:$0xff] (!%p4422_p5)   ;;  %v430_v25 = vshrl.u32 (!%p4422_p5), %v429_v20, 7 }
  0x1a   : > { %v5036_v4 = vld [vmem:[%s8960_s4 + $0x80] sm:$0xff] (!%p4422_p5)   ;;  %4777 = vmatpush3.bf16.msra.mxu0 (!%p4422_p5), %v5035_v3  ;;  %v5040_v8 = vld [vmem:[%s8960_s4 + $0x88] sm:$0xff] (!%p4422_p5)   ;;  %v5044_v12 = vld [vmem:[%s8960_s4 + $0x90] sm:$0xff] (!%p4422_p5)  }
  0x1b   : > { %4799 = vmatpush3.bf16.msra.mxu1 (!%p4422_p5), %v5036_v4  ;;  %4778 = vmatprep.subr.bf16.mxu0 (!%p4422_p5), %v5037_v5  ;;  %v5045_v13 = vld [vmem:[%s8960_s4 + $0x58] sm:$0xff] (!%p4422_p5)   ;;  %v5049_v17 = vld [vmem:[%s8960_s4 + $0x60] sm:$0xff] (!%p4422_p5)   ;;  %v5053_v22 = vld [vmem:[%s8960_s4 + $0x68] sm:$0xff] (!%p4422_p5)   ;;  %v433_v30 = vsub.s32 (!%p4422_p5), 0, %v430_v25  ;;  %v437_v32 = vsub.s32 (!%p4422_p5), 1, %v430_v25  ;;  %v445_v34 = vsub.s32 (!%p4422_p5), 3, %v430_v25 }
  0x1c   : > { %4800 = vmatprep.subr.bf16.mxu1 (!%p4422_p5), %v5038_v6  ;;  %v5046_v14 = vld [vmem:[%s8960_s4 + $0xd8] sm:$0xff] (!%p4422_p5)   ;;  %v5050_v18 = vld [vmem:[%s8960_s4 + $0xe0] sm:$0xff] (!%p4422_p5)   ;;  %v5054_v23 = vld [vmem:[%s8960_s4 + $0xe8] sm:$0xff] (!%p4422_p5)   ;;  %v441_v36 = vsub.s32 (!%p4422_p5), 2, %v430_v25 }
  0x1d   : > { %v5047_v15 = vld [vmem:[%s8960_s4 + $0x18] sm:$0xff] (!%p4422_p5)   ;;  %v5051_v19 = vld [vmem:[%s8960_s4 + $0x20] sm:$0xff] (!%p4422_p5)   ;;  %v5055_v24 = vld [vmem:[%s8960_s4 + $0x28] sm:$0xff] (!%p4422_p5)  }
  0x1e   : > { %4779 = vmatpush3.bf16.msra.mxu0 (!%p4422_p5), %v5039_v7  ;;  %v5048_v16 = vld [vmem:[%s8960_s4 + $0x98] sm:$0xff] (!%p4422_p5)   ;;  %v5052_v21 = vld [vmem:[%s8960_s4 + $0xa0] sm:$0xff] (!%p4422_p5)   ;;  %v5056_v26 = vld [vmem:[%s8960_s4 + $0xa8] sm:$0xff] (!%p4422_p5)  }
  0x1f   : > { %4801 = vmatpush3.bf16.msra.mxu1 %v5040_v8  ;;  %4780 = vmatprep.subr.bf16.mxu0 %v5041_v9  ;;  %v5057_v27 = vld [vmem:[%s8960_s4 + $0x70] sm:$0xff]   ;;  %v5061_v33 = vld [vmem:[%s8960_s4 + $0x78] sm:$0xff]   ;;  %v428_v39 = vld [vmem:[%s8956_s0] sm:$0xf] }
  0x20   : > { %4802 = vmatprep.subr.bf16.mxu1 %v5042_v10  ;;  %v5058_v28 = vld [vmem:[%s8960_s4 + $0xf0] sm:$0xff]   ;;  %v5062_v35 = vld [vmem:[%s8960_s4 + $0xf8] sm:$0xff]   ;;  %v434_v40 = vrot.slane %v428_v39, %v433_v30  ;;  %v438_v41 = vrot.slane %v428_v39, %v437_v32  ;;  %v446_v42 = vrot.slane %v428_v39, %v445_v34  ;;  %v442_v43 = vrot.slane %v428_v39, %v441_v36  ;;  %v5065_v44 = vld [vmem:[%s8961_s5 + $0x40] sm:$0xff]  }
  0x21   : > { %v5059_v29 = vld [vmem:[%s8960_s4 + $0x30] sm:$0xff]   ;;  %v5063_v37 = vld [vmem:[%s8960_s4 + $0x38] sm:$0xff]   ;;  %v5066_v45 = vld [vmem:[%s8961_s5 + $0xc0] sm:$0xff]  }
  0x22   : > { %4781 = vmatpush3.bf16.msra.mxu0 %v5043_v11  ;;  %v5060_v31 = vld [vmem:[%s8960_s4 + $0xb0] sm:$0xff]   ;;  %v5064_v38 = vld [vmem:[%s8960_s4 + $0xb8] sm:$0xff]   ;;  %vm447_vm2 = vcmp.eq.s32.totalorder %v430_v25, %v434_v40  ;;  %vm448_vm3 = vcmp.eq.s32.totalorder %v430_v25, %v438_v41  ;;  %vm450_vm4 = vcmp.eq.s32.totalorder %v430_v25, %v446_v42  ;;  %vm449_vm5 = vcmp.eq.s32.totalorder %v430_v25, %v442_v43  ;;  %v5067_v46 = vld [vmem:[%s8961_s5] sm:$0xff]  }
  0x23   : > { %4803 = vmatpush3.bf16.msra.mxu1 %v5044_v12  ;;  %4782 = vmatprep.subr.bf16.mxu0 %v5045_v13  ;;  %v4423_v48 = vsel %vm447_vm2, 1.0, %v5451_v47  ;;  %v4424_v49 = vsel %vm448_vm3, 1.0, %v5451_v47  ;;  %vm5629_vm6 = vmpackc.low %vm448_vm3, %vm448_vm3  ;;  %v5068_v51 = vld [vmem:[%s8961_s5 + $0x80] sm:$0xff]   ;;  %v4425_v52 = vsel %vm449_vm5, 1.0, %v5451_v47  ;;  %v5069_v57 = vld [vmem:[%s8961_s5 + $0x48] sm:$0xff]   ;;  %v4426_v58 = vsel %vm450_vm4, 1.0, %v5451_v47 }
  0x24   : > { %4804 = vmatprep.subr.bf16.mxu1 %v5046_v14  ;;  %4460 = vmatprep.mubr.msk.bf16.mxu0 %vm5629_vm6, %v5452_v53  ;;  %v1142_v54 = vadd.f32 %v4424_v49, %v4423_v48  ;;  %vm5642_vm7 = vmpackc.low %vm450_vm4, %vm450_vm4  ;;  %v5070_v60 = vld [vmem:[%s8961_s5 + $0xc8] sm:$0xff]   ;;  %v5073_v1 = vld [vmem:[%s8961_s5 + $0x50] sm:$0xff]  }
  0x25   : > { %4464 = vmatprep.mubr.msk.bf16.mxu1 %vm5642_vm7, %v5452_v53  ;;  %vm5651_vm8 = vmpackc.low %vm447_vm2, %vm447_vm2  ;;  %v5071_v62 = vld [vmem:[%s8961_s5 + $0x8] sm:$0xff]   ;;  %v5074_v2 = vld [vmem:[%s8961_s5 + $0xd0] sm:$0xff]  }
  0x26   : > { %4783 = vmatpush3.bf16.msra.mxu0 %v5047_v15  ;;  %vm5664_vm9 = vmpackc.low %vm449_vm5, %vm449_vm5  ;;  %v1143_v61 = vadd.f32 %v4425_v52, %v1142_v54  ;;  %v5072_v63 = vld [vmem:[%s8961_s5 + $0x88] sm:$0xff]   ;;  %v5075_v3 = vld [vmem:[%s8961_s5 + $0x10] sm:$0xff]  }
  0x27   : > { %4805 = vmatpush3.bf16.msra.mxu1 %v5048_v16  ;;  %4784 = vmatprep.subr.bf16.mxu0 %v5049_v17  ;;  %v5076_v4 = vld [vmem:[%s8961_s5 + $0x90] sm:$0xff]   ;;  %v5077_v5 = vld [vmem:[%s8961_s5 + $0x58] sm:$0xff]   ;;  %v5081_v9 = vld [vmem:[%s8961_s5 + $0x60] sm:$0xff]  }
  0x28   : > { %4806 = vmatprep.subr.bf16.mxu1 %v5050_v18  ;;  %v1144_v0 = vadd.f32 %v4426_v58, %v1143_v61  ;;  %v5078_v6 = vld [vmem:[%s8961_s5 + $0xd8] sm:$0xff]   ;;  %v5082_v10 = vld [vmem:[%s8961_s5 + $0xe0] sm:$0xff]   ;;  %v5085_v13 = vld [vmem:[%s8961_s5 + $0x68] sm:$0xff]  }
  0x29   : > { %v5079_v7 = vld [vmem:[%s8961_s5 + $0x18] sm:$0xff]   ;;  %v5083_v11 = vld [vmem:[%s8961_s5 + $0x20] sm:$0xff]   ;;  %v5086_v14 = vld [vmem:[%s8961_s5 + $0xe8] sm:$0xff]  }
  0x2a   : > { %4785 = vmatpush3.bf16.msra.mxu0 %v5051_v19  ;;  %1145 = vadd.xlane.f32.xlu0 %v1144_v0  ;;  %v5080_v8 = vld [vmem:[%s8961_s5 + $0x98] sm:$0xff]   ;;  %v5084_v12 = vld [vmem:[%s8961_s5 + $0xa0] sm:$0xff]   ;;  %v5087_v15 = vld [vmem:[%s8961_s5 + $0x28] sm:$0xff]  }
  0x2b   : > { %4807 = vmatpush3.bf16.msra.mxu1 %v5052_v21  ;;  %4786 = vmatprep.subr.bf16.mxu0 %v5053_v22  ;;  %v5088_v16 = vld [vmem:[%s8961_s5 + $0xa8] sm:$0xff]   ;;  %v5089_v17 = vld [vmem:[%s8961_s5 + $0x70] sm:$0xff]   ;;  %v5093_v21 = vld [vmem:[%s8961_s5 + $0x78] sm:$0xff]  }
  0x2c   : > { %4808 = vmatprep.subr.bf16.mxu1 %v5054_v23  ;;  %v5090_v18 = vld [vmem:[%s8961_s5 + $0xf0] sm:$0xff]   ;;  %v5094_v22 = vld [vmem:[%s8961_s5 + $0xf8] sm:$0xff]   ;;  %v802_v50 = vld [vmem:[#allocation3] sm:$0xff] }
  0x2d   : > { %v5091_v19 = vld [vmem:[%s8961_s5 + $0x30] sm:$0xff]   ;;  %v5095_v23 = vld [vmem:[%s8961_s5 + $0x38] sm:$0xff]  }
  0x2e   : > { %4787 = vmatpush3.bf16.msra.mxu0 %v5055_v24  ;;  %v5092_v20 = vld [vmem:[%s8961_s5 + $0xb0] sm:$0xff]   ;;  %v5096_v24 = vld [vmem:[%s8961_s5 + $0xb8] sm:$0xff]  }
  0x2f   : > { %4809 = vmatpush3.bf16.msra.mxu1 %v5056_v26  ;;  %4788 = vmatprep.subr.bf16.mxu0 %v5057_v27  ;;  %v1141_v25 = vld [vmem:[#allocation4] sm:$0xff] }
  0x30   : > { %4810 = vmatprep.subr.bf16.mxu1 %v5058_v28 }
  0x32   : > { %4789 = vmatpush3.bf16.msra.mxu0 %v5059_v29 }
  0x33   : > { %4811 = vmatpush3.bf16.msra.mxu1 %v5060_v31  ;;  %4790 = vmatprep.subr.bf16.mxu0 %v5061_v33 }
  0x34   : > { %4812 = vmatprep.subr.bf16.mxu1 %v5062_v35 }
  0x36   : > { %4791 = vmatpush3.bf16.msra.mxu0 %v5063_v37  ;;  %v463_v37 = vld [vmem:[#allocation2] sm:$0xff] }
  0x37   : > { %4813 = vmatpush3.bf16.msra.mxu1 %v5064_v38  ;;  %4820 = vmatprep.subr.bf16.mxu0 %v5065_v44 }
  0x38   : > { %4842 = vmatprep.subr.bf16.mxu1 %v5066_v45 }
  0x39   : > { %4462 = vmatmul.mubr.msk.bf16.vlgmr.msra.gmra.mrb[0].mxu0 %vm5651_vm8, %v5452_v53 }
  0x3a   : > { %4466 = vmatmul.mubr.msk.bf16.vlgmr.msra.gmra.mrb[0].mxu1 %vm5664_vm9, %v5452_v53  ;;  %4821 = vmatpush3.bf16.msra.mxu0 %v5067_v46 }
  0x3b   : > { %4843 = vmatpush3.bf16.msra.mxu1 %v5068_v51  ;;  %4822 = vmatprep.subr.bf16.mxu0 %v5069_v57 }
  0x3c   : > { %4844 = vmatprep.subr.bf16.mxu1 %v5070_v60  ;;  %4500 = vmatprep.mubr.msk.bf16.mxu0 %vm5629_vm6, %v5452_v53 }
  0x3d   : > { %4504 = vmatprep.mubr.msk.bf16.mxu1 %vm5642_vm7, %v5452_v53 }
  0x3e   : > { %4823 = vmatpush3.bf16.msra.mxu0 %v5071_v62 }
  0x3f   : > { %4845 = vmatpush3.bf16.msra.mxu1 %v5072_v63  ;;  %4824 = vmatprep.subr.bf16.mxu0 %v5073_v1 }
  0x40   : > { %4846 = vmatprep.subr.bf16.mxu1 %v5074_v2 }
  0x42   : > { %4825 = vmatpush3.bf16.msra.mxu0 %v5075_v3 }
  0x43   : > { %4847 = vmatpush3.bf16.msra.mxu1 %v5076_v4  ;;  %4826 = vmatprep.subr.bf16.mxu0 %v5077_v5 }
  0x44   : > { %4848 = vmatprep.subr.bf16.mxu1 %v5078_v6 }
  0x46   : > { %4827 = vmatpush3.bf16.msra.mxu0 %v5079_v7 }
  0x47   : > { %4849 = vmatpush3.bf16.msra.mxu1 %v5080_v8  ;;  %4828 = vmatprep.subr.bf16.mxu0 %v5081_v9 }
  0x48   : > { %4850 = vmatprep.subr.bf16.mxu1 %v5082_v10 }
  0x4a   : > { %4829 = vmatpush3.bf16.msra.mxu0 %v5083_v11 }
  0x4b   : > { %4851 = vmatpush3.bf16.msra.mxu1 %v5084_v12  ;;  %4830 = vmatprep.subr.bf16.mxu0 %v5085_v13 }
  0x4c   : > { %4852 = vmatprep.subr.bf16.mxu1 %v5086_v14 }
  0x4e   : > { %4831 = vmatpush3.bf16.msra.mxu0 %v5087_v15 }
  0x4f   : > { %4853 = vmatpush3.bf16.msra.mxu1 %v5088_v16  ;;  %4832 = vmatprep.subr.bf16.mxu0 %v5089_v17 }
  0x50   : > { %4854 = vmatprep.subr.bf16.mxu1 %v5090_v18 }
  0x52   : > { %4833 = vmatpush3.bf16.msra.mxu0 %v5091_v19 }
  0x53   : > { %4855 = vmatpush3.bf16.msra.mxu1 %v5092_v20  ;;  %4834 = vmatprep.subr.bf16.mxu0 %v5093_v21 }
  0x54   : > { %4856 = vmatprep.subr.bf16.mxu1 %v5094_v22 }
  0x56   : > { %4835 = vmatpush3.bf16.msra.mxu0 %v5095_v23 }
  0x57   : > { %4857 = vmatpush3.bf16.msra.mxu1 %v5096_v24 }
  0x59   : > { %4502 = vmatmul.mubr.msk.bf16.vlgmr.msra.gmra.mrb[4].mxu0 %vm5651_vm8, %v5452_v53 }
  0x5a   : > { %4506 = vmatmul.mubr.msk.bf16.vlgmr.msra.gmra.mrb[4].mxu1 %vm5664_vm9, %v5452_v53 }
  0xb7   : > { %v1146_v26 = vpop.xlane.xlu0 %1145 }
  0xb8   : > { %v1147_v27 = vadd.f32 %v1146_v26, %v1141_v25 }
  0xba   : > { %1149 = vst.msk [vmem:[#allocation4] sm:$0xff] %vm1148_vm10, %v1147_v27 }
 0x10c   : > { %v4792_v28 = vpop.f32.mrb[0].mxu0 }
 0x10d   : > { %v4814_v29 = vpop.f32.mrb[0].mxu1  ;;  %v4793_v30 = vpop.f32.mrb[1].mxu0 }
 0x10e   : > { %v4794_v31 = vadd.f32 %v4793_v30, %v4792_v28  ;;  %v4815_v32 = vpop.f32.mrb[1].mxu1  ;;  %v4795_v33 = vpop.f32.mrb[2].mxu0 }
 0x10f   : > { %v4816_v34 = vadd.f32 %v4815_v32, %v4814_v29  ;;  %v4817_v35 = vpop.f32.mrb[2].mxu1  ;;  %v4796_v36 = vpop.f32.mrb[3].mxu0 }
 0x110   : > { %v4818_v38 = vpop.f32.mrb[3].mxu1 }
 0x111   : > { %v795_v39 = vadd.f32 %v4816_v34, %v4794_v31 }
 0x113   : > { %v800_v40 = vadd.f32 %v795_v39, %v463_v37 }
 0x115   : > { %801 = vst [vmem:[#allocation2] sm:$0xff] %v800_v40 }
 0x12c   : > { %v4836_v41 = vpop.f32.mrb[4].mxu0 }
 0x12d   : > { %v4858_v42 = vpop.f32.mrb[4].mxu1  ;;  %v4837_v43 = vpop.f32.mrb[5].mxu0 }
 0x12e   : > { %v4838_v44 = vadd.f32 %v4837_v43, %v4836_v41  ;;  %v4859_v45 = vpop.f32.mrb[5].mxu1  ;;  %v4839_v46 = vpop.f32.mrb[6].mxu0 }
 0x12f   : > { %v4860_v47 = vadd.f32 %v4859_v45, %v4858_v42  ;;  %v4861_v48 = vpop.f32.mrb[6].mxu1  ;;  %v4840_v49 = vpop.f32.mrb[7].mxu0 }
 0x130   : > { %v4862_v51 = vpop.f32.mrb[7].mxu1 }
 0x131   : > { %v1134_v52 = vadd.f32 %v4860_v47, %v4838_v44 }
 0x133   : > { %v1139_v53 = vadd.f32 %v1134_v52, %v802_v50 }
 0x135   : > { %1140 = vst [vmem:[#allocation3] sm:$0xff] %v1139_v53 }
 0x136 PF: > { %1151 = sbr.rel (!%p409_p4) target bundleno = 1374 (0x55e), region = 56  ;;  %v1152_v54 = vld [vmem:[#allocation4] sm:$0xff] (%p409_p4)  ;;  %v5453_v55 = vmov (%p409_p4), 0   ;;  %v1171_v58 = vld [vmem:[#allocation2] sm:$0xff] (%p409_p4)  ;;  %v5454_v1 = vmov (%p409_p4), 0.0   ;;  %vm1156_vm12 = vcmask (%p409_p4), 7168   ;;  %v1195_v21 = vlaneseq (%p409_p4) }
 0x137   : > { %5097 = vset.pattern.permute.xlu0 (%p409_p4), %v5453_v55  ;;  %v1169_v56 = vmax.f32 (%p409_p4), %v1152_v54, 1.0  ;;  %4901 = vmatprep.subr.bf16.mxu0 (%p409_p4), %v5454_v1  ;;  %vm1153_vm11 = vcmp.gt.f32.partialorder (%p409_p4), %v1152_v54, 0.5  ;;  %vm5455_vm13 = vmmov (%p409_p4), 0   ;;  %vm1255_vm1 = vcmask (%p409_p4), 64512  }
 0x138   : > { %4907 = vmatprep.subr.bf16.mxu1 (%p409_p4), %v5454_v1  ;;  %v4507_v2 = vsel (%p409_p4), %vm1153_vm11, 1.0, %v5454_v1  ;;  %4903 = vmatprep.mubr.msk.bf16.mxu0 (%p409_p4), %vm5455_vm13, %v5454_v1  ;;  %v1196_v22 = vshrl.u32 (%p409_p4), %v1195_v21, 7  ;;  %v1199_v23 = vand.u32 (%p409_p4), 127, %v1195_v21  ;;  %vm1287_vm5 = vcmask (%p409_p4), 0  }
 0x139   : > { %5098 = vrcp.f32 (%p409_p4), %v1169_v56  ;;  %v1157_v3 = vsel (%p409_p4), %vm1156_vm12, %v4507_v2, 0.0  ;;  %4909 = vmatprep.mubr.msk.bf16.mxu1 (%p409_p4), %vm5455_vm13, %v5454_v1 }
 0x13a   : > { %v1197_v24 = vcvt.s32.f32 (%p409_p4), %v1196_v22  ;;  %v1200_v25 = vcvt.s32.f32 (%p409_p4), %v1199_v23 }
 0x13c   : > { %v1184_v59 = vld [vmem:[#allocation3] sm:$0xff] (%p409_p4)  ;;  %vm1204_vm15 = vcmp.gt.f32.partialorder (%p409_p4), %v1200_v25, %v1197_v24  ;;  %vm1201_vm4 = vcmp.eq.f32.partialorder (%p409_p4), %v1197_v24, %v1200_v25 }
 0x13d   : > { %v4509_v28 = vsel %vm1204_vm15, 1.0, %v5454_v1 }
 0x143   : > { %v5099_v57 = vpop.eup %5098 }
 0x144   : > { %1174 = vperm.xlu0 %5097, %v5099_v57  }
 0x1c3   : > { %v1175_v60 = vpop.permute.xlu0 %1174 }
 0x1c4   : > { %v1177_v61 = vmul.f32 %v1175_v60, %v1171_v58  ;;  %v1185_v62 = vmul.f32 %v1184_v59, %v1175_v60 }
 0x1c6   : > { %v1178_v63 = vmul.f32 %v1177_v61, %v1177_v61  ;;  %v1186_v0 = vmul.f32 %v1185_v62, %v1185_v62 }
 0x1c8   : > { %1179 = vadd.xlane.f32.xlu1 %v1178_v63  ;;  %1187 = vadd.xlane.f32.xlu0 %v1186_v0 }
 0x1cc   : > { %1158 = vadd.xlane.f32.xlu1 %v1157_v3 }
 0x255   : > { %v1180_v4 = vpop.xlane.xlu1 %1179  ;;  %v1188_v5 = vpop.xlane.xlu0 %1187 }
 0x256   : > { %v1181_v6 = vmax.f32 %v1180_v4, 1e-24  ;;  %v1189_v7 = vmax.f32 %v1188_v5, 1e-24 }
 0x258   : > { %5100 = vrsqrt.f32 %v1181_v6 }
 0x259   : > { %5102 = vrsqrt.f32 %v1189_v7  ;;  %v1159_v14 = vpop.xlane.xlu1 %1158 }
 0x25a   : > { %v1160_v15 = vrot.slane %v1159_v14, 4 }
 0x25c   : > { %v1161_v16 = vadd.f32 %v1160_v15, %v1159_v14 }
 0x25e   : > { %v1162_v17 = vrot.slane %v1161_v16, 2 }
 0x260   : > { %v1163_v18 = vadd.f32 %v1162_v17, %v1161_v16 }
 0x262   : > { %v5101_v8 = vpop.eup %5100  ;;  %v1164_v19 = vrot.slane %v1163_v18, 1 }
 0x263   : > { %v5103_v9 = vpop.eup %5102  ;;  %v1183_v10 = vmul.f32 %v5101_v8, %v1177_v61 }
 0x264   : > { %v1191_v11 = vmul.f32 %v5103_v9, %v1185_v62  ;;  %v1165_v20 = vadd.f32 %v1164_v19, %v1163_v18  ;;  %v4508_v62 = vsel %vm1201_vm4, 1.0, %v5454_v1 }
 0x265   : > { %v1192_v12 = vpack.c.bf16 %v1183_v10, %v1183_v10 }
 0x266   : > { %v1193_v13 = vpack.c.bf16 %v1191_v11, %v1191_v11  ;;  %4983 = vpush %v1165_v20 }
 0x267   : > { %1194 = vst [vmem:[#allocation5] sm:$0xf] %v1192_v12  ;;  %4908 = vmatpush3.bf16.xpose.msra.mxu1 %v1192_v12 }
 0x268   : > { %4902 = vmatpush3.bf16.xpose.msra.mxu0 %v1193_v13 }
 0x26e   : > { %4910 = vmatmul.mubr.bf16.vlgmr.msra.gmra.mrb[0].mxu1 %v1192_v12 }
 0x26f   : > { %4904 = vmatmul.mubr.bf16.vlgmr.msra.gmra.mrb[0].mxu0 %v1192_v12 }
 0x297   : > { %s4984_s18 = spop %4983 }
 0x298   : > { %v5771_v26 = vstv %s4984_s18 }
 0x299   : > { %vm1207_vm14 = vcmp.lt.f32.partialorder %v1197_v24, %v5771_v26  ;;  %vm1210_vm0 = vcmp.lt.f32.partialorder %v1200_v25, %v5771_v26  ;;  %v4512_v18 = vadd.f32 -1.0, %v5771_v26  ;;  %v1168_v20 = vmax.f32 %v5771_v26, 1.0 }
 0x29a   : > { %v4510_v27 = vsel %vm1207_vm14, 1.0, %v5454_v1  ;;  %v4511_v30 = vsel %vm1210_vm0, 1.0, %v5454_v1 }
 0x29b   : > { %v1339_v29 = vmul.f32 %v4510_v27, %v4509_v28  ;;  %v1213_v31 = vsub.f32 1.0, %v4511_v30  ;;  %v1342_v19 = vmul.f32 %v4512_v18, %v5771_v26 }
 0x29d   : > { %v1214_v32 = vmul.f32 -1e+30, %v1213_v31  ;;  %v1340_v50 = vmul.f32 %v4511_v30, %v1339_v29  ;;  %v1343_v21 = vmul.f32 0.5, %v1342_v19 }
 0x29f   : > { %v1356_v22 = vmax.f32 %v1343_v21, 1.0 }
 0x341   : > { %v1323_v33 = vpop.f32.mrb[0].mxu1 }
 0x342   : > { %v1249_v34 = vpop.f32.mrb[0].mxu0  ;;  %v1329_v35 = vmul.f32 2.0, %v1323_v33  ;;  %v4911_v36 = vpop.f32.mrb[1].mxu1 }
 0x343   : > { %v1250_v37 = vadd.f32 %v1249_v34, %v1214_v32  ;;  %v4905_v38 = vpop.f32.mrb[1].mxu0  ;;  %v1326_v39 = vpop.f32.mrb[2].mxu1 }
 0x344   : > { %v1330_v40 = vsub.f32 2.0, %v1329_v35  ;;  %v1252_v41 = vpop.f32.mrb[2].mxu0  ;;  %v4912_v42 = vpop.f32.mrb[3].mxu1 }
 0x345   : > { %v4906_v43 = vpop.f32.mrb[3].mxu0  ;;  %v1256_v44 = vsel %vm1255_vm1, %v1250_v37, -inf }
 0x346   : > { %v1331_v45 = vmax.f32 %v1330_v40, 1e-12  ;;  %1257 = vmax.xlane.f32.xlu1 %v1256_v44 }
 0x348   : > { %5104 = vrsqrt.f32 %v1331_v45  ;;  %vm1334_vm2 = vcmp.eq.f32.partialorder %v1331_v45, inf  ;;  %v1337_v48 = vand.u32 2147483648, %v1331_v45  ;;  %vm1336_vm3 = vcmp.eq.f32.partialorder %v1331_v45, 0.0 }
 0x352   : > { %v5105_v46 = vpop.eup %5104 }
 0x353   : > { %v1333_v47 = vmul.f32 %v5105_v46, %v1331_v45 }
 0x355   : > { %v1335_v49 = vsel %vm1334_vm2, %v1331_v45, %v1333_v47 }
 0x356   : > { %v1338_v51 = vsel %vm1336_vm3, %v1337_v48, %v1335_v49 }
 0x357   : > { %v1344_v52 = vmul.f32 %v1340_v50, %v1338_v51 }
 0x359   : > { %v1345_v4 = vsel %vm1255_vm1, %v1344_v52, 0.0 }
 0x3d3   : > { %v1258_v53 = vpop.xlane.xlu1 %1257 }
 0x3d4   : > { %v1259_v54 = vsub.f32 %v1250_v37, %v1258_v53 }
 0x3d6   : > { %v1260_v55 = vmul.f32 1.442695, %v1259_v54 }
 0x3d8   : > { %5106 = vpow2.f32 %v1260_v55 }
 0x3e2   : > { %v5107_v56 = vpop.eup %5106 }
 0x3e3   : > { %v1262_v57 = vsel %vm1255_vm1, %v5107_v56, 0.0 }
 0x3e4   : > { %1263 = vadd.xlane.f32.xlu1 %v1262_v57 }
 0x471   : > { %v1264_v58 = vpop.xlane.xlu1 %1263 }
 0x472   : > { %5108 = vlog2.f32 %v1264_v58 }
 0x473   : > { %5110 = vrcp.f32 %v1168_v20 }
 0x474   : > { %5112 = vrcp.f32 %v1356_v22 }
 0x47c   : > { %v5109_v59 = vpop.eup %5108 }
 0x47d   : > { %v1266_v60 = vmul.f32 0.6931472, %v5109_v59  ;;  %v5111_v23 = vpop.eup %5110 }
 0x47e   : > { %v5113_v28 = vpop.eup %5112 }
 0x47f   : > { %v1267_v61 = vadd.f32 %v1266_v60, %v1258_v53 }
 0x481   : > { %v1268_v63 = vsub.f32 %v1250_v37, %v1267_v61 }
 0x483   : > { %v1269_v0 = vmul.f32 %v4508_v62, %v1268_v63 }
 0x485   : > { %v1270_v2 = vmul.f32 %v4511_v30, %v1269_v0 }
 0x487   : > { %v1271_v3 = vsel %vm1255_vm1, %v1270_v2, 0.0 }
 0x488   : > { %1272 = vadd.xlane.f32.xlu1 %v1271_v3 }
 0x48c   : > { %1346 = vadd.xlane.f32.xlu1 %v1345_v4 }
 0x515   : > { %v1273_v5 = vpop.xlane.xlu1 %1272 }
 0x516   : > { %v1274_v6 = vrot.slane %v1273_v5, 4 }
 0x518   : > { %v1275_v7 = vadd.f32 %v1274_v6, %v1273_v5 }
 0x519   : > { %v1347_v8 = vpop.xlane.xlu1 %1346 }
 0x51a   : > { %v1276_v9 = vrot.slane %v1275_v7, 2  ;;  %v1348_v10 = vrot.slane %v1347_v8, 4 }
 0x51c   : > { %v1349_v11 = vadd.f32 %v1348_v10, %v1347_v8  ;;  %v1277_v12 = vadd.f32 %v1276_v9, %v1275_v7 }
 0x51e   : > { %v1350_v13 = vrot.slane %v1349_v11, 2  ;;  %v1278_v14 = vrot.slane %v1277_v12, 1 }
 0x520   : > { %v1351_v1 = vadd.f32 %v1350_v13, %v1349_v11  ;;  %v1279_v15 = vadd.f32 %v1278_v14, %v1277_v12 }
 0x522   : > { %4985 = vpush %v1279_v15  ;;  %v1352_v16 = vrot.slane %v1351_v1, 1 }
 0x524   : > { %v1353_v17 = vadd.f32 %v1352_v16, %v1351_v1 }
 0x526   : > { %4987 = vpush %v1353_v17 }
 0x553   : > { %s4986_s19 = spop %4985 }
 0x554   : > { %v1281_v24 = vstv %s4986_s19 }
 0x555   : > { %v1283_v25 = vmul.f32 %v5111_v23, %v1281_v24 }
 0x557   : > { %v1284_v27 = vsub.f32 0.0, %v1283_v25  ;;  %s4988_s20 = spop %4987 }
 0x558   : > { %v1355_v29 = vstv %s4988_s20 }
 0x559   : > { %v1285_v30 = vmul.f32 0.5, %v1284_v27  ;;  %v1358_v31 = vmul.f32 %v5113_v28, %v1355_v29 }
 0x55b   : > { %v1286_v32 = vadd.f32 %v1285_v30, %v1285_v30  ;;  %1359 = vst.msk [vmem:[#allocation9] sm:$0x1] %vm1287_vm5, %v1358_v31 }
 0x55d   : > { %1288 = vst.msk [vmem:[#allocation8] sm:$0x1] %vm1287_vm5, %v1286_v32 }
 0x55e PF: > { %p1360_p6 = scmp.eq.s32.totalorder %s5440_s21, 1  ;;  %p4513_p7 = scmp.ne.s32.totalorder %s5440_s21, 1 }
 0x560   : > { %1363 = sbr.rel (%p4513_p7) target bundleno = 2459 (0x99b), region = 60 }
 0x567   : > { %v1366_v26 = vld [vmem:[%s8957_s1 + $0x10] sm:$0xff]  ;;  %v1364_v33 = vld [vmem:[%s8957_s1] sm:$0xff]  ;;  %v5456_v34 = vmov 0   ;;  %v1367_v35 = vld [vmem:[%s8957_s1 + $0x18] sm:$0xff]  ;;  %vm1944_vm6 = vcmask 1043456   ;;  %vm1847_vm11 = vcmask 64512  }
 0x568   : > { %5115 = vset.pattern.permute.xlu1 %v5456_v34  ;;  %5114 = vset.pattern.permute.xlu0 %v5456_v34  ;;  %v1365_v36 = vld [vmem:[%s8957_s1 + $0x8] sm:$0xff]  ;;  %v1368_v38 = vld [vmem:[%s8957_s1 + $0x20] sm:$0xff]  ;;  %v1371_v39 = vld [vmem:[%s8957_s1 + $0x38] sm:$0xff] }
 0x569   : > { %1437 = vperm.xlu1 %5115, %v1366_v26   ;;  %1431 = vperm.xlu0 %5114, %v1364_v33   ;;  %v1369_v37 = vld [vmem:[%s8957_s1 + $0x28] sm:$0xff]  ;;  %v1370_v40 = vld [vmem:[%s8957_s1 + $0x30] sm:$0xff]  ;;  %v1372_v42 = vld [vmem:[%s8957_s1 + $0x40] sm:$0xff] }
 0x56a   : > { %v1373_v41 = vld [vmem:[%s8957_s1 + $0x48] sm:$0xff]  ;;  %v1375_v43 = vld [vmem:[%s8957_s1 + $0x58] sm:$0xff]  ;;  %v1374_v44 = vld [vmem:[%s8957_s1 + $0x50] sm:$0xff] }
 0x56b   : > { %v1846_v45 = vld [vmem:[#allocation5] sm:$0xf]  ;;  %v1377_v47 = vld [vmem:[%s8957_s1 + $0x68] sm:$0xff]  ;;  %v1376_v48 = vld [vmem:[%s8957_s1 + $0x60] sm:$0xff] }
 0x56c   : > { %v1946_v46 = vsel %vm1944_vm6, %v1846_v45, 0  ;;  %4981 = vmatprep.subr.msk.bf16.mxu0 %vm1944_vm6, %v1846_v45  ;;  %4982 = vmatprep.subr.msk.bf16.mxu1 %vm1944_vm6, %v1846_v45  ;;  %v1379_v49 = vld [vmem:[%s8957_s1 + $0x78] sm:$0xff]  ;;  %v1378_v50 = vld [vmem:[%s8957_s1 + $0x70] sm:$0xff]  ;;  %v1381_v51 = vld [vmem:[%s8957_s1 + $0x88] sm:$0xff] }
 0x56d   : > { %1440 = vperm.xlu1 %5115, %v1367_v35   ;;  %1434 = vperm.xlu0 %5114, %v1365_v36   ;;  %v1380_v52 = vld [vmem:[%s8957_s1 + $0x80] sm:$0xff]  ;;  %v1383_v53 = vld [vmem:[%s8957_s1 + $0x98] sm:$0xff]  ;;  %v1382_v54 = vld [vmem:[%s8957_s1 + $0x90] sm:$0xff]  ;;  %v1428_v35 = vlaneseq }
 0x56e   : > { %4914 = vmatpush3.bf16.msra.mxu0 %v1946_v46  ;;  %4980 = vmatpush3.bf16.msra.mxu1 %v1946_v46  ;;  %v1385_v55 = vld [vmem:[%s8957_s1 + $0xa8] sm:$0xff]  ;;  %v1384_v56 = vld [vmem:[%s8957_s1 + $0xa0] sm:$0xff]  ;;  %v1387_v57 = vld [vmem:[%s8957_s1 + $0xb8] sm:$0xff] }
 0x56f   : > { %v1386_v58 = vld [vmem:[%s8957_s1 + $0xb0] sm:$0xff]  ;;  %v1389_v59 = vld [vmem:[%s8957_s1 + $0xc8] sm:$0xff]  ;;  %v1388_v60 = vld [vmem:[%s8957_s1 + $0xc0] sm:$0xff]  ;;  %v5980_v36 = vand.u32 127, %v1428_v35 }
 0x570   : > { %v1391_v61 = vld [vmem:[%s8957_s1 + $0xd8] sm:$0xff]  ;;  %v1390_v62 = vld [vmem:[%s8957_s1 + $0xd0] sm:$0xff]  ;;  %v1393_v63 = vld [vmem:[%s8957_s1 + $0xe8] sm:$0xff] }
 0x571   : > { %1446 = vperm.xlu1 %5115, %v1369_v37   ;;  %1443 = vperm.xlu0 %5114, %v1368_v38   ;;  %v1392_v0 = vld [vmem:[%s8957_s1 + $0xe0] sm:$0xff]  ;;  %v1395_v2 = vld [vmem:[%s8957_s1 + $0xf8] sm:$0xff]  ;;  %v1394_v3 = vld [vmem:[%s8957_s1 + $0xf0] sm:$0xff] }
 0x572   : > { %v1397_v4 = vld [vmem:[%s8957_s1 + $0x108] sm:$0xff]  ;;  %v1396_v5 = vld [vmem:[%s8957_s1 + $0x100] sm:$0xff]  ;;  %v1399_v6 = vld [vmem:[%s8957_s1 + $0x118] sm:$0xff] }
 0x573   : > { %v1398_v7 = vld [vmem:[%s8957_s1 + $0x110] sm:$0xff]  ;;  %v1401_v8 = vld [vmem:[%s8957_s1 + $0x128] sm:$0xff]  ;;  %v1400_v9 = vld [vmem:[%s8957_s1 + $0x120] sm:$0xff] }
 0x574   : > { %v1403_v10 = vld [vmem:[%s8957_s1 + $0x138] sm:$0xff]  ;;  %v1402_v11 = vld [vmem:[%s8957_s1 + $0x130] sm:$0xff]  ;;  %v1405_v12 = vld [vmem:[%s8957_s1 + $0x148] sm:$0xff] }
 0x575   : > { %1452 = vperm.xlu1 %5115, %v1371_v39   ;;  %1449 = vperm.xlu0 %5114, %v1370_v40   ;;  %v1404_v13 = vld [vmem:[%s8957_s1 + $0x140] sm:$0xff]  ;;  %v1407_v14 = vld [vmem:[%s8957_s1 + $0x158] sm:$0xff]  ;;  %v1406_v1 = vld [vmem:[%s8957_s1 + $0x150] sm:$0xff] }
 0x576   : > { %v1409_v15 = vld [vmem:[%s8957_s1 + $0x168] sm:$0xff]  ;;  %v1408_v16 = vld [vmem:[%s8957_s1 + $0x160] sm:$0xff]  ;;  %v1411_v17 = vld [vmem:[%s8957_s1 + $0x178] sm:$0xff] }
 0x577   : > { %v1410_v18 = vld [vmem:[%s8957_s1 + $0x170] sm:$0xff]  ;;  %v1413_v19 = vld [vmem:[%s8957_s1 + $0x188] sm:$0xff]  ;;  %v1412_v20 = vld [vmem:[%s8957_s1 + $0x180] sm:$0xff] }
 0x578   : > { %v1415_v21 = vld [vmem:[%s8957_s1 + $0x198] sm:$0xff]  ;;  %v1414_v22 = vld [vmem:[%s8957_s1 + $0x190] sm:$0xff]  ;;  %v1417_v23 = vld [vmem:[%s8957_s1 + $0x1a8] sm:$0xff] }
 0x579   : > { %1458 = vperm.xlu1 %5115, %v1373_v41   ;;  %1455 = vperm.xlu0 %5114, %v1372_v42   ;;  %v1416_v24 = vld [vmem:[%s8957_s1 + $0x1a0] sm:$0xff]  ;;  %v1419_v25 = vld [vmem:[%s8957_s1 + $0x1b8] sm:$0xff]  ;;  %v1418_v27 = vld [vmem:[%s8957_s1 + $0x1b0] sm:$0xff]  ;;  %v5457_v41 = vmov 0.0  }
 0x57a   : > { %v1421_v28 = vld [vmem:[%s8957_s1 + $0x1c8] sm:$0xff]  ;;  %v1420_v29 = vld [vmem:[%s8957_s1 + $0x1c0] sm:$0xff]  ;;  %v1423_v30 = vld [vmem:[%s8957_s1 + $0x1d8] sm:$0xff] }
 0x57b   : > { %v1422_v31 = vld [vmem:[%s8957_s1 + $0x1d0] sm:$0xff]  ;;  %v1425_v32 = vld [vmem:[%s8957_s1 + $0x1e8] sm:$0xff]  ;;  %v1424_v26 = vld [vmem:[%s8957_s1 + $0x1e0] sm:$0xff] }
 0x57c   : > { %v1427_v33 = vld [vmem:[%s8957_s1 + $0x1f8] sm:$0xff]  ;;  %v1426_v34 = vld [vmem:[%s8957_s1 + $0x1f0] sm:$0xff] }
 0x57d   : > { %1464 = vperm.xlu1 %5115, %v1375_v43   ;;  %1461 = vperm.xlu0 %5114, %v1374_v44  }
 0x581   : > { %1470 = vperm.xlu1 %5115, %v1377_v47   ;;  %1467 = vperm.xlu0 %5114, %v1376_v48  }
 0x585   : > { %1476 = vperm.xlu1 %5115, %v1379_v49   ;;  %1473 = vperm.xlu0 %5114, %v1378_v50  }
 0x589   : > { %1482 = vperm.xlu1 %5115, %v1381_v51   ;;  %1479 = vperm.xlu0 %5114, %v1380_v52  }
 0x58d   : > { %1488 = vperm.xlu1 %5115, %v1383_v53   ;;  %1485 = vperm.xlu0 %5114, %v1382_v54  }
 0x591   : > { %1494 = vperm.xlu1 %5115, %v1385_v55   ;;  %1491 = vperm.xlu0 %5114, %v1384_v56  }
 0x595   : > { %1500 = vperm.xlu1 %5115, %v1387_v57   ;;  %1497 = vperm.xlu0 %5114, %v1386_v58  }
 0x599   : > { %1506 = vperm.xlu1 %5115, %v1389_v59   ;;  %1503 = vperm.xlu0 %5114, %v1388_v60   ;;  %v4618_v60 = vld [vmem:[%s8960_s4] sm:$0xff]  }
 0x59d   : > { %1512 = vperm.xlu1 %5115, %v1391_v61   ;;  %1509 = vperm.xlu0 %5114, %v1390_v62  }
 0x5a1   : > { %1518 = vperm.xlu1 %5115, %v1393_v63   ;;  %1515 = vperm.xlu0 %5114, %v1392_v0  }
 0x5a5   : > { %1524 = vperm.xlu1 %5115, %v1395_v2   ;;  %1521 = vperm.xlu0 %5114, %v1394_v3   ;;  %v6009_v3 = vunpack.c.l.bf16 %v4618_v60 }
 0x5a9   : > { %1530 = vperm.xlu1 %5115, %v1397_v4   ;;  %1527 = vperm.xlu0 %5114, %v1396_v5   ;;  %v4745_v4 = vld [vmem:[%s8960_s4 + $0x8] sm:$0xff]  }
 0x5ad   : > { %1536 = vperm.xlu1 %5115, %v1399_v6   ;;  %1533 = vperm.xlu0 %5114, %v1398_v7  }
 0x5b1   : > { %1542 = vperm.xlu1 %5115, %v1401_v8   ;;  %1539 = vperm.xlu0 %5114, %v1400_v9  }
 0x5b5   : > { %1548 = vperm.xlu1 %5115, %v1403_v10   ;;  %1545 = vperm.xlu0 %5114, %v1402_v11   ;;  %v2557_v10 = vmul.f32 %v6009_v3, %v6009_v3  ;;  %v6021_v11 = vunpack.c.l.bf16 %v4745_v4 }
 0x5b9   : > { %1554 = vperm.xlu1 %5115, %v1405_v12   ;;  %1551 = vperm.xlu0 %5114, %v1404_v13   ;;  %v6025_v12 = vunpack.c.h.bf16 %v4618_v60 }
 0x5bd   : > { %1560 = vperm.xlu1 %5115, %v1407_v14   ;;  %1557 = vperm.xlu0 %5114, %v1406_v1  }
 0x5c1   : > { %1566 = vperm.xlu1 %5115, %v1409_v15   ;;  %1563 = vperm.xlu0 %5114, %v1408_v16  }
 0x5c5   : > { %1572 = vperm.xlu1 %5115, %v1411_v17   ;;  %1569 = vperm.xlu0 %5114, %v1410_v18   ;;  %v2559_v17 = vmul.f32 %v6021_v11, %v6021_v11  ;;  %v6032_v18 = vunpack.c.h.bf16 %v4745_v4 }
 0x5c9   : > { %1578 = vperm.xlu1 %5115, %v1413_v19   ;;  %1575 = vperm.xlu0 %5114, %v1412_v20   ;;  %v4746_v19 = vld [vmem:[%s8960_s4 + $0x10] sm:$0xff]   ;;  %v2558_v20 = vmul.f32 %v6025_v12, %v6025_v12 }
 0x5cd   : > { %1584 = vperm.xlu1 %5115, %v1415_v21   ;;  %1581 = vperm.xlu0 %5114, %v1414_v22   ;;  %v6042_v21 = vunpack.c.l.bf16 %v4746_v19 }
 0x5d1   : > { %1590 = vperm.xlu1 %5115, %v1417_v23   ;;  %1587 = vperm.xlu0 %5114, %v1416_v24  }
 0x5d5   : > { %1596 = vperm.xlu1 %5115, %v1419_v25   ;;  %1593 = vperm.xlu0 %5114, %v1418_v27  }
 0x5d9   : > { %1602 = vperm.xlu1 %5115, %v1421_v28   ;;  %1599 = vperm.xlu0 %5114, %v1420_v29   ;;  %v2560_v28 = vmul.f32 %v6032_v18, %v6032_v18  ;;  %v6048_v29 = vunpack.c.h.bf16 %v4746_v19 }
 0x5dd   : > { %1608 = vperm.xlu1 %5115, %v1423_v30   ;;  %1605 = vperm.xlu0 %5114, %v1422_v31   ;;  %v4747_v30 = vld [vmem:[%s8960_s4 + $0x18] sm:$0xff]   ;;  %v2561_v31 = vmul.f32 %v6042_v21, %v6042_v21 }
 0x5e1   : > { %1614 = vperm.xlu1 %5115, %v1425_v32   ;;  %1611 = vperm.xlu0 %5114, %v1424_v26   ;;  %v6057_v32 = vunpack.c.l.bf16 %v4747_v30 }
 0x5e5   : > { %1620 = vperm.xlu1 %5115, %v1427_v33   ;;  %1617 = vperm.xlu0 %5114, %v1426_v34  }
 0x5e8   : > { %v1438_v37 = vpop.permute.xlu1 %1437  ;;  %v1432_v38 = vpop.permute.xlu0 %1431 }
 0x5e9   : > { %vm1624_vm7 = vcmp.eq.s32.totalorder %v5980_v36, %v1438_v37  ;;  %vm1622_vm8 = vcmp.eq.s32.totalorder %v5980_v36, %v1432_v38  ;;  %v2562_v38 = vmul.f32 %v6048_v29, %v6048_v29 }
 0x5ea   : > { %v4516_v42 = vsel %vm1624_vm7, 1.0, %v5457_v41  ;;  %v4514_v44 = vsel %vm1622_vm8, 1.0, %v5457_v41 }
 0x5ec   : > { %v1441_v39 = vpop.permute.xlu1 %1440  ;;  %v1435_v40 = vpop.permute.xlu0 %1434 }
 0x5ed   : > { %vm1625_vm9 = vcmp.eq.s32.totalorder %v5980_v36, %v1441_v39  ;;  %vm1623_vm10 = vcmp.eq.s32.totalorder %v5980_v36, %v1435_v40  ;;  %v6064_v39 = vunpack.c.h.bf16 %v4747_v30  ;;  %v4748_v40 = vld [vmem:[%s8960_s4 + $0x20] sm:$0xff]   ;;  %v4751_v30 = vld [vmem:[%s8960_s4 + $0x38] sm:$0xff]  }
 0x5ee   : > { %v4517_v43 = vsel %vm1625_vm9, 1.0, %v5457_v41  ;;  %v4515_v45 = vsel %vm1623_vm10, 1.0, %v5457_v41 }
 0x5ef   : > { %v1815_v46 = vpack.c.bf16 %v4517_v43, %v4516_v42  ;;  %v1814_v47 = vpack.c.bf16 %v4515_v45, %v4514_v44  ;;  %v2563_v42 = vmul.f32 %v6057_v32, %v6057_v32 }
 0x5f0   : > { %v1447_v48 = vpop.permute.xlu1 %1446  ;;  %v1444_v49 = vpop.permute.xlu0 %1443 }
 0x5f1   : > { %vm1627_vm12 = vcmp.eq.s32.totalorder %v5980_v36, %v1447_v48  ;;  %vm1626_vm13 = vcmp.eq.s32.totalorder %v5980_v36, %v1444_v49  ;;  %4915 = vmatprep.mubr.msk.bf16.mxu0 %vm1847_vm11, %v1814_v47  ;;  %v2564_v48 = vmul.f32 %v6064_v39, %v6064_v39  ;;  %v6078_v49 = vunpack.c.l.bf16 %v4748_v40 }
 0x5f2   : > { %v4519_v50 = vsel %vm1627_vm12, 1.0, %v5457_v41  ;;  %v4518_v51 = vsel %vm1626_vm13, 1.0, %v5457_v41  ;;  %4916 = vmatmul.mubr.msk.bf16.vlgmr.msra.gmra.mrb[0].mxu0 %vm1847_vm11, %v1815_v46 }
 0x5f3   : > { %v1816_v52 = vpack.c.bf16 %v4519_v50, %v4518_v51 }
 0x5f4   : > { %v1453_v53 = vpop.permute.xlu1 %1452  ;;  %v1450_v54 = vpop.permute.xlu0 %1449 }
 0x5f5   : > { %vm1629_vm14 = vcmp.eq.s32.totalorder %v5980_v36, %v1453_v53  ;;  %vm1628_vm15 = vcmp.eq.s32.totalorder %v5980_v36, %v1450_v54  ;;  %4919 = vmatprep.mubr.msk.bf16.mxu0 %vm1847_vm11, %v1816_v52 }
 0x5f6   : > { %v4521_v55 = vsel %vm1629_vm14, 1.0, %v5457_v41  ;;  %v4520_v56 = vsel %vm1628_vm15, 1.0, %v5457_v41 }
 0x5f7   : > { %v1817_v57 = vpack.c.bf16 %v4521_v55, %v4520_v56  ;;  %v2565_v55 = vmul.f32 %v6078_v49, %v6078_v49  ;;  %v6087_v56 = vunpack.c.h.bf16 %v4748_v40 }
 0x5f8   : > { %v1459_v58 = vpop.permute.xlu1 %1458  ;;  %v1456_v59 = vpop.permute.xlu0 %1455 }
 0x5f9   : > { %vm1631_vm0 = vcmp.eq.s32.totalorder %v5980_v36, %v1459_v58  ;;  %vm1630_vm1 = vcmp.eq.s32.totalorder %v5980_v36, %v1456_v59 }
 0x5fa   : > { %v4523_v61 = vsel %vm1631_vm0, 1.0, %v5457_v41  ;;  %v4522_v62 = vsel %vm1630_vm1, 1.0, %v5457_v41  ;;  %4920 = vmatmul.mubr.msk.bf16.gmra.mrb[4].mxu0 %vm1847_vm11, %v1817_v57  ;;  %v4749_v57 = vld [vmem:[%s8960_s4 + $0x28] sm:$0xff]  }
 0x5fb   : > { %v1818_v63 = vpack.c.bf16 %v4523_v61, %v4522_v62 }
 0x5fc   : > { %v1465_v0 = vpop.permute.xlu1 %1464  ;;  %v1462_v2 = vpop.permute.xlu0 %1461 }
 0x5fd   : > { %vm1633_vm2 = vcmp.eq.s32.totalorder %v5980_v36, %v1465_v0  ;;  %vm1632_vm3 = vcmp.eq.s32.totalorder %v5980_v36, %v1462_v2  ;;  %4923 = vmatprep.mubr.msk.bf16.mxu0 %vm1847_vm11, %v1818_v63  ;;  %v2566_v63 = vmul.f32 %v6087_v56, %v6087_v56  ;;  %v6099_v0 = vunpack.c.l.bf16 %v4749_v57 }
 0x5fe   : > { %v4525_v5 = vsel %vm1633_vm2, 1.0, %v5457_v41  ;;  %v4524_v6 = vsel %vm1632_vm3, 1.0, %v5457_v41 }
 0x5ff   : > { %v1819_v7 = vpack.c.bf16 %v4525_v5, %v4524_v6 }
 0x600   : > { %v1471_v8 = vpop.permute.xlu1 %1470  ;;  %v1468_v9 = vpop.permute.xlu0 %1467 }
 0x601   : > { %vm1635_vm4 = vcmp.eq.s32.totalorder %v5980_v36, %v1471_v8  ;;  %vm1634_vm5 = vcmp.eq.s32.totalorder %v5980_v36, %v1468_v9  ;;  %v2567_v8 = vmul.f32 %v6099_v0, %v6099_v0  ;;  %v6108_v9 = vunpack.c.h.bf16 %v4749_v57 }
 0x602   : > { %v4527_v13 = vsel %vm1635_vm4, 1.0, %v5457_v41  ;;  %v4526_v14 = vsel %vm1634_vm5, 1.0, %v5457_v41  ;;  %4924 = vmatmul.mubr.msk.bf16.gmra.mrb[8].mxu0 %vm1847_vm11, %v1819_v7 }
 0x603   : > { %v1820_v1 = vpack.c.bf16 %v4527_v13, %v4526_v14 }
 0x604   : > { %v1477_v15 = vpop.permute.xlu1 %1476  ;;  %v1474_v16 = vpop.permute.xlu0 %1473  ;;  %2621 = vadd.xlane.f32.xlu0 %v2557_v10  ;;  %v4750_v10 = vld [vmem:[%s8960_s4 + $0x30] sm:$0xff]  }
 0x605   : > { %vm1637_vm6 = vcmp.eq.s32.totalorder %v5980_v36, %v1477_v15  ;;  %vm1636_vm7 = vcmp.eq.s32.totalorder %v5980_v36, %v1474_v16  ;;  %4927 = vmatprep.mubr.msk.bf16.mxu0 %vm1847_vm11, %v1820_v1  ;;  %v6120_v19 = vunpack.c.l.bf16 %v4750_v10 }
 0x606   : > { %v4529_v22 = vsel %vm1637_vm6, 1.0, %v5457_v41  ;;  %v4528_v23 = vsel %vm1636_vm7, 1.0, %v5457_v41 }
 0x607   : > { %v1821_v24 = vpack.c.bf16 %v4529_v22, %v4528_v23 }
 0x608   : > { %v1483_v25 = vpop.permute.xlu1 %1482  ;;  %v1480_v27 = vpop.permute.xlu0 %1479  ;;  %2625 = vadd.xlane.f32.xlu0 %v2559_v17  ;;  %v2568_v17 = vmul.f32 %v6108_v9, %v6108_v9 }
 0x609   : > { %vm1639_vm8 = vcmp.eq.s32.totalorder %v5980_v36, %v1483_v25  ;;  %vm1638_vm9 = vcmp.eq.s32.totalorder %v5980_v36, %v1480_v27  ;;  %2623 = vadd.xlane.f32.xlu1 %v2558_v20  ;;  %v2569_v27 = vmul.f32 %v6120_v19, %v6120_v19 }
 0x60a   : > { %v4531_v26 = vsel %vm1639_vm8, 1.0, %v5457_v41  ;;  %v4530_v33 = vsel %vm1638_vm9, 1.0, %v5457_v41  ;;  %4928 = vmatmul.mubr.msk.bf16.gmra.mrb[12].mxu0 %vm1847_vm11, %v1821_v24 }
 0x60b   : > { %v1822_v34 = vpack.c.bf16 %v4531_v26, %v4530_v33 }
 0x60c   : > { %v1489_v35 = vpop.permute.xlu1 %1488  ;;  %v1486_v37 = vpop.permute.xlu0 %1485  ;;  %2627 = vadd.xlane.f32.xlu0 %v2560_v28  ;;  %v6129_v28 = vunpack.c.h.bf16 %v4750_v10 }
 0x60d   : > { %vm1641_vm10 = vcmp.eq.s32.totalorder %v5980_v36, %v1489_v35  ;;  %vm1640_vm12 = vcmp.eq.s32.totalorder %v5980_v36, %v1486_v37  ;;  %4931 = vmatprep.mubr.msk.bf16.mxu0 %vm1847_vm11, %v1822_v34  ;;  %2629 = vadd.xlane.f32.xlu1 %v2561_v31 }
 0x60e   : > { %v4533_v43 = vsel %vm1641_vm10, 1.0, %v5457_v41  ;;  %v4532_v44 = vsel %vm1640_vm12, 1.0, %v5457_v41  ;;  %9016 = vst [vmem:[#allocation13_spill] sm:$0xff] %v6129_v28  ;;  %v2570_v37 = vmul.f32 %v6129_v28, %v6129_v28 }
 0x60f   : > { %v1823_v45 = vpack.c.bf16 %v4533_v43, %v4532_v44 }
 0x610   : > { %v1495_v46 = vpop.permute.xlu1 %1494  ;;  %v1492_v47 = vpop.permute.xlu0 %1491  ;;  %2631 = vadd.xlane.f32.xlu0 %v2562_v38  ;;  %v6141_v38 = vunpack.c.l.bf16 %v4751_v30 }
 0x611   : > { %vm1643_vm13 = vcmp.eq.s32.totalorder %v5980_v36, %v1495_v46  ;;  %vm1642_vm14 = vcmp.eq.s32.totalorder %v5980_v36, %v1492_v47  ;;  %2633 = vadd.xlane.f32.xlu1 %v2563_v42  ;;  %v6150_v47 = vunpack.c.h.bf16 %v4751_v30 }
 0x612   : > { %v4535_v50 = vsel %vm1643_vm13, 1.0, %v5457_v41  ;;  %v4534_v51 = vsel %vm1642_vm14, 1.0, %v5457_v41  ;;  %4932 = vmatmul.mubr.msk.bf16.gmra.mrb[16].mxu0 %vm1847_vm11, %v1823_v45  ;;  %v2571_v46 = vmul.f32 %v6141_v38, %v6141_v38 }
 0x613   : > { %v1824_v52 = vpack.c.bf16 %v4535_v50, %v4534_v51  ;;  %9017 = vst [vmem:[#allocation14_spill] sm:$0xff] %v6150_v47 }
 0x614   : > { %v1501_v53 = vpop.permute.xlu1 %1500  ;;  %v1498_v54 = vpop.permute.xlu0 %1497  ;;  %2635 = vadd.xlane.f32.xlu0 %v2564_v48  ;;  %v4752_v48 = vld [vmem:[%s8960_s4 + $0x40] sm:$0xff]  }
 0x615   : > { %vm1645_vm15 = vcmp.eq.s32.totalorder %v5980_v36, %v1501_v53  ;;  %vm1644_vm0 = vcmp.eq.s32.totalorder %v5980_v36, %v1498_v54  ;;  %4935 = vmatprep.mubr.msk.bf16.mxu0 %vm1847_vm11, %v1824_v52  ;;  %v6162_v57 = vunpack.c.l.bf16 %v4752_v48 }
 0x616   : > { %v4537_v58 = vsel %vm1645_vm15, 1.0, %v5457_v41  ;;  %v4536_v59 = vsel %vm1644_vm0, 1.0, %v5457_v41 }
 0x617   : > { %v1825_v60 = vpack.c.bf16 %v4537_v58, %v4536_v59  ;;  %9018 = vst [vmem:[#allocation15_spill] sm:$0xff] %v6162_v57 }
 0x618   : > { %v1507_v61 = vpop.permute.xlu1 %1506  ;;  %v1504_v62 = vpop.permute.xlu0 %1503  ;;  %2637 = vadd.xlane.f32.xlu0 %v2565_v55  ;;  %v2572_v55 = vmul.f32 %v6150_v47, %v6150_v47 }
 0x619   : > { %vm1647_vm1 = vcmp.eq.s32.totalorder %v5980_v36, %v1507_v61  ;;  %vm1646_vm2 = vcmp.eq.s32.totalorder %v5980_v36, %v1504_v62 }
 0x61a   : > { %v4539_v2 = vsel %vm1647_vm1, 1.0, %v5457_v41  ;;  %v4538_v4 = vsel %vm1646_vm2, 1.0, %v5457_v41  ;;  %4936 = vmatmul.mubr.msk.bf16.gmra.mrb[20].mxu0 %vm1847_vm11, %v1825_v60 }
 0x61b   : > { %v1826_v5 = vpack.c.bf16 %v4539_v2, %v4538_v4  ;;  %v6171_v2 = vunpack.c.h.bf16 %v4752_v48  ;;  %v4753_v4 = vld [vmem:[%s8960_s4 + $0x48] sm:$0xff]  }
 0x61c   : > { %v1513_v6 = vpop.permute.xlu1 %1512  ;;  %v1510_v7 = vpop.permute.xlu0 %1509  ;;  %2639 = vadd.xlane.f32.xlu0 %v2566_v63  ;;  %v2573_v63 = vmul.f32 %v6162_v57, %v6162_v57 }
 0x61d   : > { %vm1649_vm3 = vcmp.eq.s32.totalorder %v5980_v36, %v1513_v6  ;;  %vm1648_vm4 = vcmp.eq.s32.totalorder %v5980_v36, %v1510_v7  ;;  %4939 = vmatprep.mubr.msk.bf16.mxu0 %vm1847_vm11, %v1826_v5  ;;  %9019 = vst [vmem:[#allocation16_spill] sm:$0xff] %v6171_v2 }
 0x61e   : > { %v4541_v13 = vsel %vm1649_vm3, 1.0, %v5457_v41  ;;  %v4540_v14 = vsel %vm1648_vm4, 1.0, %v5457_v41 }
 0x61f   : > { %v1827_v1 = vpack.c.bf16 %v4541_v13, %v4540_v14  ;;  %v2574_v13 = vmul.f32 %v6171_v2, %v6171_v2  ;;  %v6183_v14 = vunpack.c.l.bf16 %v4753_v4 }
 0x620   : > { %v1519_v15 = vpop.permute.xlu1 %1518  ;;  %v1516_v16 = vpop.permute.xlu0 %1515  ;;  %2641 = vadd.xlane.f32.xlu0 %v2567_v8 }
 0x621   : > { %vm1651_vm5 = vcmp.eq.s32.totalorder %v5980_v36, %v1519_v15  ;;  %vm1650_vm6 = vcmp.eq.s32.totalorder %v5980_v36, %v1516_v16  ;;  %9020 = vst [vmem:[#allocation17_spill] sm:$0xff] %v6183_v14 }
 0x622   : > { %v4543_v20 = vsel %vm1651_vm5, 1.0, %v5457_v41  ;;  %v4542_v22 = vsel %vm1650_vm6, 1.0, %v5457_v41  ;;  %4940 = vmatmul.mubr.msk.bf16.gmra.mrb[24].mxu0 %vm1847_vm11, %v1827_v1 }
 0x623   : > { %v1828_v23 = vpack.c.bf16 %v4543_v20, %v4542_v22  ;;  %v2575_v22 = vmul.f32 %v6183_v14, %v6183_v14 }
 0x624   : > { %v1525_v24 = vpop.permute.xlu1 %1524  ;;  %v1522_v25 = vpop.permute.xlu0 %1521  ;;  %2643 = vadd.xlane.f32.xlu0 %v2568_v17 }
 0x625   : > { %vm1653_vm7 = vcmp.eq.s32.totalorder %v5980_v36, %v1525_v24  ;;  %vm1652_vm8 = vcmp.eq.s32.totalorder %v5980_v36, %v1522_v25  ;;  %4943 = vmatprep.mubr.msk.bf16.mxu0 %vm1847_vm11, %v1828_v23  ;;  %v6192_v23 = vunpack.c.h.bf16 %v4753_v4  ;;  %v4754_v24 = vld [vmem:[%s8960_s4 + $0x50] sm:$0xff]  }
 0x626   : > { %v4545_v31 = vsel %vm1653_vm7, 1.0, %v5457_v41  ;;  %v4544_v26 = vsel %vm1652_vm8, 1.0, %v5457_v41 }
 0x627   : > { %v1829_v33 = vpack.c.bf16 %v4545_v31, %v4544_v26  ;;  %9021 = vst [vmem:[#allocation18_spill] sm:$0xff] %v6192_v23 }
 0x628   : > { %v1531_v34 = vpop.permute.xlu1 %1530  ;;  %v1528_v35 = vpop.permute.xlu0 %1527  ;;  %2645 = vadd.xlane.f32.xlu0 %v2569_v27 }
 0x629   : > { %vm1655_vm9 = vcmp.eq.s32.totalorder %v5980_v36, %v1531_v34  ;;  %vm1654_vm10 = vcmp.eq.s32.totalorder %v5980_v36, %v1528_v35  ;;  %v6204_v34 = vunpack.c.l.bf16 %v4754_v24 }
 0x62a   : > { %4944 = vmatmul.mubr.msk.bf16.gmra.mrb[28].mxu0 %vm1847_vm11, %v1829_v33  ;;  %v4546_v40 = vsel %vm1654_vm10, 1.0, %v5457_v41  ;;  %v4547_v42 = vsel %vm1655_vm9, 1.0, %v5457_v41  ;;  %v2576_v33 = vmul.f32 %v6192_v23, %v6192_v23 }
 0x62b   : > { %v1830_v43 = vpack.c.bf16 %v4547_v42, %v4546_v40  ;;  %9022 = vst [vmem:[#allocation19_spill] sm:$0xff] %v6204_v34 }
 0x62c   : > { %v1537_v44 = vpop.permute.xlu1 %1536  ;;  %v1534_v45 = vpop.permute.xlu0 %1533  ;;  %2647 = vadd.xlane.f32.xlu0 %v2570_v37 }
 0x62d   : > { %vm1657_vm12 = vcmp.eq.s32.totalorder %v5980_v36, %v1537_v44  ;;  %vm1656_vm13 = vcmp.eq.s32.totalorder %v5980_v36, %v1534_v45  ;;  %4947 = vmatprep.mubr.msk.bf16.mxu1 %vm1847_vm11, %v1830_v43  ;;  %v2577_v44 = vmul.f32 %v6204_v34, %v6204_v34  ;;  %v6213_v45 = vunpack.c.h.bf16 %v4754_v24 }
 0x62e   : > { %v4549_v50 = vsel %vm1657_vm12, 1.0, %v5457_v41  ;;  %v4548_v51 = vsel %vm1656_vm13, 1.0, %v5457_v41 }
 0x62f   : > { %v1831_v52 = vpack.c.bf16 %v4549_v50, %v4548_v51  ;;  %9023 = vst [vmem:[#allocation20_spill] sm:$0xff] %v6213_v45 }
 0x630   : > { %v1543_v53 = vpop.permute.xlu1 %1542  ;;  %v1540_v54 = vpop.permute.xlu0 %1539  ;;  %2649 = vadd.xlane.f32.xlu0 %v2571_v46  ;;  %v4755_v46 = vld [vmem:[%s8960_s4 + $0x58] sm:$0xff]  }
 0x631   : > { %vm1659_vm14 = vcmp.eq.s32.totalorder %v5980_v36, %v1543_v53  ;;  %vm1658_vm15 = vcmp.eq.s32.totalorder %v5980_v36, %v1540_v54  ;;  %4948 = vmatmul.mubr.msk.bf16.vlgmr.msra.gmra.mrb[0].mxu1 %vm1847_vm11, %v1831_v52  ;;  %v2578_v54 = vmul.f32 %v6213_v45, %v6213_v45  ;;  %v6234_v4 = vunpack.c.h.bf16 %v4755_v46 }
 0x632   : > { %v4551_v58 = vsel %vm1659_vm14, 1.0, %v5457_v41  ;;  %v4550_v59 = vsel %vm1658_vm15, 1.0, %v5457_v41 }
 0x633   : > { %v1832_v60 = vpack.c.bf16 %v4551_v58, %v4550_v59  ;;  %9025 = vst [vmem:[#allocation22_spill] sm:$0xff] %v6234_v4 }
 0x634   : > { %v1549_v61 = vpop.permute.xlu1 %1548  ;;  %v1546_v62 = vpop.permute.xlu0 %1545  ;;  %2651 = vadd.xlane.f32.xlu0 %v2572_v55  ;;  %v6225_v55 = vunpack.c.l.bf16 %v4755_v46 }
 0x635   : > { %vm1661_vm0 = vcmp.eq.s32.totalorder %v5980_v36, %v1549_v61  ;;  %vm1660_vm1 = vcmp.eq.s32.totalorder %v5980_v36, %v1546_v62  ;;  %4951 = vmatprep.mubr.msk.bf16.mxu1 %vm1847_vm11, %v1832_v60 }
 0x636   : > { %v4553_v5 = vsel %vm1661_vm0, 1.0, %v5457_v41  ;;  %v4552_v6 = vsel %vm1660_vm1, 1.0, %v5457_v41  ;;  %9024 = vst [vmem:[#allocation21_spill] sm:$0xff] %v6225_v55 }
 0x637   : > { %v1833_v7 = vpack.c.bf16 %v4553_v5, %v4552_v6  ;;  %v4756_v5 = vld [vmem:[%s8960_s4 + $0x60] sm:$0xff]  }
 0x638   : > { %v1555_v8 = vpop.permute.xlu1 %1554  ;;  %v1552_v10 = vpop.permute.xlu0 %1551  ;;  %2653 = vadd.xlane.f32.xlu0 %v2573_v63  ;;  %v2579_v63 = vmul.f32 %v6225_v55, %v6225_v55 }
 0x639   : > { %vm1663_vm2 = vcmp.eq.s32.totalorder %v5980_v36, %v1555_v8  ;;  %vm1662_vm3 = vcmp.eq.s32.totalorder %v5980_v36, %v1552_v10  ;;  %4952 = vmatmul.mubr.msk.bf16.gmra.mrb[4].mxu1 %vm1847_vm11, %v1833_v7 }
 0x63a   : > { %v4555_v1 = vsel %vm1663_vm2, 1.0, %v5457_v41  ;;  %v4554_v15 = vsel %vm1662_vm3, 1.0, %v5457_v41 }
 0x63b   : > { %v1834_v16 = vpack.c.bf16 %v4555_v1, %v4554_v15  ;;  %v2580_v1 = vmul.f32 %v6234_v4, %v6234_v4  ;;  %v6246_v15 = vunpack.c.l.bf16 %v4756_v5 }
 0x63c   : > { %v1561_v17 = vpop.permute.xlu1 %1560  ;;  %v1558_v20 = vpop.permute.xlu0 %1557  ;;  %2655 = vadd.xlane.f32.xlu0 %v2574_v13 }
 0x63d   : > { %vm1665_vm4 = vcmp.eq.s32.totalorder %v5980_v36, %v1561_v17  ;;  %vm1664_vm5 = vcmp.eq.s32.totalorder %v5980_v36, %v1558_v20  ;;  %4955 = vmatprep.mubr.msk.bf16.mxu1 %vm1847_vm11, %v1834_v16  ;;  %9026 = vst [vmem:[#allocation23_spill] sm:$0xff] %v6246_v15 }
 0x63e   : > { %v4557_v25 = vsel %vm1665_vm4, 1.0, %v5457_v41  ;;  %v4556_v27 = vsel %vm1664_vm5, 1.0, %v5457_v41 }
 0x63f   : > { %v1835_v30 = vpack.c.bf16 %v4557_v25, %v4556_v27  ;;  %v2581_v25 = vmul.f32 %v6246_v15, %v6246_v15  ;;  %v6255_v27 = vunpack.c.h.bf16 %v4756_v5 }
 0x640   : > { %v1567_v31 = vpop.permute.xlu1 %1566  ;;  %v1564_v26 = vpop.permute.xlu0 %1563  ;;  %2657 = vadd.xlane.f32.xlu0 %v2575_v22 }
 0x641   : > { %vm1667_vm6 = vcmp.eq.s32.totalorder %v5980_v36, %v1567_v31  ;;  %vm1666_vm7 = vcmp.eq.s32.totalorder %v5980_v36, %v1564_v26  ;;  %4956 = vmatmul.mubr.msk.bf16.gmra.mrb[8].mxu1 %vm1847_vm11, %v1835_v30  ;;  %9027 = vst [vmem:[#allocation24_spill] sm:$0xff] %v6255_v27  ;;  %v4757_v30 = vld [vmem:[%s8960_s4 + $0x68] sm:$0xff]  }
 0x642   : > { %v4559_v35 = vsel %vm1667_vm6, 1.0, %v5457_v41  ;;  %v4558_v37 = vsel %vm1666_vm7, 1.0, %v5457_v41 }
 0x643   : > { %v1836_v40 = vpack.c.bf16 %v4559_v35, %v4558_v37 }
 0x644   : > { %v1573_v42 = vpop.permute.xlu1 %1572  ;;  %v1570_v43 = vpop.permute.xlu0 %1569  ;;  %2659 = vadd.xlane.f32.xlu0 %v2576_v33 }
 0x645   : > { %vm1669_vm8 = vcmp.eq.s32.totalorder %v5980_v36, %v1573_v42  ;;  %vm1668_vm9 = vcmp.eq.s32.totalorder %v5980_v36, %v1570_v43  ;;  %4959 = vmatprep.mubr.msk.bf16.mxu1 %vm1847_vm11, %v1836_v40  ;;  %v2582_v40 = vmul.f32 %v6255_v27, %v6255_v27  ;;  %v6267_v42 = vunpack.c.l.bf16 %v4757_v30 }
 0x646   : > { %v4561_v48 = vsel %vm1669_vm8, 1.0, %v5457_v41  ;;  %v4560_v50 = vsel %vm1668_vm9, 1.0, %v5457_v41 }
 0x647   : > { %v1837_v51 = vpack.c.bf16 %v4561_v48, %v4560_v50  ;;  %9028 = vst [vmem:[#allocation25_spill] sm:$0xff] %v6267_v42 }
 0x648   : > { %v1579_v52 = vpop.permute.xlu1 %1578  ;;  %v1576_v53 = vpop.permute.xlu0 %1575  ;;  %2661 = vadd.xlane.f32.xlu0 %v2577_v44 }
 0x649   : > { %vm1671_vm10 = vcmp.eq.s32.totalorder %v5980_v36, %v1579_v52  ;;  %vm1670_vm12 = vcmp.eq.s32.totalorder %v5980_v36, %v1576_v53  ;;  %4960 = vmatmul.mubr.msk.bf16.gmra.mrb[12].mxu1 %vm1847_vm11, %v1837_v51  ;;  %v2583_v51 = vmul.f32 %v6267_v42, %v6267_v42  ;;  %v6276_v52 = vunpack.c.h.bf16 %v4757_v30  ;;  %v4758_v53 = vld [vmem:[%s8960_s4 + $0x70] sm:$0xff]  }
 0x64a   : > { %v4563_v58 = vsel %vm1671_vm10, 1.0, %v5457_v41  ;;  %v4562_v59 = vsel %vm1670_vm12, 1.0, %v5457_v41 }
 0x64b   : > { %v1838_v60 = vpack.c.bf16 %v4563_v58, %v4562_v59  ;;  %9029 = vst [vmem:[#allocation26_spill] sm:$0xff] %v6276_v52 }
 0x64c   : > { %v1585_v61 = vpop.permute.xlu1 %1584  ;;  %v1582_v62 = vpop.permute.xlu0 %1581  ;;  %2663 = vadd.xlane.f32.xlu0 %v2578_v54 }
 0x64d   : > { %vm1673_vm13 = vcmp.eq.s32.totalorder %v5980_v36, %v1585_v61  ;;  %vm1672_vm14 = vcmp.eq.s32.totalorder %v5980_v36, %v1582_v62  ;;  %4963 = vmatprep.mubr.msk.bf16.mxu1 %vm1847_vm11, %v1838_v60  ;;  %v2584_v62 = vmul.f32 %v6276_v52, %v6276_v52 }
 0x64e   : > { %v4565_v6 = vsel %vm1673_vm13, 1.0, %v5457_v41  ;;  %v4564_v7 = vsel %vm1672_vm14, 1.0, %v5457_v41 }
 0x64f   : > { %v1839_v8 = vpack.c.bf16 %v4565_v6, %v4564_v7 }
 0x650   : > { %v1591_v10 = vpop.permute.xlu1 %1590  ;;  %v1588_v13 = vpop.permute.xlu0 %1587  ;;  %2665 = vadd.xlane.f32.xlu0 %v2579_v63  ;;  %v6288_v63 = vunpack.c.l.bf16 %v4758_v53 }
 0x651   : > { %vm1675_vm15 = vcmp.eq.s32.totalorder %v5980_v36, %v1591_v10  ;;  %vm1674_vm0 = vcmp.eq.s32.totalorder %v5980_v36, %v1588_v13  ;;  %4964 = vmatmul.mubr.msk.bf16.gmra.mrb[16].mxu1 %vm1847_vm11, %v1839_v8 }
 0x652   : > { %v4567_v16 = vsel %vm1675_vm15, 1.0, %v5457_v41  ;;  %v4566_v17 = vsel %vm1674_vm0, 1.0, %v5457_v41  ;;  %9030 = vst [vmem:[#allocation27_spill] sm:$0xff] %v6288_v63  ;;  %v2585_v13 = vmul.f32 %v6288_v63, %v6288_v63 }
 0x653   : > { %v1840_v20 = vpack.c.bf16 %v4567_v16, %v4566_v17  ;;  %v4759_v16 = vld [vmem:[%s8960_s4 + $0x78] sm:$0xff]  }
 0x654   : > { %v1597_v22 = vpop.permute.xlu1 %1596  ;;  %v1594_v24 = vpop.permute.xlu0 %1593  ;;  %2667 = vadd.xlane.f32.xlu0 %v2580_v1  ;;  %v6297_v1 = vunpack.c.h.bf16 %v4758_v53  ;;  %v6314_v30 = vunpack.c.h.bf16 %v4759_v16 }
 0x655   : > { %vm1677_vm1 = vcmp.eq.s32.totalorder %v5980_v36, %v1597_v22  ;;  %vm1676_vm2 = vcmp.eq.s32.totalorder %v5980_v36, %v1594_v24  ;;  %4967 = vmatprep.mubr.msk.bf16.mxu1 %vm1847_vm11, %v1840_v20 }
 0x656   : > { %v4569_v31 = vsel %vm1677_vm1, 1.0, %v5457_v41  ;;  %v4568_v26 = vsel %vm1676_vm2, 1.0, %v5457_v41  ;;  %9031 = vst [vmem:[#allocation28_spill] sm:$0xff] %v6297_v1  ;;  %v2586_v24 = vmul.f32 %v6297_v1, %v6297_v1  ;;  %9033 = vst [vmem:[#allocation30_spill] sm:$0xff] %v6314_v30 }
 0x657   : > { %v1841_v33 = vpack.c.bf16 %v4569_v31, %v4568_v26  ;;  %v4760_v31 = vld [vmem:[%s8960_s4 + $0x80] sm:$0xff]  }
 0x658   : > { %v1603_v35 = vpop.permute.xlu1 %1602  ;;  %v1600_v37 = vpop.permute.xlu0 %1599  ;;  %2669 = vadd.xlane.f32.xlu0 %v2581_v25  ;;  %v6309_v25 = vunpack.c.l.bf16 %v4759_v16  ;;  %v6321_v26 = vunpack.c.l.bf16 %v4760_v31 }
 0x659   : > { %vm1679_vm3 = vcmp.eq.s32.totalorder %v5980_v36, %v1603_v35  ;;  %vm1678_vm4 = vcmp.eq.s32.totalorder %v5980_v36, %v1600_v37  ;;  %4968 = vmatmul.mubr.msk.bf16.gmra.mrb[20].mxu1 %vm1847_vm11, %v1841_v33  ;;  %v6325_v35 = vunpack.c.h.bf16 %v4760_v31  ;;  %v4761_v37 = vld [vmem:[%s8960_s4 + $0x88] sm:$0xff]  }
 0x65a   : > { %v4571_v43 = vsel %vm1679_vm3, 1.0, %v5457_v41  ;;  %v4570_v44 = vsel %vm1678_vm4, 1.0, %v5457_v41  ;;  %9032 = vst [vmem:[#allocation29_spill] sm:$0xff] %v6309_v25  ;;  %v2589_v33 = vmul.f32 %v6321_v26, %v6321_v26 }
 0x65b   : > { %v1842_v46 = vpack.c.bf16 %v4571_v43, %v4570_v44  ;;  %v6332_v43 = vunpack.c.l.bf16 %v4761_v37 }
 0x65c   : > { %v1609_v48 = vpop.permute.xlu1 %1608  ;;  %v1606_v50 = vpop.permute.xlu0 %1605  ;;  %2671 = vadd.xlane.f32.xlu0 %v2582_v40  ;;  %v2590_v40 = vmul.f32 %v6325_v35, %v6325_v35 }
 0x65d   : > { %vm1681_vm5 = vcmp.eq.s32.totalorder %v5980_v36, %v1609_v48  ;;  %vm1680_vm6 = vcmp.eq.s32.totalorder %v5980_v36, %v1606_v50  ;;  %4971 = vmatprep.mubr.msk.bf16.mxu1 %vm1847_vm11, %v1842_v46  ;;  %v2591_v44 = vmul.f32 %v6332_v43, %v6332_v43  ;;  %v6336_v46 = vunpack.c.h.bf16 %v4761_v37 }
 0x65e   : > { %v4573_v54 = vsel %vm1681_vm5, 1.0, %v5457_v41  ;;  %v4572_v58 = vsel %vm1680_vm6, 1.0, %v5457_v41 }
 0x65f   : > { %v1843_v59 = vpack.c.bf16 %v4573_v54, %v4572_v58  ;;  %v2592_v48 = vmul.f32 %v6336_v46, %v6336_v46 }
 0x660   : > { %v1615_v60 = vpop.permute.xlu1 %1614  ;;  %v1612_v61 = vpop.permute.xlu0 %1611  ;;  %2673 = vadd.xlane.f32.xlu0 %v2583_v51 }
 0x661   : > { %vm1683_vm7 = vcmp.eq.s32.totalorder %v5980_v36, %v1615_v60  ;;  %vm1682_vm8 = vcmp.eq.s32.totalorder %v5980_v36, %v1612_v61  ;;  %4972 = vmatmul.mubr.msk.bf16.gmra.mrb[24].mxu1 %vm1847_vm11, %v1843_v59 }
 0x662   : > { %v4575_v5 = vsel %vm1683_vm7, 1.0, %v5457_v41  ;;  %v4574_v6 = vsel %vm1682_vm8, 1.0, %v5457_v41 }
 0x663   : > { %v1844_v7 = vpack.c.bf16 %v4575_v5, %v4574_v6  ;;  %v4762_v5 = vld [vmem:[%s8960_s4 + $0x90] sm:$0xff]  }
 0x664   : > { %v1621_v8 = vpop.permute.xlu1 %1620  ;;  %v1618_v10 = vpop.permute.xlu0 %1617  ;;  %2675 = vadd.xlane.f32.xlu0 %v2584_v62 }
 0x665   : > { %vm1685_vm9 = vcmp.eq.s32.totalorder %v5980_v36, %v1621_v8  ;;  %vm1684_vm10 = vcmp.eq.s32.totalorder %v5980_v36, %v1618_v10  ;;  %4975 = vmatprep.mubr.msk.bf16.mxu1 %vm1847_vm11, %v1844_v7  ;;  %v2587_v36 = vmul.f32 %v6309_v25, %v6309_v25  ;;  %v6361_v7 = vunpack.c.l.bf16 %v4762_v5 }
 0x666   : > { %v4577_v17 = vsel %vm1685_vm9, 1.0, %v5457_v41  ;;  %v4576_v20 = vsel %vm1684_vm10, 1.0, %v5457_v41  ;;  %v2588_v41 = vmul.f32 %v6314_v30, %v6314_v30 }
 0x667   : > { %v1845_v22 = vpack.c.bf16 %v4577_v17, %v4576_v20 }
 0x668   : > { %2677 = vadd.xlane.f32.xlu0 %v2585_v13 }
 0x669   : > { %4976 = vmatmul.mubr.msk.bf16.gmra.mrb[28].mxu1 %vm1847_vm11, %v1845_v22  ;;  %v2593_v22 = vmul.f32 %v6361_v7, %v6361_v7  ;;  %vm3966_vm11 = vcmask 7168  }
 0x66c   : > { %2679 = vadd.xlane.f32.xlu0 %v2586_v24  ;;  %v6373_v24 = vunpack.c.h.bf16 %v4762_v5  ;;  %v4764_v5 = vld [vmem:[%s8960_s4 + $0xa0] sm:$0xff]  }
 0x66d   : > { %v6417_v63 = vunpack.c.h.bf16 %v4764_v5 }
 0x66f   : > { %v2598_v27 = vmul.f32 %v6417_v63, %v6417_v63 }
 0x670   : > { %2681 = vadd.xlane.f32.xlu0 %v2587_v36 }
 0x674   : > { %2683 = vadd.xlane.f32.xlu0 %v2588_v41 }
 0x678   : > { %2685 = vadd.xlane.f32.xlu0 %v2589_v33 }
 0x67c   : > { %2687 = vadd.xlane.f32.xlu0 %v2590_v40 }
 0x680   : > { %2689 = vadd.xlane.f32.xlu0 %v2591_v44 }
 0x684   : > { %2691 = vadd.xlane.f32.xlu0 %v2592_v48 }
 0x691   : > { %v6340_v50 = vpop.xlane.xlu0 %2621 }
 0x695   : > { %v6342_v51 = vpop.xlane.xlu0 %2625 }
 0x699   : > { %v6344_v53 = vpop.xlane.xlu0 %2627 }
 0x69d   : > { %v6346_v54 = vpop.xlane.xlu0 %2631 }
 0x6a1   : > { %v6348_v58 = vpop.xlane.xlu0 %2635 }
 0x6a5   : > { %v6350_v59 = vpop.xlane.xlu0 %2637 }
 0x6a9   : > { %v6352_v60 = vpop.xlane.xlu0 %2639 }
 0x6ad   : > { %v6354_v61 = vpop.xlane.xlu0 %2641 }
 0x6b1   : > { %v6356_v62 = vpop.xlane.xlu0 %2643 }
 0x6b5   : > { %v6364_v13 = vpop.xlane.xlu0 %2645 }
 0x6b9   : > { %v6378_v36 = vpop.xlane.xlu0 %2647 }
 0x6c5   : > { %v4917_v6 = vpop.f32.mrb[0].mxu0 }
 0x6c6   : > { %v2367_v8 = vmul.f32 %v4917_v6, %v6021_v11  ;;  %v1982_v10 = vpop.f32.mrb[1].mxu0  ;;  %v4763_v11 = vld [vmem:[%s8960_s4 + $0x98] sm:$0xff]   ;;  %v6399_v6 = vpop.xlane.xlu0 %2649 }
 0x6c7   : > { %v2365_v16 = vmul.f32 %v6009_v3, %v1982_v10  ;;  %v6367_v17 = vpop.f32.mrb[2].mxu0  ;;  %v2594_v3 = vmul.f32 %v6373_v24, %v6373_v24  ;;  %v6384_v41 = vunpack.c.l.bf16 %v4763_v11  ;;  %v6394_v48 = vunpack.c.h.bf16 %v4763_v11 }
 0x6c8   : > { %2433 = vadd.xlane.f32.xlu1 %v2367_v8  ;;  %v6369_v20 = vpop.f32.mrb[3].mxu0 }
 0x6c9   : > { %2429 = vadd.xlane.f32.xlu0 %v2365_v16  ;;  %v2595_v44 = vmul.f32 %v6384_v41, %v6384_v41  ;;  %v2596_v10 = vmul.f32 %v6394_v48, %v6394_v48  ;;  %v6405_v16 = vunpack.c.l.bf16 %v4764_v5 }
 0x6ca   : > { %v6413_v1 = vpop.xlane.xlu0 %2651 }
 0x6cb   : > { %v2597_v30 = vmul.f32 %v6405_v16, %v6405_v16 }
 0x6cd   : > { %v6380_v31 = vpop.f32.mrb[4].mxu0  ;;  %2693 = vadd.xlane.f32.xlu0 %v2593_v22 }
 0x6ce   : > { %v6386_v33 = vpop.f32.mrb[5].mxu0 }
 0x6cf   : > { %v6388_v37 = vpop.f32.mrb[6].mxu0 }
 0x6d0   : > { %v6390_v40 = vpop.f32.mrb[7].mxu0 }
 0x6d1   : > { %2695 = vadd.xlane.f32.xlu0 %v2594_v3 }
 0x6d5   : > { %v6401_v8 = vpop.f32.mrb[8].mxu0  ;;  %2697 = vadd.xlane.f32.xlu0 %v2595_v44  ;;  %v4765_v44 = vld [vmem:[%s8960_s4 + $0xa8] sm:$0xff]  }
 0x6d6   : > { %v6407_v22 = vpop.f32.mrb[9].mxu0  ;;  %v6426_v52 = vunpack.c.l.bf16 %v4765_v44  ;;  %v6438_v4 = vunpack.c.h.bf16 %v4765_v44 }
 0x6d7   : > { %v6409_v3 = vpop.f32.mrb[10].mxu0 }
 0x6d8   : > { %v6411_v11 = vpop.f32.mrb[11].mxu0  ;;  %v2599_v45 = vmul.f32 %v6426_v52, %v6426_v52  ;;  %v2600_v2 = vmul.f32 %v6438_v4, %v6438_v4 }
 0x6d9   : > { %2699 = vadd.xlane.f32.xlu0 %v2596_v10  ;;  %v6430_v10 = vpop.xlane.xlu0 %2653 }
 0x6dd   : > { %v6422_v25 = vpop.f32.mrb[12].mxu0  ;;  %2701 = vadd.xlane.f32.xlu0 %v2597_v30  ;;  %v4766_v30 = vld [vmem:[%s8960_s4 + $0xb0] sm:$0xff]   ;;  %v6443_v34 = vpop.xlane.xlu0 %2655 }
 0x6de   : > { %v6428_v15 = vpop.f32.mrb[13].mxu0  ;;  %9036 = vst [vmem:[#allocation33_spill] sm:$0xff] %v6443_v34  ;;  %v6449_v23 = vunpack.c.l.bf16 %v4766_v30  ;;  %v6459_v28 = vunpack.c.h.bf16 %v4766_v30 }
 0x6df   : > { %v6432_v42 = vpop.f32.mrb[14].mxu0 }
 0x6e0   : > { %9034 = vst [vmem:[#allocation31_spill] sm:$0xff] %v6432_v42  ;;  %v6434_v5 = vpop.f32.mrb[15].mxu0  ;;  %9038 = vst [vmem:[#allocation35_spill] sm:$0xff] %v6449_v23  ;;  %v2601_v14 = vmul.f32 %v6449_v23, %v6449_v23 }
 0x6e1   : > { %9035 = vst [vmem:[#allocation32_spill] sm:$0xff] %v6434_v5  ;;  %2703 = vadd.xlane.f32.xlu0 %v2598_v27  ;;  %9042 = vst [vmem:[#allocation39_spill] sm:$0xff] %v6459_v28 }
 0x6e5   : > { %v6445_v55 = vpop.f32.mrb[16].mxu0  ;;  %2705 = vadd.xlane.f32.xlu0 %v2599_v45  ;;  %v4767_v45 = vld [vmem:[%s8960_s4 + $0xb8] sm:$0xff]  }
 0x6e6   : > { %9037 = vst [vmem:[#allocation34_spill] sm:$0xff] %v6445_v55  ;;  %v6451_v27 = vpop.f32.mrb[17].mxu0  ;;  %v6464_v55 = vpop.xlane.xlu0 %2657  ;;  %v6482_v34 = vunpack.c.h.bf16 %v4767_v45 }
 0x6e7   : > { %9039 = vst [vmem:[#allocation36_spill] sm:$0xff] %v6451_v27  ;;  %v6453_v57 = vpop.f32.mrb[18].mxu0  ;;  %9043 = vst [vmem:[#allocation40_spill] sm:$0xff] %v6464_v55  ;;  %v6470_v27 = vunpack.c.l.bf16 %v4767_v45 }
 0x6e8   : > { %9040 = vst [vmem:[#allocation37_spill] sm:$0xff] %v6453_v57  ;;  %v6455_v44 = vpop.f32.mrb[19].mxu0  ;;  %v2602_v57 = vmul.f32 %v6459_v28, %v6459_v28  ;;  %9050 = vst [vmem:[#allocation47_spill] sm:$0xff] %v6482_v34 }
 0x6e9   : > { %9041 = vst [vmem:[#allocation38_spill] sm:$0xff] %v6455_v44  ;;  %2707 = vadd.xlane.f32.xlu0 %v2600_v2  ;;  %9045 = vst [vmem:[#allocation42_spill] sm:$0xff] %v6470_v27  ;;  %v2603_v55 = vmul.f32 %v6470_v27, %v6470_v27 }
 0x6ea   : > { %v6478_v23 = vpop.xlane.xlu0 %2659 }
 0x6eb   : > { %9049 = vst [vmem:[#allocation46_spill] sm:$0xff] %v6478_v23 }
 0x6ed   : > { %v6466_v5 = vpop.f32.mrb[20].mxu0  ;;  %2709 = vadd.xlane.f32.xlu0 %v2601_v14  ;;  %v4768_v14 = vld [vmem:[%s8960_s4 + $0xc0] sm:$0xff]  }
 0x6ee   : > { %9044 = vst [vmem:[#allocation41_spill] sm:$0xff] %v6466_v5  ;;  %v6472_v2 = vpop.f32.mrb[21].mxu0  ;;  %v6503_v23 = vunpack.c.h.bf16 %v4768_v14 }
 0x6ef   : > { %9046 = vst [vmem:[#allocation43_spill] sm:$0xff] %v6472_v2  ;;  %v6474_v44 = vpop.f32.mrb[22].mxu0  ;;  %v6491_v2 = vunpack.c.l.bf16 %v4768_v14 }
 0x6f0   : > { %9047 = vst [vmem:[#allocation44_spill] sm:$0xff] %v6474_v44  ;;  %v6476_v30 = vpop.f32.mrb[23].mxu0  ;;  %v2604_v44 = vmul.f32 %v6482_v34, %v6482_v34  ;;  %9057 = vst [vmem:[#allocation54_spill] sm:$0xff] %v6503_v23 }
 0x6f1   : > { %9048 = vst [vmem:[#allocation45_spill] sm:$0xff] %v6476_v30  ;;  %2711 = vadd.xlane.f32.xlu0 %v2602_v57  ;;  %9052 = vst [vmem:[#allocation49_spill] sm:$0xff] %v6491_v2  ;;  %v6495_v57 = vpop.xlane.xlu0 %2661  ;;  %v2605_v27 = vmul.f32 %v6491_v2, %v6491_v2 }
 0x6f2   : > { %9054 = vst [vmem:[#allocation51_spill] sm:$0xff] %v6495_v57 }
 0x6f5   : > { %v6487_v28 = vpop.f32.mrb[24].mxu0  ;;  %2713 = vadd.xlane.f32.xlu0 %v2603_v55  ;;  %v4769_v55 = vld [vmem:[%s8960_s4 + $0xc8] sm:$0xff]   ;;  %v6508_v34 = vpop.xlane.xlu0 %2663 }
 0x6f6   : > { %9051 = vst [vmem:[#allocation48_spill] sm:$0xff] %v6487_v28  ;;  %v6493_v30 = vpop.f32.mrb[25].mxu0  ;;  %9058 = vst [vmem:[#allocation55_spill] sm:$0xff] %v6508_v34  ;;  %v6524_v57 = vunpack.c.h.bf16 %v4769_v55 }
 0x6f7   : > { %9053 = vst [vmem:[#allocation50_spill] sm:$0xff] %v6493_v30  ;;  %v6497_v5 = vpop.f32.mrb[26].mxu0  ;;  %v6514_v30 = vunpack.c.l.bf16 %v4769_v55 }
 0x6f8   : > { %9055 = vst [vmem:[#allocation52_spill] sm:$0xff] %v6497_v5  ;;  %v6499_v45 = vpop.f32.mrb[27].mxu0  ;;  %v2606_v5 = vmul.f32 %v6503_v23, %v6503_v23  ;;  %9064 = vst [vmem:[#allocation61_spill] sm:$0xff] %v6524_v57 }
 0x6f9   : > { %9056 = vst [vmem:[#allocation53_spill] sm:$0xff] %v6499_v45  ;;  %2715 = vadd.xlane.f32.xlu0 %v2604_v44  ;;  %9060 = vst [vmem:[#allocation57_spill] sm:$0xff] %v6514_v30  ;;  %v2607_v2 = vmul.f32 %v6514_v30, %v6514_v30 }
 0x6fd   : > { %v6510_v28 = vpop.f32.mrb[28].mxu0  ;;  %2717 = vadd.xlane.f32.xlu0 %v2605_v27  ;;  %v4770_v27 = vld [vmem:[%s8960_s4 + $0xd0] sm:$0xff]  }
 0x6fe   : > { %9059 = vst [vmem:[#allocation56_spill] sm:$0xff] %v6510_v28  ;;  %v6516_v44 = vpop.f32.mrb[29].mxu0  ;;  %v6529_v28 = vpop.xlane.xlu0 %2665  ;;  %v6541_v47 = vunpack.c.h.bf16 %v4770_v27 }
 0x6ff   : > { %9061 = vst [vmem:[#allocation58_spill] sm:$0xff] %v6516_v44  ;;  %v6518_v45 = vpop.f32.mrb[30].mxu0  ;;  %9065 = vst [vmem:[#allocation62_spill] sm:$0xff] %v6529_v28 }
 0x700   : > { %9062 = vst [vmem:[#allocation59_spill] sm:$0xff] %v6518_v45  ;;  %v6520_v14 = vpop.f32.mrb[31].mxu0  ;;  %9067 = vst [vmem:[#allocation64_spill] sm:$0xff] %v6541_v47 }
 0x701   : > { %9063 = vst [vmem:[#allocation60_spill] sm:$0xff] %v6520_v14  ;;  %2719 = vadd.xlane.f32.xlu0 %v2606_v5  ;;  %v2608_v14 = vmul.f32 %v6524_v57, %v6524_v57  ;;  %v6534_v5 = vunpack.c.l.bf16 %v4770_v27 }
 0x702   : > { %v6536_v30 = vpop.xlane.xlu0 %2667 }
 0x703   : > { %9066 = vst [vmem:[#allocation63_spill] sm:$0xff] %v6534_v5  ;;  %v2609_v28 = vmul.f32 %v6534_v5, %v6534_v5 }
 0x704   : > { %v4949_v23 = vpop.f32.mrb[0].mxu1 }
 0x705   : > { %v2399_v34 = vmul.f32 %v4949_v23, %v6332_v43  ;;  %v2110_v44 = vpop.f32.mrb[1].mxu1  ;;  %2721 = vadd.xlane.f32.xlu0 %v2607_v2  ;;  %v4771_v23 = vld [vmem:[%s8960_s4 + $0xd8] sm:$0xff]  }
 0x706   : > { %v4950_v45 = vpop.f32.mrb[2].mxu1  ;;  %v2397_v42 = vmul.f32 %v6321_v26, %v2110_v44  ;;  %v2610_v26 = vmul.f32 %v6541_v47, %v6541_v47  ;;  %v6550_v44 = vunpack.c.l.bf16 %v4771_v23  ;;  %v6554_v27 = vpop.xlane.xlu0 %2669 }
 0x707   : > { %2497 = vadd.xlane.f32.xlu1 %v2399_v34  ;;  %v2113_v55 = vpop.f32.mrb[3].mxu1  ;;  %v2368_v34 = vmul.f32 %v6367_v17, %v6032_v18  ;;  %9069 = vst [vmem:[#allocation66_spill] sm:$0xff] %v6554_v27  ;;  %v6561_v17 = vunpack.c.h.bf16 %v4771_v23 }
 0x708   : > { %9068 = vst [vmem:[#allocation65_spill] sm:$0xff] %v6550_v44  ;;  %v2611_v18 = vmul.f32 %v6550_v44, %v6550_v44 }
 0x709   : > { %2723 = vadd.xlane.f32.xlu0 %v2608_v14  ;;  %9070 = vst [vmem:[#allocation67_spill] sm:$0xff] %v6561_v17 }
 0x70a   : > { %v6568_v57 = vpop.xlane.xlu0 %2671 }
 0x70b   : > { %2493 = vadd.xlane.f32.xlu1 %v2397_v42  ;;  %v2400_v42 = vmul.f32 %v4950_v45, %v6336_v46  ;;  %9071 = vst [vmem:[#allocation68_spill] sm:$0xff] %v6568_v57  ;;  %v2612_v46 = vmul.f32 %v6561_v17, %v6561_v17 }
 0x70c   : > { %v4953_v43 = vpop.f32.mrb[4].mxu1 }
 0x70d   : > { %v2126_v2 = vpop.f32.mrb[5].mxu1  ;;  %2725 = vadd.xlane.f32.xlu0 %v2609_v28  ;;  %v4772_v28 = vld [vmem:[%s8960_s4 + $0xe0] sm:$0xff]  }
 0x70e   : > { %v6552_v14 = vpop.f32.mrb[6].mxu1  ;;  %v6576_v45 = vunpack.c.l.bf16 %v4772_v28 }
 0x70f   : > { %2435 = vadd.xlane.f32.xlu1 %v2368_v34  ;;  %v6556_v5 = vpop.f32.mrb[7].mxu1  ;;  %v2366_v34 = vmul.f32 %v6025_v12, %v6369_v20  ;;  %v6585_v12 = vunpack.c.h.bf16 %v4772_v28  ;;  %v4773_v20 = vld [vmem:[%s8960_s4 + $0xe8] sm:$0xff]  }
 0x710   : > { %9072 = vst [vmem:[#allocation69_spill] sm:$0xff] %v6576_v45  ;;  %v2613_v44 = vmul.f32 %v6576_v45, %v6576_v45 }
 0x711   : > { %2727 = vadd.xlane.f32.xlu0 %v2610_v26  ;;  %9073 = vst [vmem:[#allocation70_spill] sm:$0xff] %v6585_v12 }
 0x713   : > { %2499 = vadd.xlane.f32.xlu1 %v2400_v42  ;;  %v2398_v42 = vmul.f32 %v6325_v35, %v2113_v55  ;;  %v2614_v35 = vmul.f32 %v6585_v12, %v6585_v12  ;;  %v6600_v55 = vunpack.c.l.bf16 %v4773_v20 }
 0x714   : > { %v6566_v47 = vpop.f32.mrb[8].mxu1 }
 0x715   : > { %v6572_v27 = vpop.f32.mrb[9].mxu1  ;;  %2729 = vadd.xlane.f32.xlu0 %v2611_v18  ;;  %v6590_v18 = vpop.xlane.xlu0 %2673  ;;  %9074 = vst [vmem:[#allocation71_spill] sm:$0xff] %v6600_v55 }
 0x716   : > { %v6578_v23 = vpop.f32.mrb[10].mxu1 }
 0x717   : > { %2431 = vadd.xlane.f32.xlu1 %v2366_v34  ;;  %v6580_v26 = vpop.f32.mrb[11].mxu1  ;;  %v2371_v34 = vmul.f32 %v6380_v31, %v6057_v32  ;;  %v2615_v32 = vmul.f32 %v6600_v55, %v6600_v55  ;;  %v4736_v31 = vunpack.c.h.bf16 %v4773_v20 }
 0x719   : > { %2731 = vadd.xlane.f32.xlu0 %v2612_v46  ;;  %v6606_v45 = vpop.xlane.xlu0 %2675 }
 0x71b   : > { %2495 = vadd.xlane.f32.xlu1 %v2398_v42  ;;  %v2403_v42 = vmul.f32 %v4953_v43, %v6384_v41 }
 0x71c   : > { %v6592_v17 = vpop.f32.mrb[12].mxu1 }
 0x71d   : > { %v6596_v57 = vpop.f32.mrb[13].mxu1  ;;  %2733 = vadd.xlane.f32.xlu0 %v2613_v44  ;;  %v4774_v44 = vld [vmem:[%s8960_s4 + $0xf0] sm:$0xff]  }
 0x71e   : > { %v6602_v28 = vpop.f32.mrb[14].mxu1  ;;  %v6620_v41 = vunpack.c.l.bf16 %v4774_v44 }
 0x71f   : > { %9075 = vst [vmem:[#allocation72_spill] sm:$0xff] %v6602_v28  ;;  %2441 = vadd.xlane.f32.xlu1 %v2371_v34  ;;  %v6604_v46 = vpop.f32.mrb[15].mxu1  ;;  %v2369_v34 = vmul.f32 %v6042_v21, %v6386_v33  ;;  %v2616_v28 = vmul.f32 %v4736_v31, %v4736_v31  ;;  %v4740_v21 = vunpack.c.h.bf16 %v4774_v44  ;;  %v4775_v33 = vld [vmem:[%s8960_s4 + $0xf8] sm:$0xff]  }
 0x720   : > { %9076 = vst [vmem:[#allocation73_spill] sm:$0xff] %v6604_v46  ;;  %9077 = vst [vmem:[#allocation74_spill] sm:$0xff] %v6620_v41  ;;  %v2617_v55 = vmul.f32 %v6620_v41, %v6620_v41 }
 0x721   : > { %2735 = vadd.xlane.f32.xlu0 %v2614_v35  ;;  %v6624_v35 = vpop.xlane.xlu0 %2677 }
 0x723   : > { %2505 = vadd.xlane.f32.xlu1 %v2403_v42  ;;  %v2401_v42 = vmul.f32 %v6361_v7, %v2126_v2  ;;  %v2618_v7 = vmul.f32 %v4740_v21, %v4740_v21  ;;  %v6642_v2 = vunpack.c.l.bf16 %v4775_v33 }
 0x724   : > { %v6614_v12 = vpop.f32.mrb[16].mxu1 }
 0x725   : > { %v6618_v46 = vpop.f32.mrb[17].mxu1  ;;  %2737 = vadd.xlane.f32.xlu0 %v2615_v32  ;;  %9081 = vst [vmem:[#allocation78_spill] sm:$0xff] %v6642_v2  ;;  %v2619_v41 = vmul.f32 %v6642_v2, %v6642_v2 }
 0x726   : > { %v6622_v43 = vpop.f32.mrb[18].mxu1 }
 0x727   : > { %9078 = vst [vmem:[#allocation75_spill] sm:$0xff] %v6622_v43  ;;  %2437 = vadd.xlane.f32.xlu1 %v2369_v34  ;;  %v6626_v20 = vpop.f32.mrb[19].mxu1  ;;  %v6636_v43 = vpop.xlane.xlu0 %2679  ;;  %v2372_v34 = vmul.f32 %v6388_v37, %v6064_v39 }
 0x728   : > { %9079 = vst [vmem:[#allocation76_spill] sm:$0xff] %v6626_v20 }
 0x729   : > { %2739 = vadd.xlane.f32.xlu0 %v2616_v28 }
 0x72b   : > { %2501 = vadd.xlane.f32.xlu1 %v2401_v42  ;;  %v2404_v42 = vmul.f32 %v6552_v14, %v6394_v48  ;;  %v6652_v39 = vpop.xlane.xlu0 %2681 }
 0x72c   : > { %v6634_v32 = vpop.f32.mrb[20].mxu1 }
 0x72d   : > { %9080 = vst [vmem:[#allocation77_spill] sm:$0xff] %v6634_v32  ;;  %v6640_v20 = vpop.f32.mrb[21].mxu1  ;;  %2741 = vadd.xlane.f32.xlu0 %v2617_v55  ;;  %v4744_v32 = vunpack.c.h.bf16 %v4775_v33  ;;  %v2370_v55 = vmul.f32 %v6048_v29, %v6390_v40  ;;  %v2402_v33 = vmul.f32 %v6373_v24, %v6556_v5  ;;  %v2375_v29 = vmul.f32 %v6401_v8, %v6099_v0 }
 0x72e   : > { %v6644_v28 = vpop.f32.mrb[22].mxu1  ;;  %v2407_v24 = vmul.f32 %v6566_v47, %v6426_v52  ;;  %v2373_v0 = vmul.f32 %v6078_v49, %v6407_v22  ;;  %v2405_v8 = vmul.f32 %v6405_v16, %v6572_v27  ;;  %v2408_v52 = vmul.f32 %v6578_v23, %v6438_v4  ;;  %v2624_v22 = vpop.xlane.xlu1 %2623 }
 0x72f   : > { %9082 = vst [vmem:[#allocation79_spill] sm:$0xff] %v6644_v28  ;;  %2443 = vadd.xlane.f32.xlu1 %v2372_v34  ;;  %v6646_v44 = vpop.f32.mrb[23].mxu1  ;;  %v2620_v34 = vmul.f32 %v4744_v32, %v4744_v32  ;;  %v6662_v14 = vpop.xlane.xlu0 %2683  ;;  %v2374_v49 = vmul.f32 %v6087_v56, %v6411_v11  ;;  %v2813_v16 = vmax.f32 %v6340_v50, 1e-24  ;;  %v2815_v27 = vmax.f32 %v6342_v51, 1e-24 }
 0x730   : > { %9083 = vst [vmem:[#allocation80_spill] sm:$0xff] %v6646_v44  ;;  %v2820_v56 = vmax.f32 %v6348_v58, 1e-24  ;;  %v2821_v11 = vmax.f32 %v6350_v59, 1e-24  ;;  %v2379_v51 = vmul.f32 %v6422_v25, %v6141_v38  ;;  %v2377_v59 = vmul.f32 %v6120_v19, %v6428_v15 }
 0x731   : > { %2743 = vadd.xlane.f32.xlu0 %v2618_v7  ;;  %5116 = vrsqrt.f32 %v2813_v16  ;;  %v2824_v23 = vmax.f32 %v6356_v62, 1e-24  ;;  %v2825_v58 = vmax.f32 %v6364_v13, 1e-24  ;;  %v2826_v38 = vmax.f32 %v6378_v36, 1e-24 }
 0x732   : > { %5118 = vrsqrt.f32 %v2815_v27  ;;  %v2630_v50 = vpop.xlane.xlu1 %2629  ;;  %v2827_v25 = vmax.f32 %v6399_v6, 1e-24  ;;  %v2829_v62 = vmax.f32 %v6430_v10, 1e-24  ;;  %v2814_v15 = vmax.f32 %v2624_v22, 1e-24 }
 0x733   : > { %2507 = vadd.xlane.f32.xlu1 %v2404_v42  ;;  %v9089_v10 = vld [vmem:[#allocation40_spill] sm:$0xff]  ;;  %v9094_v16 = vld [vmem:[#allocation46_spill] sm:$0xff] }
 0x734   : > { %v6654_v37 = vpop.f32.mrb[24].mxu1  ;;  %v2832_v27 = vmax.f32 %v9094_v16, 1e-24 }
 0x735   : > { %v6658_v28 = vpop.f32.mrb[25].mxu1  ;;  %2745 = vadd.xlane.f32.xlu0 %v2619_v41 }
 0x736   : > { %v4974_v44 = vpop.f32.mrb[26].mxu1 }
 0x737   : > { %2439 = vadd.xlane.f32.xlu1 %v2370_v55  ;;  %v6660_v48 = vpop.f32.mrb[27].mxu1  ;;  %v2424_v7 = vmul.f32 %v4974_v44, %v4736_v31  ;;  %v6672_v55 = vpop.xlane.xlu0 %2685 }
 0x738   : > { %9084 = vst [vmem:[#allocation81_spill] sm:$0xff] %v6660_v48 }
 0x739   : > { %2747 = vadd.xlane.f32.xlu0 %v2620_v34  ;;  %v9085_v34 = vld [vmem:[#allocation14_spill] sm:$0xff] }
 0x73b   : > { %2503 = vadd.xlane.f32.xlu1 %v2402_v33  ;;  %v6676_v31 = vpop.xlane.xlu0 %2687  ;;  %v5117_v13 = vpop.eup %5116  ;;  %v9087_v33 = vld [vmem:[#allocation33_spill] sm:$0xff] }
 0x73c   : > { %v6666_v42 = vpop.f32.mrb[28].mxu1  ;;  %v5119_v36 = vpop.eup %5118  ;;  %v2830_v6 = vmax.f32 %v9087_v33, 1e-24 }
 0x73d   : > { %v6670_v40 = vpop.f32.mrb[29].mxu1  ;;  %2547 = vadd.xlane.f32.xlu0 %v2424_v7 }
 0x73e   : > { %v4978_v41 = vpop.f32.mrb[30].mxu1 }
 0x73f   : > { %2449 = vadd.xlane.f32.xlu1 %v2375_v29  ;;  %v2225_v2 = vpop.f32.mrb[31].mxu1  ;;  %v2428_v5 = vmul.f32 %v4978_v41, %v4744_v32  ;;  %v6682_v44 = vpop.xlane.xlu0 %2689 }
 0x740   : > { %v2426_v48 = vmul.f32 %v4740_v21, %v2225_v2  ;;  %v2376_v21 = vmul.f32 %v6409_v3, %v6108_v9  ;;  %v2816_v9 = vmax.f32 %v6344_v53, 1e-24  ;;  %v2406_v3 = vmul.f32 %v6417_v63, %v6580_v26 }
 0x741   : > { %v2818_v2 = vmax.f32 %v6346_v54, 1e-24  ;;  %v2822_v53 = vmax.f32 %v6352_v60, 1e-24  ;;  %v2823_v63 = vmax.f32 %v6354_v61, 1e-24  ;;  %v2634_v60 = vpop.xlane.xlu1 %2633 }
 0x742   : > { %2551 = vadd.xlane.f32.xlu0 %v2426_v48  ;;  %5120 = vrsqrt.f32 %v2816_v9  ;;  %v2828_v26 = vmax.f32 %v6413_v1, 1e-24  ;;  %v9086_v48 = vld [vmem:[#allocation31_spill] sm:$0xff]  ;;  %v2817_v1 = vmax.f32 %v2630_v50, 1e-24 }
 0x743   : > { %2513 = vadd.xlane.f32.xlu1 %v2407_v24  ;;  %v6686_v47 = vpop.xlane.xlu0 %2691  ;;  %5122 = vrsqrt.f32 %v2818_v2  ;;  %v2380_v19 = vmul.f32 %v9086_v48, %v9085_v34  ;;  %v2831_v24 = vmax.f32 %v9089_v10, 1e-24  ;;  %v9096_v2 = vld [vmem:[#allocation51_spill] sm:$0xff] }
 0x744   : > { %5124 = vrsqrt.f32 %v2820_v56  ;;  %v2833_v56 = vmax.f32 %v9096_v2, 1e-24  ;;  %v3071_v10 = vld [vmem:[%s8958_s2 + $0x10] sm:$0xff] }
 0x745   : > { %5126 = vrsqrt.f32 %v2821_v11  ;;  %v3135_v2 = vsub.f32 2.0, %v3071_v10 }
 0x746   : > { %2555 = vadd.xlane.f32.xlu0 %v2428_v5  ;;  %5128 = vrsqrt.f32 %v2822_v53 }
 0x747   : > { %2445 = vadd.xlane.f32.xlu1 %v2373_v0  ;;  %5130 = vrsqrt.f32 %v2823_v63 }
 0x748   : > { %5132 = vrsqrt.f32 %v2824_v23 }
 0x749   : > { %5134 = vrsqrt.f32 %v2825_v58  ;;  %v9100_v58 = vld [vmem:[#allocation17_spill] sm:$0xff] }
 0x74a   : > { %5136 = vrsqrt.f32 %v2826_v38 }
 0x74b   : > { %2509 = vadd.xlane.f32.xlu1 %v2405_v8  ;;  %5138 = vrsqrt.f32 %v2827_v25  ;;  %v9091_v8 = vld [vmem:[#allocation32_spill] sm:$0xff]  ;;  %v9102_v25 = vld [vmem:[#allocation62_spill] sm:$0xff] }
 0x74c   : > { %v6725_v29 = vpop.eup %5120  ;;  %5140 = vrsqrt.f32 %v2828_v26 }
 0x74d   : > { %v6727_v41 = vpop.eup %5122  ;;  %5142 = vrsqrt.f32 %v2829_v62  ;;  %v2836_v62 = vmax.f32 %v6536_v30, 1e-24 }
 0x74e   : > { %9088 = vst [vmem:[#allocation14_spill] sm:$0xff] %v6727_v41  ;;  %v6730_v0 = vpop.eup %5124  ;;  %5144 = vrsqrt.f32 %v2814_v15 }
 0x74f   : > { %2451 = vadd.xlane.f32.xlu1 %v2376_v21  ;;  %9090 = vst [vmem:[#allocation31_spill] sm:$0xff] %v6730_v0  ;;  %v9092_v21 = vld [vmem:[#allocation13_spill] sm:$0xff]  ;;  %v6734_v22 = vpop.eup %5126  ;;  %5146 = vrsqrt.f32 %v2830_v6  ;;  %v9107_v6 = vld [vmem:[#allocation68_spill] sm:$0xff]  ;;  %v3075_v0 = vld [vmem:[%s8958_s2 + $0x30] sm:$0xff] }
 0x750   : > { %9093 = vst [vmem:[#allocation33_spill] sm:$0xff] %v6734_v22  ;;  %5148 = vrsqrt.f32 %v2817_v1  ;;  %v2838_v1 = vmax.f32 %v9107_v6, 1e-24  ;;  %v9160_v22 = vld [vmem:[#allocation47_spill] sm:$0xff] }
 0x751   : > { %5150 = vrsqrt.f32 %v2831_v24 }
 0x753   : > { %2515 = vadd.xlane.f32.xlu1 %v2408_v52  ;;  %v2378_v52 = vmul.f32 %v9092_v21, %v9091_v8  ;;  %v9110_v8 = vld [vmem:[#allocation15_spill] sm:$0xff] }
 0x755   : > { %v2434_v5 = vpop.xlane.xlu1 %2433 }
 0x756   : > { %v6692_v32 = vpop.xlane.xlu0 %2429  ;;  %v2751_v11 = vmul.f32 2.0, %v2434_v5  ;;  %v9109_v5 = vld [vmem:[#allocation36_spill] sm:$0xff] }
 0x757   : > { %2447 = vadd.xlane.f32.xlu1 %v2374_v49  ;;  %v2819_v49 = vmax.f32 %v2634_v60, 1e-24  ;;  %v2749_v63 = vmul.f32 2.0, %v6692_v32  ;;  %v2835_v60 = vmax.f32 %v9102_v25, 1e-24  ;;  %v2381_v21 = vmul.f32 %v9110_v8, %v9109_v5 }
 0x758   : > { %v2943_v15 = vmul.f32 %v5119_v36, %v2751_v11  ;;  %v3069_v11 = vld [vmem:[%s8958_s2] sm:$0xff]  ;;  %v2843_v25 = vmax.f32 %v6652_v39, 1e-24  ;;  %v6813_v39 = vld [vmem:[%s8959_s3 + $0x10] sm:$0xff] }
 0x759   : > { %5152 = vrsqrt.f32 %v2819_v49  ;;  %v2941_v24 = vmul.f32 %v5117_v13, %v2749_v63  ;;  %v2840_v49 = vmax.f32 %v6606_v45, 1e-24  ;;  %v2841_v13 = vmax.f32 %v6624_v35, 1e-24 }
 0x75a   : > { %v6700_v4 = vpop.xlane.xlu0 %2693  ;;  %5154 = vrsqrt.f32 %v2832_v27  ;;  %v2842_v63 = vmax.f32 %v6636_v43, 1e-24 }
 0x75b   : > { %2511 = vadd.xlane.f32.xlu1 %v2406_v3  ;;  %v6739_v3 = vpop.eup %5128  ;;  %5156 = vrsqrt.f32 %v2833_v56  ;;  %v3007_v56 = vsub.f32 2.0, %v2943_v15  ;;  %v3005_v35 = vsub.f32 2.0, %v2941_v24 }
 0x75c   : > { %9095 = vst [vmem:[#allocation40_spill] sm:$0xff] %v6739_v3  ;;  %v6742_v50 = vpop.eup %5130  ;;  %v9159_v3 = vld [vmem:[#allocation35_spill] sm:$0xff] }
 0x75d   : > { %9097 = vst [vmem:[#allocation32_spill] sm:$0xff] %v6742_v50  ;;  %v6746_v23 = vpop.eup %5132  ;;  %v6821_v24 = vmax.f32 %v3005_v35, 0.0  ;;  %v9163_v50 = vld [vmem:[#allocation39_spill] sm:$0xff] }
 0x75e   : > { %v6708_v54 = vpop.xlane.xlu0 %2695  ;;  %9099 = vst [vmem:[#allocation13_spill] sm:$0xff] %v6746_v23  ;;  %v6751_v26 = vpop.eup %5134  ;;  %v6946_v23 = vmul.f32 %v9159_v3, %v6596_v57  ;;  %v3102_v57 = vld [vmem:[%s8958_s2 + $0x108] sm:$0xff] }
 0x75f   : > { %2457 = vadd.xlane.f32.xlu1 %v2379_v51  ;;  %v9098_v51 = vld [vmem:[#allocation55_spill] sm:$0xff]  ;;  %9103 = vst [vmem:[#allocation46_spill] sm:$0xff] %v6751_v26  ;;  %v6756_v48 = vpop.eup %5136  ;;  %v9157_v26 = vld [vmem:[#allocation42_spill] sm:$0xff]  ;;  %vm3391_vm13 = vcmp.eq.f32.partialorder %v6821_v24, inf  ;;  %vm3393_vm15 = vcmp.eq.f32.partialorder %v6821_v24, 0.0 }
 0x760   : > { %v2834_v53 = vmax.f32 %v9098_v51, 1e-24  ;;  %9104 = vst [vmem:[#allocation51_spill] sm:$0xff] %v6756_v48  ;;  %v6759_v33 = vpop.eup %5138  ;;  %v9113_v51 = vld [vmem:[#allocation18_spill] sm:$0xff] }
 0x761   : > { %9106 = vst [vmem:[#allocation55_spill] sm:$0xff] %v6759_v33  ;;  %v6765_v30 = vpop.eup %5140 }
 0x762   : > { %v6716_v61 = vpop.xlane.xlu0 %2697  ;;  %5158 = vrsqrt.f32 %v2834_v53  ;;  %9108 = vst [vmem:[#allocation17_spill] sm:$0xff] %v6765_v30  ;;  %v6770_v36 = vpop.eup %5142  ;;  %v9114_v53 = vld [vmem:[#allocation37_spill] sm:$0xff]  ;;  %v9148_v30 = vld [vmem:[#allocation30_spill] sm:$0xff] }
 0x763   : > { %2453 = vadd.xlane.f32.xlu1 %v2377_v59  ;;  %v9101_v59 = vld [vmem:[#allocation34_spill] sm:$0xff]  ;;  %5160 = vrsqrt.f32 %v2835_v60  ;;  %v6775_v27 = vpop.eup %5144  ;;  %v2384_v45 = vmul.f32 %v9114_v53, %v9113_v51  ;;  %v9122_v51 = vld [vmem:[#allocation21_spill] sm:$0xff] }
 0x764   : > { %v2383_v38 = vmul.f32 %v9101_v59, %v9100_v58  ;;  %9111 = vst [vmem:[#allocation34_spill] sm:$0xff] %v6770_v36  ;;  %5162 = vrsqrt.f32 %v2836_v62  ;;  %v6789_v58 = vld [vmem:[%s8959_s3] sm:$0xff]  ;;  %v6794_v59 = vld [vmem:[%s8959_s3 + $0x8] sm:$0xff] }
 0x765   : > { %v4108_v60 = vsel %vm3966_vm11, %v6789_v58, 0.0  ;;  %v4109_v43 = vsel %vm3966_vm11, %v6794_v59, 0.0  ;;  %v9123_v53 = vld [vmem:[#allocation41_spill] sm:$0xff]  ;;  %v9139_v36 = vld [vmem:[#allocation26_spill] sm:$0xff] }
 0x766   : > { %v6723_v7 = vpop.xlane.xlu0 %2699  ;;  %v4110_v5 = vadd.f32 %v4109_v43, %v4108_v60 }
 0x767   : > { %2459 = vadd.xlane.f32.xlu1 %v2380_v19  ;;  %v9105_v19 = vld [vmem:[#allocation66_spill] sm:$0xff] }
 0x768   : > { %v2837_v32 = vmax.f32 %v9105_v19, 1e-24  ;;  %9115 = vst [vmem:[#allocation66_spill] sm:$0xff] %v6794_v59  ;;  %v2844_v19 = vmax.f32 %v6662_v14, 1e-24  ;;  %v4111_v14 = vsel %vm3966_vm11, %v6813_v39, 0.0 }
 0x76a   : > { %v6737_v9 = vpop.xlane.xlu0 %2701  ;;  %5164 = vrsqrt.f32 %v2837_v32  ;;  %v3133_v32 = vsub.f32 2.0, %v3069_v11 }
 0x76b   : > { %2455 = vadd.xlane.f32.xlu1 %v2378_v52  ;;  %v2839_v52 = vmax.f32 %v6590_v18, 1e-24  ;;  %v6781_v18 = vpop.eup %5146  ;;  %5166 = vrsqrt.f32 %v2838_v1  ;;  %v6815_v1 = vmax.f32 %v3007_v56, 0.0  ;;  %v6828_v56 = vadd.f32 0.2, %v3135_v2  ;;  %v9126_v2 = vld [vmem:[#allocation19_spill] sm:$0xff] }
 0x76c   : > { %9112 = vst [vmem:[#allocation62_spill] sm:$0xff] %v6781_v18  ;;  %v6835_v35 = vadd.f32 0.2, %v3133_v32  ;;  %v9130_v32 = vld [vmem:[#allocation45_spill] sm:$0xff]  ;;  %v9138_v18 = vld [vmem:[#allocation23_spill] sm:$0xff] }
 0x76d   : > { %5168 = vrsqrt.f32 %v2839_v52  ;;  %v9120_v52 = vld [vmem:[#allocation16_spill] sm:$0xff]  ;;  %vm3405_vm12 = vcmp.eq.f32.partialorder %v6815_v1, inf  ;;  %vm3407_vm14 = vcmp.eq.f32.partialorder %v6815_v1, 0.0 }
 0x76e   : > { %v6754_v34 = vpop.xlane.xlu0 %2703  ;;  %5170 = vrsqrt.f32 %v2840_v49 }
 0x76f   : > { %2465 = vadd.xlane.f32.xlu1 %v2383_v38  ;;  %v6796_v38 = vpop.eup %5148  ;;  %5172 = vrsqrt.f32 %v2841_v13  ;;  %v2845_v13 = vmax.f32 %v6672_v55, 1e-24  ;;  %v9125_v55 = vld [vmem:[#allocation43_spill] sm:$0xff] }
 0x770   : > { %v6803_v62 = vpop.eup %5150  ;;  %5174 = vrsqrt.f32 %v2842_v63  ;;  %v2846_v63 = vmax.f32 %v6676_v31, 1e-24 }
 0x771   : > { %9116 = vst [vmem:[#allocation68_spill] sm:$0xff] %v6803_v62  ;;  %v6808_v6 = vpop.eup %5152  ;;  %5176 = vrsqrt.f32 %v2843_v25  ;;  %v3103_v25 = vld [vmem:[%s8958_s2 + $0x110] sm:$0xff]  ;;  %v9140_v62 = vld [vmem:[#allocation52_spill] sm:$0xff] }
 0x772   : > { %v6773_v16 = vpop.xlane.xlu0 %2705  ;;  %v6817_v10 = vpop.eup %5154  ;;  %5178 = vrsqrt.f32 %v2844_v19  ;;  %v2847_v19 = vmax.f32 %v6682_v44, 1e-24 }
 0x773   : > { %2461 = vadd.xlane.f32.xlu1 %v2381_v21  ;;  %9117 = vst [vmem:[#allocation36_spill] sm:$0xff] %v6817_v10  ;;  %v6823_v8 = vpop.eup %5156  ;;  %v9119_v21 = vld [vmem:[#allocation38_spill] sm:$0xff]  ;;  %5180 = vrsqrt.f32 %v6815_v1 }
 0x774   : > { %9118 = vst [vmem:[#allocation15_spill] sm:$0xff] %v6823_v8  ;;  %v2382_v49 = vmul.f32 %v9120_v52, %v9119_v21  ;;  %v6830_v11 = vpop.eup %5158  ;;  %v2385_v21 = vmul.f32 %v9126_v2, %v9125_v55  ;;  %v9127_v52 = vld [vmem:[#allocation22_spill] sm:$0xff]  ;;  %5182 = vrsqrt.f32 %v6821_v24  ;;  %v4112_v55 = vadd.f32 %v4111_v14, %v4110_v5  ;;  %v9134_v2 = vld [vmem:[#allocation25_spill] sm:$0xff] }
 0x775   : > { %9121 = vst [vmem:[#allocation18_spill] sm:$0xff] %v6830_v11  ;;  %v6842_v43 = vpop.eup %5160  ;;  %v9128_v11 = vld [vmem:[#allocation44_spill] sm:$0xff]  ;;  %5184 = vrsqrt.f32 %v2845_v13  ;;  %v6881_v14 = vmul.f32 %v9140_v62, %v9139_v36  ;;  %v9141_v5 = vld [vmem:[#allocation53_spill] sm:$0xff]  ;;  %v9147_v36 = vld [vmem:[#allocation27_spill] sm:$0xff] }
 0x776   : > { %v6806_v15 = vpop.xlane.xlu0 %2707  ;;  %9124 = vst [vmem:[#allocation37_spill] sm:$0xff] %v6842_v43  ;;  %v6848_v8 = vmul.f32 %v9128_v11, %v9127_v52  ;;  %v6852_v31 = vpop.eup %5162  ;;  %v2848_v43 = vmax.f32 %v6686_v47, 1e-24  ;;  %v6863_v11 = vld [vmem:[%s8959_s3 + $0x18] sm:$0xff]  ;;  %5186 = vrsqrt.f32 %v2846_v63  ;;  %v6909_v63 = vld [vmem:[%s8959_s3 + $0x110] sm:$0xff] }
 0x777   : > { %2467 = vadd.xlane.f32.xlu1 %v2384_v45  ;;  %v2387_v45 = vmul.f32 %v9123_v53, %v9122_v51  ;;  %9129 = vst [vmem:[#allocation38_spill] sm:$0xff] %v6852_v31  ;;  %v9131_v51 = vld [vmem:[#allocation20_spill] sm:$0xff]  ;;  %9132 = vst [vmem:[#allocation16_spill] sm:$0xff] %v6863_v11  ;;  %v6865_v44 = vpop.eup %5164  ;;  %v3167_v31 = vsub.f32 2.0, %v3103_v25  ;;  %5188 = vrsqrt.f32 %v2847_v19 }
 0x778   : > { %v6856_v53 = vmul.f32 %v9131_v51, %v9130_v32  ;;  %9133 = vst [vmem:[#allocation21_spill] sm:$0xff] %v6865_v44  ;;  %v4113_v32 = vsel %vm3966_vm11, %v6863_v11, 0.0  ;;  %v6873_v47 = vpop.eup %5166  ;;  %v9137_v51 = vld [vmem:[#allocation50_spill] sm:$0xff]  ;;  %v9142_v44 = vld [vmem:[#allocation24_spill] sm:$0xff]  ;;  %9150 = vst [vmem:[#allocation19_spill] sm:$0xff] %v6909_v63  ;;  %5190 = vrsqrt.f32 %v2848_v43 }
 0x779   : > { %9136 = vst [vmem:[#allocation41_spill] sm:$0xff] %v6873_v47  ;;  %v6877_v10 = vmul.f32 %v9138_v18, %v9137_v51  ;;  %v6885_v48 = vmul.f32 %v9142_v44, %v9141_v5  ;;  %v3101_v25 = vld [vmem:[%s8958_s2 + $0x100] sm:$0xff]  ;;  %v9146_v47 = vld [vmem:[#allocation58_spill] sm:$0xff]  ;;  %v9149_v44 = vld [vmem:[#allocation59_spill] sm:$0xff]  ;;  %v6938_v43 = vadd.f32 0.2, %v3167_v31 }
 0x77a   : > { %v6837_v60 = vpop.xlane.xlu0 %2709  ;;  %v9145_v18 = vld [vmem:[#allocation56_spill] sm:$0xff]  ;;  %v6900_v62 = vmul.f32 %v9147_v36, %v9146_v47  ;;  %v6904_v5 = vmul.f32 %v9149_v44, %v9148_v30  ;;  %v6922_v30 = vsel %vm3966_vm11, %v6909_v63, 0.0  ;;  %v4114_v44 = vadd.f32 %v4113_v32, %v4112_v55  ;;  %v9174_v63 = vld [vmem:[#allocation54_spill] sm:$0xff] }
 0x77b   : > { %2463 = vadd.xlane.f32.xlu1 %v2382_v49  ;;  %v9135_v49 = vld [vmem:[#allocation48_spill] sm:$0xff]  ;;  %9154 = vst [vmem:[#allocation44_spill] sm:$0xff] %v6922_v30 }
 0x77c   : > { %v6869_v52 = vmul.f32 %v9135_v49, %v9134_v2  ;;  %v6892_v2 = vpop.eup %5168  ;;  %v9144_v49 = vld [vmem:[#allocation29_spill] sm:$0xff]  ;;  %v9153_v47 = vld [vmem:[#allocation28_spill] sm:$0xff] }
 0x77d   : > { %9143 = vst [vmem:[#allocation43_spill] sm:$0xff] %v6892_v2  ;;  %v6896_v51 = vmul.f32 %v9145_v18, %v9144_v49  ;;  %v3072_v49 = vld [vmem:[%s8958_s2 + $0x18] sm:$0xff]  ;;  %v6914_v18 = vpop.eup %5170  ;;  %v6930_v19 = vld [vmem:[%s8959_s3 + $0x20] sm:$0xff] }
 0x77e   : > { %v6887_v13 = vpop.xlane.xlu0 %2711  ;;  %9151 = vst [vmem:[#allocation22_spill] sm:$0xff] %v6914_v18  ;;  %v9152_v2 = vld [vmem:[#allocation60_spill] sm:$0xff]  ;;  %9155 = vst [vmem:[#allocation45_spill] sm:$0xff] %v6930_v19  ;;  %v6932_v18 = vpop.eup %5172  ;;  %v4115_v30 = vsel %vm3966_vm11, %v6930_v19, 0.0  ;;  %v3136_v31 = vsub.f32 2.0, %v3072_v49  ;;  %v9170_v49 = vld [vmem:[#allocation75_spill] sm:$0xff] }
 0x77f   : > { %2473 = vadd.xlane.f32.xlu1 %v2387_v45  ;;  %v6918_v36 = vmul.f32 %v9153_v47, %v9152_v2  ;;  %v3104_v45 = vld [vmem:[%s8958_s2 + $0x118] sm:$0xff]  ;;  %9156 = vst [vmem:[#allocation20_spill] sm:$0xff] %v6932_v18  ;;  %v6936_v2 = vmul.f32 %v6592_v17, %v9157_v26  ;;  %v3165_v47 = vsub.f32 2.0, %v3101_v25  ;;  %v6942_v33 = vpop.eup %5174  ;;  %v9162_v18 = vld [vmem:[#allocation73_spill] sm:$0xff] }
 0x780   : > { %9158 = vst [vmem:[#allocation25_spill] sm:$0xff] %v6942_v33  ;;  %v9161_v55 = vld [vmem:[#allocation72_spill] sm:$0xff]  ;;  %v6954_v17 = vmul.f32 %v9163_v50, %v9162_v18  ;;  %v3070_v25 = vld [vmem:[%s8958_s2 + $0x8] sm:$0xff]  ;;  %v6964_v3 = vpop.eup %5176  ;;  %v3168_v41 = vsub.f32 2.0, %v3104_v45  ;;  %v4116_v45 = vadd.f32 %v4115_v30, %v4114_v44 }
 0x781   : > { %v6950_v32 = vmul.f32 %v9161_v55, %v9160_v22  ;;  %9164 = vst [vmem:[#allocation48_spill] sm:$0xff] %v6964_v3  ;;  %v9165_v33 = vld [vmem:[#allocation57_spill] sm:$0xff]  ;;  %v6981_v11 = vpop.eup %5178  ;;  %v9173_v3 = vld [vmem:[#allocation76_spill] sm:$0xff] }
 0x782   : > { %v6956_v26 = vpop.xlane.xlu0 %2713  ;;  %v6968_v22 = vmul.f32 %v6614_v12, %v9165_v33  ;;  %v9167_v50 = vld [vmem:[#allocation49_spill] sm:$0xff]  ;;  %9172 = vst [vmem:[#allocation52_spill] sm:$0xff] %v6981_v11  ;;  %v6985_v12 = vmul.f32 %v9174_v63, %v9173_v3  ;;  %v5181_v11 = vpop.eup %5180  ;;  %v7001_v63 = vadd.f32 0.2, %v3165_v47  ;;  %v3134_v3 = vsub.f32 2.0, %v3070_v25  ;;  %v9185_v30 = vld [vmem:[#allocation80_spill] sm:$0xff] }
 0x783   : > { %v6972_v18 = vmul.f32 %v9167_v50, %v6618_v46  ;;  %v9169_v55 = vld [vmem:[#allocation61_spill] sm:$0xff]  ;;  %2469 = vadd.xlane.f32.xlu1 %v2385_v21  ;;  %v9179_v50 = vld [vmem:[#allocation63_spill] sm:$0xff]  ;;  %v9186_v44 = vld [vmem:[#allocation64_spill] sm:$0xff]  ;;  %v7022_v25 = vadd.f32 0.2, %v3136_v31 }
 0x784   : > { %9166 = vst [vmem:[#allocation50_spill] sm:$0xff] %v6968_v22  ;;  %v6976_v19 = vmul.f32 %v9170_v49, %v9169_v55  ;;  %9175 = vst [vmem:[#allocation53_spill] sm:$0xff] %v6985_v12  ;;  %v9176_v33 = vld [vmem:[#allocation65_spill] sm:$0xff]  ;;  %v6993_v55 = vmul.f32 %v9179_v50, %v6640_v20  ;;  %v3107_v21 = vld [vmem:[%s8958_s2 + $0x130] sm:$0xff]  ;;  %v7013_v12 = vmul.f32 %v9186_v44, %v9185_v30  ;;  %v7035_v30 = vadd.f32 0.2, %v3168_v41 }
 0x785   : > { %9168 = vst [vmem:[#allocation23_spill] sm:$0xff] %v6972_v18  ;;  %v9177_v22 = vld [vmem:[#allocation77_spill] sm:$0xff]  ;;  %9181 = vst [vmem:[#allocation56_spill] sm:$0xff] %v7001_v63  ;;  %v9182_v50 = vld [vmem:[#allocation67_spill] sm:$0xff] }
 0x786   : > { %9171 = vst [vmem:[#allocation26_spill] sm:$0xff] %v6976_v19  ;;  %v6989_v46 = vmul.f32 %v9177_v22, %v9176_v33  ;;  %9180 = vst [vmem:[#allocation29_spill] sm:$0xff] %v6993_v55  ;;  %v3266_v49 = vld [vmem:[%s8959_s3 + $0x28] sm:$0xff]  ;;  %v3166_v19 = vsub.f32 2.0, %v3102_v57  ;;  %v3073_v22 = vld [vmem:[%s8958_s2 + $0x20] sm:$0xff]  ;;  %v5183_v33 = vpop.eup %5182  ;;  %v7015_v59 = vpop.xlane.xlu0 %2715  ;;  %v3139_v57 = vsub.f32 2.0, %v3075_v0 }
 0x787   : > { %v4117_v20 = vsel %vm3966_vm11, %v3266_v49, 0.0  ;;  %9187 = vst [vmem:[#allocation27_spill] sm:$0xff] %v7013_v12  ;;  %v7020_v47 = vld [vmem:[%s8959_s3 + $0x100] sm:$0xff]  ;;  %v7024_v49 = vpop.eup %5184  ;;  %v9189_v63 = vld [vmem:[#allocation71_spill] sm:$0xff]  ;;  %2475 = vadd.xlane.f32.xlu1 %v6848_v8  ;;  %9192 = vst [vmem:[#allocation28_spill] sm:$0xff] %v7035_v30  ;;  %v3171_v0 = vsub.f32 2.0, %v3107_v21  ;;  %v3404_v8 = vmul.f32 %v5181_v11, %v6815_v1 }
 0x788   : > { %9178 = vst [vmem:[#allocation24_spill] sm:$0xff] %v6989_v46  ;;  %v9183_v46 = vld [vmem:[#allocation79_spill] sm:$0xff]  ;;  %9188 = vst [vmem:[#allocation30_spill] sm:$0xff] %v7020_v47  ;;  %v3105_v44 = vld [vmem:[%s8958_s2 + $0x120] sm:$0xff]  ;;  %v7060_v12 = vadd.f32 0.2, %v3134_v3 }
 0x789   : > { %v7009_v55 = vmul.f32 %v9183_v46, %v9182_v50  ;;  %v7028_v46 = vmul.f32 %v6654_v37, %v9189_v63  ;;  %v7033_v50 = vsel %vm3966_vm11, %v7020_v47, 0.0  ;;  %v7040_v31 = vld [vmem:[%s8959_s3 + $0x118] sm:$0xff]  ;;  %v7045_v37 = vpop.eup %5186  ;;  %v7055_v41 = vld [vmem:[%s8959_s3 + $0x30] sm:$0xff]  ;;  %v7062_v30 = vadd.f32 0.2, %v3166_v19  ;;  %v9199_v18 = vld [vmem:[#allocation81_spill] sm:$0xff] }
 0x78a   : > { %9191 = vst [vmem:[#allocation60_spill] sm:$0xff] %v7033_v50  ;;  %9193 = vst [vmem:[#allocation42_spill] sm:$0xff] %v7040_v31  ;;  %v7050_v63 = vsel %vm3966_vm11, %v7040_v31, 0.0  ;;  %v3137_v50 = vsub.f32 2.0, %v3073_v22  ;;  %v7057_v21 = vpop.eup %5188  ;;  %v4119_v11 = vsel %vm3966_vm11, %v7055_v41, 0.0  ;;  %v9200_v22 = vld [vmem:[#allocation70_spill] sm:$0xff] }
 0x78b   : > { %9184 = vst [vmem:[#allocation58_spill] sm:$0xff] %v7009_v55  ;;  %9190 = vst [vmem:[#allocation59_spill] sm:$0xff] %v7028_v46  ;;  %v4118_v46 = vadd.f32 %v4117_v20, %v4116_v45  ;;  %v3390_v55 = vmul.f32 %v5183_v33, %v6821_v24  ;;  %v7066_v31 = vpop.eup %5190  ;;  %v7074_v45 = vmul.f32 %v9200_v22, %v9199_v18  ;;  %v7076_v20 = vpop.xlane.xlu0 %2717  ;;  %v7081_v19 = vld [vmem:[%s8959_s3 + $0x108] sm:$0xff]  ;;  %v7083_v3 = vadd.f32 0.2, %v3139_v57  ;;  %v7088_v33 = vld [vmem:[%s8959_s3 + $0x130] sm:$0xff] }
 0x78c   : > { %9194 = vst [vmem:[#allocation35_spill] sm:$0xff] %v7050_v63  ;;  %9195 = vst [vmem:[#allocation47_spill] sm:$0xff] %v7055_v41  ;;  %v9197_v63 = vld [vmem:[#allocation69_spill] sm:$0xff]  ;;  %v3076_v18 = vld [vmem:[%s8958_s2 + $0x38] sm:$0xff]  ;;  %2471 = vadd.xlane.f32.xlu1 %v6856_v53  ;;  %v7099_v57 = vadd.f32 0.2, %v3171_v0 }
 0x78d   : > { %9196 = vst [vmem:[#allocation72_spill] sm:$0xff] %v7062_v30  ;;  %v7070_v47 = vmul.f32 %v9197_v63, %v6658_v28  ;;  %9201 = vst [vmem:[#allocation39_spill] sm:$0xff] %v7074_v45  ;;  %v3169_v28 = vsub.f32 2.0, %v3105_v44  ;;  %v7097_v63 = vsel %vm3966_vm11, %v7081_v19, 0.0  ;;  %v7103_v22 = vsel %vm3966_vm11, %v7088_v33, 0.0  ;;  %v3108_v44 = vld [vmem:[%s8958_s2 + $0x138] sm:$0xff] }
 0x78e   : > { %9202 = vst [vmem:[#allocation57_spill] sm:$0xff] %v7081_v19  ;;  %9203 = vst [vmem:[#allocation49_spill] sm:$0xff] %v7083_v3  ;;  %v3406_v45 = vsel %vm3405_vm12, %v6815_v1, %v3404_v8  ;;  %v3268_v53 = vld [vmem:[%s8959_s3 + $0x38] sm:$0xff]  ;;  %v3074_v0 = vld [vmem:[%s8958_s2 + $0x28] sm:$0xff]  ;;  %v3394_v41 = vand.u32 2147483648, %v6821_v24 }
 0x78f   : > { %9198 = vst [vmem:[#allocation73_spill] sm:$0xff] %v7070_v47  ;;  %9204 = vst [vmem:[#allocation61_spill] sm:$0xff] %v7088_v33  ;;  %v7110_v47 = vadd.f32 0.2, %v3137_v50  ;;  %v3392_v33 = vsel %vm3391_vm13, %v6821_v24, %v3390_v55  ;;  %v4121_v8 = vsel %vm3966_vm11, %v3268_v53, 0.0  ;;  %v3106_v50 = vld [vmem:[%s8958_s2 + $0x128] sm:$0xff]  ;;  %v7126_v3 = vpop.xlane.xlu0 %2719 }
 0x790   : > { %9205 = vst [vmem:[#allocation75_spill] sm:$0xff] %v7097_v63  ;;  %9206 = vst [vmem:[#allocation76_spill] sm:$0xff] %v7099_v57  ;;  %v4120_v63 = vadd.f32 %v4119_v11, %v4118_v46  ;;  %v3140_v57 = vsub.f32 2.0, %v3076_v18  ;;  %v7128_v19 = vadd.f32 0.2, %v3169_v28  ;;  %v7133_v46 = vld [vmem:[%s8959_s3 + $0x120] sm:$0xff]  ;;  %2481 = vadd.xlane.f32.xlu1 %v6869_v52  ;;  %v3395_v53 = vsel %vm3393_vm15, %v3394_v41, %v3392_v33 }
 0x791   : > { %9207 = vst [vmem:[#allocation54_spill] sm:$0xff] %v7103_v22  ;;  %9208 = vst [vmem:[#allocation65_spill] sm:$0xff] %v7110_v47  ;;  %v3408_v22 = vand.u32 2147483648, %v6815_v1  ;;  %v3172_v55 = vsub.f32 2.0, %v3108_v44  ;;  %v7139_v1 = vsel %vm3966_vm11, %v7133_v46, 0.0  ;;  %v3138_v18 = vsub.f32 2.0, %v3074_v0 }
 0x792   : > { %9209 = vst [vmem:[#allocation77_spill] sm:$0xff] %v7128_v19  ;;  %9210 = vst [vmem:[#allocation63_spill] sm:$0xff] %v7139_v1  ;;  %v2849_v28 = vmax.f32 %v6700_v4, 1e-24  ;;  %v3170_v19 = vsub.f32 2.0, %v3106_v50  ;;  %v3269_v30 = vld [vmem:[%s8959_s3 + $0x40] sm:$0xff]  ;;  %v4122_v47 = vadd.f32 %v4121_v8, %v4120_v63 }
 0x793   : > { %v3409_v11 = vsel %vm3407_vm14, %v3408_v22, %v3406_v45  ;;  %v9211_v44 = vld [vmem:[#allocation78_spill] sm:$0xff]  ;;  %v2850_v24 = vmax.f32 %v6708_v54, 1e-24  ;;  %v7150_v52 = vadd.f32 0.2, %v3140_v57  ;;  %v4123_v4 = vsel %vm3966_vm11, %v3269_v30, 0.0 }
 0x794   : > { %v7147_v45 = vmul.f32 %v6666_v42, %v9211_v44  ;;  %v3079_v41 = vld [vmem:[%s8958_s2 + $0x50] sm:$0xff]  ;;  %v3839_v63 = vmul.f32 %v3409_v11, %v6828_v56  ;;  %v2851_v0 = vmax.f32 %v6716_v61, 1e-24  ;;  %v7162_v42 = vpop.xlane.xlu0 %2721  ;;  %v7164_v8 = vadd.f32 0.2, %v3172_v55  ;;  %v7169_v54 = vld [vmem:[%s8959_s3 + $0x138] sm:$0xff]  ;;  %2477 = vadd.xlane.f32.xlu1 %v6877_v10  ;;  %v2498_v50 = vpop.xlane.xlu1 %2497 }
 0x795   : > { %v9212_v33 = vld [vmem:[#allocation74_spill] sm:$0xff]  ;;  %v2852_v57 = vmax.f32 %v6723_v7, 1e-24  ;;  %v7179_v61 = vsel %vm3966_vm11, %v7169_v54, 0.0  ;;  %v7181_v56 = vadd.f32 0.2, %v3138_v18  ;;  %5192 = vrsqrt.f32 %v2849_v28 }
 0x796   : > { %v7158_v22 = vmul.f32 %v9212_v33, %v6670_v40  ;;  %v3111_v30 = vld [vmem:[%s8958_s2 + $0x150] sm:$0xff]  ;;  %v3837_v40 = vmul.f32 %v3395_v53, %v6835_v35  ;;  %9213 = vst [vmem:[#allocation67_spill] sm:$0xff] %v7179_v61  ;;  %v7183_v55 = vadd.f32 0.2, %v3170_v19  ;;  %v3143_v11 = vsub.f32 2.0, %v3079_v41  ;;  %v3077_v44 = vld [vmem:[%s8958_s2 + $0x40] sm:$0xff] }
 0x797   : > { %v4124_v35 = vadd.f32 %v4123_v4, %v4122_v47  ;;  %v3270_v7 = vld [vmem:[%s8959_s3 + $0x48] sm:$0xff]  ;;  %5194 = vrsqrt.f32 %v2850_v24  ;;  %v2853_v10 = vmax.f32 %v6737_v9, 1e-24  ;;  %v3175_v53 = vsub.f32 2.0, %v3111_v30  ;;  %v3109_v18 = vld [vmem:[%s8958_s2 + $0x140] sm:$0xff] }
 0x798   : > { %v4125_v19 = vsel %vm3966_vm11, %v3270_v7, 0.0  ;;  %v3903_v28 = vmul.f32 %v3839_v63, %v6813_v39  ;;  %5196 = vrsqrt.f32 %v2851_v0  ;;  %v2854_v41 = vmax.f32 %v6754_v34, 1e-24  ;;  %v7198_v4 = vpop.xlane.xlu0 %2723  ;;  %v3298_v24 = vld [vmem:[%s8959_s3 + $0x128] sm:$0xff]  ;;  %2483 = vadd.xlane.f32.xlu1 %v6881_v14  ;;  %v2494_v63 = vpop.xlane.xlu1 %2493  ;;  %v3271_v0 = vld [vmem:[%s8959_s3 + $0x50] sm:$0xff] }
 0x799   : > { %v2783_v47 = vmul.f32 2.0, %v2498_v50  ;;  %v3901_v9 = vmul.f32 %v3837_v40, %v6789_v58  ;;  %5198 = vrsqrt.f32 %v2852_v57  ;;  %v7206_v33 = vsel %vm3966_vm11, %v3298_v24, 0.0  ;;  %v3303_v57 = vld [vmem:[%s8959_s3 + $0x150] sm:$0xff] }
 0x79a   : > { %9214 = vst [vmem:[#allocation79_spill] sm:$0xff] %v7206_v33  ;;  %v3141_v30 = vsub.f32 2.0, %v3077_v44  ;;  %v2855_v39 = vmax.f32 %v6773_v16, 1e-24  ;;  %v7209_v34 = vadd.f32 0.2, %v3143_v11  ;;  %v4126_v7 = vadd.f32 %v4125_v19, %v4124_v35 }
 0x79b   : > { %v3173_v50 = vsub.f32 2.0, %v3109_v18  ;;  %5200 = vrsqrt.f32 %v2853_v10  ;;  %v2781_v58 = vmul.f32 2.0, %v2494_v63  ;;  %v4127_v40 = vsel %vm3966_vm11, %v3271_v0, 0.0  ;;  %v3128_v16 = vld [vmem:[%s8958_s2 + $0x1d8] sm:$0xff]  ;;  %v3301_v33 = vld [vmem:[%s8959_s3 + $0x140] sm:$0xff] }
 0x79c   : > { %v7215_v14 = vadd.f32 0.2, %v3175_v53  ;;  %v7224_v11 = vsel %vm3966_vm11, %v3903_v28, 0.0  ;;  %5202 = vrsqrt.f32 %v2854_v41  ;;  %v2975_v44 = vmul.f32 %v7057_v21, %v2783_v47  ;;  %v7227_v35 = vpop.xlane.xlu0 %2725  ;;  %v3080_v53 = vld [vmem:[%s8958_s2 + $0x58] sm:$0xff]  ;;  %2479 = vadd.xlane.f32.xlu1 %v6885_v48  ;;  %v3130_v47 = vld [vmem:[%s8958_s2 + $0x1e8] sm:$0xff]  ;;  %v2436_v24 = vpop.xlane.xlu1 %2435 }
 0x79d   : > { %v7230_v10 = vsel %vm3966_vm11, %v3303_v57, 0.0  ;;  %v3112_v18 = vld [vmem:[%s8958_s2 + $0x158] sm:$0xff]  ;;  %v7239_v19 = vsel %vm3966_vm11, %v3901_v9, 0.0  ;;  %v2856_v28 = vmax.f32 %v6806_v15, 1e-24  ;;  %v7243_v21 = vmul.f32 %v7024_v49, %v2781_v58  ;;  %v3078_v15 = vld [vmem:[%s8958_s2 + $0x48] sm:$0xff] }
 0x79e   : > { %9215 = vst [vmem:[#allocation80_spill] sm:$0xff] %v7230_v10  ;;  %v7246_v41 = vadd.f32 0.2, %v3141_v30  ;;  %5204 = vrsqrt.f32 %v2855_v39  ;;  %v7251_v63 = vadd.f32 0.2, %v3173_v50  ;;  %v3272_v9 = vld [vmem:[%s8959_s3 + $0x58] sm:$0xff]  ;;  %v4128_v49 = vadd.f32 %v4127_v40, %v4126_v7 }
 0x79f   : > { %v3192_v48 = vsub.f32 2.0, %v3128_v16  ;;  %v2857_v30 = vmax.f32 %v6837_v60, 1e-24  ;;  %v3144_v0 = vsub.f32 2.0, %v3080_v53  ;;  %v4129_v58 = vsel %vm3966_vm11, %v3272_v9, 0.0  ;;  %v7261_v39 = vpop.eup %5192 }
 0x7a0   : > { %9216 = vst [vmem:[#allocation64_spill] sm:$0xff] %v7251_v63  ;;  %v3176_v57 = vsub.f32 2.0, %v3112_v18  ;;  %v2858_v50 = vmax.f32 %v6887_v13, 1e-24  ;;  %v3039_v10 = vsub.f32 2.0, %v2975_v44  ;;  %v2752_v63 = vmul.f32 2.0, %v2436_v24  ;;  %v7264_v61 = vpop.xlane.xlu0 %2727  ;;  %2489 = vadd.xlane.f32.xlu1 %v6896_v51  ;;  %v2500_v24 = vpop.xlane.xlu1 %2499 }
 0x7a1   : > { %v3194_v7 = vsub.f32 2.0, %v3130_v47  ;;  %v7269_v40 = vpop.eup %5194  ;;  %5206 = vrsqrt.f32 %v2856_v28  ;;  %v2859_v60 = vmax.f32 %v6956_v26, 1e-24  ;;  %v7274_v16 = vsel %vm3966_vm11, %v3301_v33, 0.0  ;;  %v3110_v44 = vld [vmem:[%s8958_s2 + $0x148] sm:$0xff]  ;;  %v3273_v26 = vld [vmem:[%s8959_s3 + $0x60] sm:$0xff] }
 0x7a2   : > { %9217 = vst [vmem:[#allocation71_spill] sm:$0xff] %v7274_v16  ;;  %v3142_v13 = vsub.f32 2.0, %v3078_v15  ;;  %v7279_v53 = vpop.eup %5196  ;;  %v2860_v18 = vmax.f32 %v7015_v59, 1e-24  ;;  %v2944_v47 = vmul.f32 %v6725_v29, %v2752_v63  ;;  %v4130_v51 = vadd.f32 %v4129_v58, %v4128_v49  ;;  %v3083_v59 = vld [vmem:[%s8958_s2 + $0x70] sm:$0xff]  ;;  %v3304_v49 = vld [vmem:[%s8959_s3 + $0x158] sm:$0xff] }
 0x7a3   : > { %v7286_v28 = vadd.f32 0.2, %v3192_v48  ;;  %v7288_v33 = vpop.eup %5198  ;;  %5208 = vrsqrt.f32 %v2857_v30  ;;  %v7290_v9 = vadd.f32 0.2, %v3144_v0  ;;  %v7292_v15 = vadd.f32 0.2, %v3176_v57 }
 0x7a4   : > { %v4131_v29 = vsel %vm3966_vm11, %v3273_v26, 0.0  ;;  %5210 = vrsqrt.f32 %v2858_v50  ;;  %v7298_v63 = vmax.f32 %v3039_v10, 0.0  ;;  %v7300_v16 = vpop.xlane.xlu0 %2729  ;;  %v3174_v48 = vsub.f32 2.0, %v3110_v44  ;;  %2485 = vadd.xlane.f32.xlu1 %v6900_v62  ;;  %v7318_v50 = vld [vmem:[%s8958_s2 + $0x1f8] sm:$0xff]  ;;  %v2432_v44 = vpop.xlane.xlu1 %2431  ;;  %v3081_v62 = vld [vmem:[%s8958_s2 + $0x60] sm:$0xff] }
 0x7a5   : > { %9218 = vst [vmem:[#allocation69_spill] sm:$0xff] %v7286_v28  ;;  %9219 = vst [vmem:[#allocation81_spill] sm:$0xff] %v7290_v9  ;;  %v7305_v30 = vadd.f32 0.2, %v3194_v7  ;;  %v7307_v0 = vpop.eup %5200  ;;  %5212 = vrsqrt.f32 %v2859_v60  ;;  %v3008_v58 = vsub.f32 2.0, %v2944_v47  ;;  %v7311_v57 = vsel %vm3966_vm11, %v3304_v49, 0.0 }
 0x7a6   : > { %9220 = vst [vmem:[#allocation70_spill] sm:$0xff] %v7292_v15  ;;  %9222 = vst [vmem:[#allocation74_spill] sm:$0xff] %v7311_v57  ;;  %v7313_v10 = vadd.f32 0.2, %v3142_v13  ;;  %v7320_v26 = vpop.eup %5202  ;;  %5214 = vrsqrt.f32 %v2860_v18  ;;  %v3037_v7 = vsub.f32 2.0, %v7243_v21  ;;  %v3147_v60 = vsub.f32 2.0, %v3083_v59 }
 0x7a7   : > { %9221 = vst [vmem:[#allocation78_spill] sm:$0xff] %v7305_v30  ;;  %9224 = vst [vmem:[#allocation83_spill] sm:$0xff] %v7318_v50  ;;  %v4132_v47 = vadd.f32 %v4131_v29, %v4130_v51  ;;  %v3274_v13 = vld [vmem:[%s8959_s3 + $0x68] sm:$0xff]  ;;  %v7329_v49 = vmax.f32 %v3008_v58, 0.0  ;;  %v2784_v30 = vmul.f32 2.0, %v2500_v24  ;;  %v2750_v28 = vmul.f32 2.0, %v2432_v44 }
 0x7a8   : > { %9223 = vst [vmem:[#allocation82_spill] sm:$0xff] %v7313_v10  ;;  %v4133_v57 = vsel %vm3966_vm11, %v3274_v13, 0.0  ;;  %v7332_v18 = vpop.eup %5204  ;;  %v2861_v21 = vmax.f32 %v7076_v20, 1e-24  ;;  %5216 = vrsqrt.f32 %v7298_v63  ;;  %v7336_v59 = vpop.xlane.xlu0 %2731  ;;  %v7338_v15 = vadd.f32 0.2, %v3174_v48  ;;  %2491 = vadd.xlane.f32.xlu1 %v6904_v5 }
 0x7a9   : > { %v3302_v51 = vld [vmem:[%s8959_s3 + $0x148] sm:$0xff]  ;;  %v2862_v24 = vmax.f32 %v7126_v3, 1e-24  ;;  %5218 = vrsqrt.f32 %v7329_v49  ;;  %v3145_v58 = vsub.f32 2.0, %v3081_v62  ;;  %v3084_v48 = vld [vmem:[%s8958_s2 + $0x78] sm:$0xff]  ;;  %v7356_v13 = vmax.f32 %v3037_v7, 0.0  ;;  %v2496_v29 = vpop.xlane.xlu1 %2495 }
 0x7aa   : > { %9225 = vst [vmem:[#allocation84_spill] sm:$0xff] %v7338_v15  ;;  %v7348_v20 = vsel %vm3966_vm11, %v3302_v51, 0.0  ;;  %v3082_v44 = vld [vmem:[%s8958_s2 + $0x68] sm:$0xff]  ;;  %v2942_v3 = vmul.f32 %v6775_v27, %v2750_v28  ;;  %v7359_v50 = vadd.f32 0.2, %v3147_v60  ;;  %v3275_v5 = vld [vmem:[%s8959_s3 + $0x70] sm:$0xff]  ;;  %v4134_v62 = vadd.f32 %v4133_v57, %v4132_v47 }
 0x7ab   : > { %9226 = vst [vmem:[#allocation85_spill] sm:$0xff] %v7348_v20  ;;  %v3087_v51 = vld [vmem:[%s8958_s2 + $0x90] sm:$0xff]  ;;  %v7367_v20 = vpop.eup %5206  ;;  %v2863_v15 = vmax.f32 %v7162_v42, 1e-24  ;;  %v2976_v7 = vmul.f32 %v7066_v31, %v2784_v30  ;;  %v2782_v1 = vmul.f32 2.0, %v2496_v29  ;;  %v4135_v27 = vsel %vm3966_vm11, %v3275_v5, 0.0 }
 0x7ac   : > { %9227 = vst [vmem:[#allocation86_spill] sm:$0xff] %v7359_v50  ;;  %5220 = vrsqrt.f32 %v2861_v21  ;;  %v2864_v28 = vmax.f32 %v7198_v4, 1e-24  ;;  %v7373_v60 = vpop.xlane.xlu0 %2733  ;;  %v3148_v50 = vsub.f32 2.0, %v3084_v48  ;;  %v3146_v57 = vsub.f32 2.0, %v3082_v44  ;;  %2487 = vadd.xlane.f32.xlu1 %v6918_v36  ;;  %v3276_v29 = vld [vmem:[%s8959_s3 + $0x78] sm:$0xff] }
 0x7ad   : > { %v7375_v47 = vpop.eup %5208  ;;  %5222 = vrsqrt.f32 %v2862_v24  ;;  %v3006_v9 = vsub.f32 2.0, %v2942_v3  ;;  %v7378_v10 = vadd.f32 0.2, %v3145_v58  ;;  %v3151_v42 = vsub.f32 2.0, %v3087_v51  ;;  %v2442_v21 = vpop.xlane.xlu1 %2441  ;;  %v3085_v36 = vld [vmem:[%s8958_s2 + $0x80] sm:$0xff]  ;;  %v3088_v51 = vld [vmem:[%s8958_s2 + $0x98] sm:$0xff] }
 0x7ae   : > { %9228 = vst [vmem:[#allocation87_spill] sm:$0xff] %v7375_v47  ;;  %v7380_v31 = vpop.eup %5210  ;;  %5224 = vrsqrt.f32 %v7356_v13  ;;  %v2865_v30 = vmax.f32 %v7227_v35, 1e-24  ;;  %v2974_v4 = vmul.f32 %v7045_v37, %v2782_v1  ;;  %v4136_v24 = vadd.f32 %v4135_v27, %v4134_v62 }
 0x7af   : > { %9229 = vst [vmem:[#allocation88_spill] sm:$0xff] %v7380_v31  ;;  %v7391_v58 = vpop.eup %5212  ;;  %5226 = vrsqrt.f32 %v2863_v15  ;;  %v3040_v48 = vsub.f32 2.0, %v2976_v7  ;;  %v7393_v44 = vmax.f32 %v3006_v9, 0.0  ;;  %v4137_v35 = vsel %vm3966_vm11, %v3276_v29, 0.0 }
 0x7b0   : > { %9230 = vst [vmem:[#allocation89_spill] sm:$0xff] %v7391_v58  ;;  %v7396_v3 = vpop.eup %5214  ;;  %5228 = vrsqrt.f32 %v2864_v28  ;;  %v2755_v37 = vmul.f32 2.0, %v2442_v21  ;;  %v7398_v1 = vpop.xlane.xlu0 %2735  ;;  %v7400_v5 = vadd.f32 0.2, %v3148_v50  ;;  %v7402_v62 = vadd.f32 0.2, %v3146_v57  ;;  %2517 = vadd.xlane.f32.xlu1 %v6946_v23 }
 0x7b1   : > { %9231 = vst [vmem:[#allocation90_spill] sm:$0xff] %v7396_v3  ;;  %v2866_v15 = vmax.f32 %v7264_v61, 1e-24  ;;  %5230 = vrsqrt.f32 %v7393_v44  ;;  %v7410_v9 = vadd.f32 0.2, %v3151_v42  ;;  %v3149_v7 = vsub.f32 2.0, %v3085_v36  ;;  %v2506_v57 = vpop.xlane.xlu1 %2505 }
 0x7b2   : > { %v3086_v50 = vld [vmem:[%s8958_s2 + $0x88] sm:$0xff]  ;;  %v5217_v27 = vpop.eup %5216  ;;  %vm3629_vm0 = vcmp.eq.f32.partialorder %v7298_v63, inf  ;;  %v3632_v28 = vand.u32 2147483648, %v7298_v63  ;;  %5232 = vrsqrt.f32 %v2865_v30  ;;  %v3277_v61 = vld [vmem:[%s8959_s3 + $0x80] sm:$0xff]  ;;  %v4138_v21 = vadd.f32 %v4137_v35, %v4136_v24  ;;  %v3279_v36 = vld [vmem:[%s8959_s3 + $0x90] sm:$0xff] }
 0x7b3   : > { %9232 = vst [vmem:[#allocation91_spill] sm:$0xff] %v7410_v9  ;;  %v5219_v23 = vpop.eup %5218  ;;  %vm3631_vm1 = vcmp.eq.f32.partialorder %v7298_v63, 0.0  ;;  %v7421_v42 = vmax.f32 %v3040_v48, 0.0  ;;  %v3038_v29 = vsub.f32 2.0, %v2974_v4  ;;  %v4139_v3 = vsel %vm3966_vm11, %v3277_v61, 0.0 }
 0x7b4   : > { %v3152_v58 = vsub.f32 2.0, %v3088_v51  ;;  %v2867_v30 = vmax.f32 %v7300_v16, 1e-24  ;;  %v2947_v31 = vmul.f32 %v6808_v6, %v2755_v37  ;;  %v7429_v47 = vpop.xlane.xlu0 %2737  ;;  %v7432_v24 = vsel %vm3966_vm11, %v3279_v36, 0.0  ;;  %2519 = vadd.xlane.f32.xlu1 %v6954_v17 }
 0x7b5   : > { %v3150_v35 = vsub.f32 2.0, %v3086_v50  ;;  %v3628_v48 = vmul.f32 %v5217_v27, %v7298_v63  ;;  %5234 = vrsqrt.f32 %v2866_v15  ;;  %v2787_v4 = vmul.f32 2.0, %v2506_v57  ;;  %v2438_v37 = vpop.xlane.xlu1 %2437  ;;  %v3280_v50 = vld [vmem:[%s8959_s3 + $0x98] sm:$0xff] }
 0x7b6   : > { %v7436_v9 = vadd.f32 0.2, %v3149_v7  ;;  %v7438_v61 = vpop.eup %5220  ;;  %vm3615_vm2 = vcmp.eq.f32.partialorder %v7356_v13, inf  ;;  %v3411_v16 = vmul.f32 %v5219_v23, %v7329_v49  ;;  %v4140_v51 = vadd.f32 %v4139_v3, %v4138_v21  ;;  %v3278_v21 = vld [vmem:[%s8959_s3 + $0x88] sm:$0xff] }
 0x7b7   : > { %9233 = vst [vmem:[#allocation92_spill] sm:$0xff] %v7438_v61  ;;  %v7446_v15 = vpop.eup %5222  ;;  %5236 = vrsqrt.f32 %v7421_v42  ;;  %v7449_v17 = vmax.f32 %v3038_v29, 0.0  ;;  %v7451_v7 = vadd.f32 0.2, %v3152_v58  ;;  %v7454_v27 = vsel %vm3966_vm11, %v3280_v50, 0.0 }
 0x7b8   : > { %9234 = vst [vmem:[#allocation93_spill] sm:$0xff] %v7446_v15  ;;  %v5225_v57 = vpop.eup %5224  ;;  %5238 = vrsqrt.f32 %v2867_v30  ;;  %v3011_v23 = vsub.f32 2.0, %v2947_v31  ;;  %v2753_v36 = vmul.f32 2.0, %v2438_v37  ;;  %v7456_v3 = vadd.f32 0.2, %v3150_v35  ;;  %2521 = vadd.xlane.f32.xlu1 %v6936_v2  ;;  %v7477_v50 = vpop.xlane.xlu0 %2739 }
 0x7b9   : > { %9235 = vst [vmem:[#allocation94_spill] sm:$0xff] %v7451_v7  ;;  %v7461_v6 = vpop.eup %5226  ;;  %v3630_v58 = vsel %vm3629_vm0, %v7298_v63, %v3628_v48  ;;  %vm3412_vm3 = vcmp.eq.f32.partialorder %v7329_v49, inf  ;;  %v2979_v29 = vmul.f32 %v7279_v53, %v2787_v4  ;;  %v4141_v31 = vsel %vm3966_vm11, %v3278_v21, 0.0 }
 0x7ba   : > { %9236 = vst [vmem:[#allocation95_spill] sm:$0xff] %v7461_v6  ;;  %v7470_v30 = vpop.eup %5228  ;;  %vm3617_vm4 = vcmp.eq.f32.partialorder %v7356_v13, 0.0  ;;  %v3413_v35 = vsel %vm3412_vm3, %v7329_v49, %v3411_v16  ;;  %vm3414_vm5 = vcmp.eq.f32.partialorder %v7329_v49, 0.0  ;;  %v3415_v37 = vand.u32 2147483648, %v7329_v49  ;;  %v2502_v6 = vpop.xlane.xlu1 %2501 }
 0x7bb   : > { %9237 = vst [vmem:[#allocation96_spill] sm:$0xff] %v7470_v30  ;;  %v2868_v48 = vmax.f32 %v7336_v59, 1e-24  ;;  %v5231_v53 = vpop.eup %5230  ;;  %v3614_v2 = vmul.f32 %v5225_v57, %v7356_v13  ;;  %5240 = vrsqrt.f32 %v7449_v17  ;;  %v2945_v4 = vmul.f32 %v6796_v38, %v2753_v36 }
 0x7bc   : > { %v2785_v21 = vmul.f32 2.0, %v2502_v6  ;;  %v7482_v30 = vpop.eup %5232  ;;  %v3633_v16 = vsel %vm3631_vm1, %v3632_v28, %v3630_v58  ;;  %v3397_v49 = vmul.f32 %v5231_v53, %v7393_v44  ;;  %vm3398_vm6 = vcmp.eq.f32.partialorder %v7393_v44, inf  ;;  %2523 = vadd.xlane.f32.xlu1 %v6950_v32  ;;  %v9238_v53 = vld [vmem:[#allocation23_spill] sm:$0xff] }
 0x7bd   : > { %v7488_v59 = vmax.f32 %v3011_v23, 0.0  ;;  %v3416_v15 = vsel %vm3414_vm5, %v3415_v37, %v3413_v35  ;;  %v3401_v61 = vand.u32 2147483648, %v7393_v44  ;;  %v3043_v57 = vsub.f32 2.0, %v2979_v29  ;;  %v3091_v23 = vld [vmem:[%s8958_s2 + $0xb0] sm:$0xff] }
 0x7be   : > { %v3009_v7 = vsub.f32 2.0, %v2945_v4  ;;  %v3399_v38 = vsel %vm3398_vm6, %v7393_v44, %v3397_v49  ;;  %vm3400_vm7 = vcmp.eq.f32.partialorder %v7393_v44, 0.0  ;;  %v2977_v63 = vmul.f32 %v7261_v39, %v2785_v21  ;;  %v2444_v28 = vpop.xlane.xlu1 %2443 }
 0x7bf   : > { %v4142_v6 = vadd.f32 %v4141_v31, %v4140_v51  ;;  %v7498_v36 = vpop.eup %5234  ;;  %v3871_v58 = vmul.f32 %v3633_v16, %v6938_v43  ;;  %v3616_v32 = vsel %vm3615_vm2, %v7356_v13, %v3614_v2  ;;  %v3402_v29 = vsel %vm3400_vm7, %v3401_v61, %v3399_v38  ;;  %v7509_v51 = vpop.xlane.xlu0 %2741  ;;  %v9241_v16 = vld [vmem:[#allocation19_spill] sm:$0xff] }
 0x7c0   : > { %v7504_v35 = vmax.f32 %v3009_v7, 0.0  ;;  %v3840_v44 = vmul.f32 %v3416_v15, %v7022_v25  ;;  %v3838_v39 = vmul.f32 %v3402_v29, %v7060_v12  ;;  %5242 = vrsqrt.f32 %v7488_v59  ;;  %2525 = vadd.xlane.f32.xlu1 %v9238_v53  ;;  %v9240_v25 = vld [vmem:[#allocation66_spill] sm:$0xff] }
 0x7c1   : > { %v2756_v31 = vmul.f32 2.0, %v2444_v28  ;;  %v5237_v37 = vpop.eup %5236  ;;  %vm3636_vm8 = vcmp.eq.f32.partialorder %v7421_v42, inf  ;;  %v7512_v43 = vmax.f32 %v3043_v57, 0.0  ;;  %v3155_v61 = vsub.f32 2.0, %v3091_v23  ;;  %v9243_v23 = vld [vmem:[#allocation16_spill] sm:$0xff] }
 0x7c2   : > { %5244 = vrsqrt.f32 %v7504_v35  ;;  %v7516_v7 = vpop.eup %5238  ;;  %vm3638_vm9 = vcmp.eq.f32.partialorder %v7421_v42, 0.0  ;;  %v3639_v12 = vand.u32 2147483648, %v7421_v42  ;;  %v3902_v15 = vmul.f32 %v3838_v39, %v9240_v25  ;;  %v2508_v21 = vpop.xlane.xlu1 %2507  ;;  %v9244_v39 = vld [vmem:[#allocation31_spill] sm:$0xff] }
 0x7c3   : > { %9239 = vst [vmem:[#allocation23_spill] sm:$0xff] %v7516_v7  ;;  %v2869_v2 = vmax.f32 %v7373_v60, 1e-24  ;;  %v3041_v4 = vsub.f32 2.0, %v2977_v63  ;;  %v3935_v49 = vmul.f32 %v3871_v58, %v9241_v16  ;;  %v9242_v57 = vand.u32 2147483648, %v7356_v13  ;;  %v9245_v16 = vld [vmem:[#allocation53_spill] sm:$0xff] }
 0x7c4   : > { %5246 = vrsqrt.f32 %v2868_v48  ;;  %v2788_v28 = vmul.f32 2.0, %v2508_v21  ;;  %v3904_v29 = vmul.f32 %v3840_v44, %v9243_v23  ;;  %v3635_v53 = vmul.f32 %v5237_v37, %v7421_v42  ;;  %2527 = vadd.xlane.f32.xlu1 %v9245_v16  ;;  %v9246_v48 = vld [vmem:[#allocation56_spill] sm:$0xff]  ;;  %v7541_v37 = vpop.xlane.xlu0 %2743 }
 0x7c5   : > { %v3619_v38 = vsel %vm3617_vm4, %v9242_v57, %v3616_v32  ;;  %v3968_v7 = vsel %vm3966_vm11, %v3902_v15, 0.0  ;;  %v2948_v25 = vmul.f32 %v9244_v39, %v2756_v31  ;;  %v5241_v60 = vpop.eup %5240  ;;  %v2870_v58 = vmax.f32 %v7398_v1, 1e-24  ;;  %v9247_v57 = vld [vmem:[#allocation50_spill] sm:$0xff] }
 0x7c6   : > { %v3969_v63 = vadd.f32 %v3968_v7, %v7239_v19  ;;  %5248 = vrsqrt.f32 %v7512_v43  ;;  %v7536_v13 = vadd.f32 %v7432_v24, %v4142_v6  ;;  %v3869_v32 = vmul.f32 %v3619_v38, %v9246_v48  ;;  %v2440_v31 = vpop.xlane.xlu1 %2439  ;;  %v3283_v19 = vld [vmem:[%s8959_s3 + $0xb0] sm:$0xff] }
 0x7c7   : > { %5250 = vrsqrt.f32 %v2869_v2  ;;  %v7539_v44 = vmax.f32 %v3041_v4, 0.0  ;;  %v7543_v15 = vadd.f32 0.2, %v3155_v61  ;;  %v7549_v1 = vsel %vm3966_vm11, %v3935_v49, 0.0  ;;  %v9248_v38 = vld [vmem:[#allocation30_spill] sm:$0xff] }
 0x7c8   : > { %v3971_v24 = vadd.f32 %v7224_v11, %v3969_v63  ;;  %v2980_v6 = vmul.f32 %v7288_v33, %v2788_v28  ;;  %v7554_v7 = vsel %vm3966_vm11, %v3283_v19, 0.0  ;;  %v3972_v2 = vsel %vm3966_vm11, %v3904_v29, 0.0  ;;  %2529 = vadd.xlane.f32.xlu1 %v9247_v57  ;;  %v7579_v48 = vpop.xlane.xlu0 %2745 }
 0x7c9   : > { %v3637_v61 = vsel %vm3636_vm8, %v7421_v42, %v3635_v53  ;;  %v3621_v4 = vmul.f32 %v5241_v60, %v7449_v17  ;;  %v3012_v21 = vsub.f32 2.0, %v2948_v25  ;;  %vm3622_vm10 = vcmp.eq.f32.partialorder %v7449_v17, inf }
 0x7ca   : > { %5252 = vrsqrt.f32 %v2870_v58  ;;  %v7562_v49 = vadd.f32 %v3972_v2, %v3971_v24  ;;  %v2754_v11 = vmul.f32 2.0, %v2440_v31  ;;  %v5243_v33 = vpop.eup %5242  ;;  %v3933_v28 = vmul.f32 %v3869_v32, %v9248_v38  ;;  %v2504_v29 = vpop.xlane.xlu1 %2503  ;;  %v9249_v32 = vld [vmem:[#allocation14_spill] sm:$0xff] }
 0x7cb   : > { %vm3624_vm12 = vcmp.eq.f32.partialorder %v7449_v17, 0.0  ;;  %v3625_v23 = vand.u32 2147483648, %v7449_v17  ;;  %5254 = vrsqrt.f32 %v7539_v44  ;;  %v3640_v39 = vsel %vm3638_vm9, %v3639_v12, %v3637_v61  ;;  %v9251_v24 = vld [vmem:[#allocation26_spill] sm:$0xff] }
 0x7cc   : > { %v5245_v53 = vpop.eup %5244  ;;  %vm3433_vm13 = vcmp.eq.f32.partialorder %v7488_v59, inf  ;;  %v2871_v25 = vmax.f32 %v7429_v47, 1e-24  ;;  %v3044_v60 = vsub.f32 2.0, %v2980_v6  ;;  %v3623_v63 = vsel %vm3622_vm10, %v7449_v17, %v3621_v4  ;;  %2531 = vadd.xlane.f32.xlu1 %v9251_v24  ;;  %v9252_v6 = vld [vmem:[#allocation28_spill] sm:$0xff] }
 0x7cd   : > { %v3418_v58 = vmul.f32 %v5245_v53, %v7504_v35  ;;  %v7577_v16 = vmax.f32 %v3012_v21, 0.0  ;;  %v2946_v31 = vmul.f32 %v9249_v32, %v2754_v11  ;;  %v3432_v42 = vmul.f32 %v5243_v33, %v7488_v59 }
 0x7ce   : > { %v7582_v19 = vpop.eup %5246  ;;  %vm3419_vm14 = vcmp.eq.f32.partialorder %v7504_v35, inf  ;;  %v3422_v47 = vand.u32 2147483648, %v7504_v35  ;;  %v2872_v12 = vmax.f32 %v7477_v50, 1e-24  ;;  %v3872_v2 = vmul.f32 %v3640_v39, %v9252_v6  ;;  %v2450_v21 = vpop.xlane.xlu1 %2449  ;;  %v9254_v50 = vld [vmem:[#allocation65_spill] sm:$0xff] }
 0x7cf   : > { %9250 = vst [vmem:[#allocation66_spill] sm:$0xff] %v7582_v19  ;;  %v3420_v61 = vsel %vm3419_vm14, %v7504_v35, %v3418_v58  ;;  %vm3421_vm15 = vcmp.eq.f32.partialorder %v7504_v35, 0.0  ;;  %v3010_v4 = vsub.f32 2.0, %v2946_v31  ;;  %v3626_v57 = vsel %vm3624_vm12, %v3625_v23, %v3623_v63  ;;  %v7605_v35 = vld [vmem:[%s8958_s2 + $0xa0] sm:$0xff] }
 0x7d0   : > { %v5249_v11 = vpop.eup %5248  ;;  %v3423_v33 = vsel %vm3421_vm15, %v3422_v47, %v3420_v61  ;;  %v7594_v38 = vmax.f32 %v3044_v60, 0.0  ;;  %v2786_v53 = vmul.f32 2.0, %v2504_v29  ;;  %5256 = vrsqrt.f32 %v7577_v16  ;;  %v9255_v60 = vld [vmem:[#allocation29_spill] sm:$0xff]  ;;  %v9256_v63 = vld [vmem:[#allocation72_spill] sm:$0xff] }
 0x7d1   : > { %v7596_v32 = vpop.eup %5250  ;;  %v3841_v24 = vmul.f32 %v3423_v33, %v9254_v50  ;;  %v7600_v39 = vmax.f32 %v3010_v4, 0.0  ;;  %v2759_v58 = vmul.f32 2.0, %v2450_v21  ;;  %v3434_v17 = vsel %vm3433_vm13, %v7488_v59, %v3432_v42  ;;  %2533 = vadd.xlane.f32.xlu1 %v9255_v60  ;;  %v9257_v6 = vld [vmem:[#allocation45_spill] sm:$0xff]  ;;  %v2748_v4 = vpop.xlane.xlu0 %2747  ;;  %v9259_v42 = vld [vmem:[#allocation42_spill] sm:$0xff] }
 0x7d2   : > { %9253 = vst [vmem:[#allocation19_spill] sm:$0xff] %v7596_v32  ;;  %v3436_v23 = vand.u32 2147483648, %v7488_v59  ;;  %5258 = vrsqrt.f32 %v2872_v12  ;;  %v2978_v29 = vmul.f32 %v7269_v40, %v2786_v53  ;;  %v3870_v31 = vmul.f32 %v3626_v57, %v9256_v63  ;;  %v2514_v21 = vpop.xlane.xlu1 %2513  ;;  %v9269_v32 = vld [vmem:[#allocation73_spill] sm:$0xff] }
 0x7d3   : > { %v3656_v47 = vmul.f32 %v5249_v11, %v7512_v43  ;;  %v3905_v61 = vmul.f32 %v3841_v24, %v9257_v6  ;;  %5260 = vrsqrt.f32 %v7600_v39  ;;  %v3936_v50 = vmul.f32 %v3872_v2, %v9259_v42  ;;  %v9260_v24 = vld [vmem:[#allocation32_spill] sm:$0xff]  ;;  %v9261_v6 = vld [vmem:[#allocation27_spill] sm:$0xff]  ;;  %v9262_v42 = vld [vmem:[#allocation57_spill] sm:$0xff] }
 0x7d4   : > { %v7617_v33 = vpop.eup %5252  ;;  %vm3435_vm0 = vcmp.eq.f32.partialorder %v7488_v59, 0.0  ;;  %5262 = vrsqrt.f32 %v7594_v38  ;;  %v2873_v53 = vmax.f32 %v7509_v51, 1e-24  ;;  %v2951_v60 = vmul.f32 %v9260_v24, %v2759_v58  ;;  %v9263_v58 = vld [vmem:[#allocation49_spill] sm:$0xff] }
 0x7d5   : > { %9258 = vst [vmem:[#allocation16_spill] sm:$0xff] %v7617_v33  ;;  %v5255_v12 = vpop.eup %5254  ;;  %v3437_v57 = vsel %vm3435_vm0, %v3436_v23, %v3434_v17  ;;  %v3974_v11 = vsel %vm3966_vm11, %v3905_v61, 0.0  ;;  %v7627_v63 = vsel %vm3966_vm11, %v3933_v28, 0.0  ;;  %vm3657_vm1 = vcmp.eq.f32.partialorder %v7512_v43, inf  ;;  %2535 = vadd.xlane.f32.xlu1 %v9261_v6 }
 0x7d6   : > { %v7631_v2 = vadd.f32 %v3974_v11, %v7562_v49  ;;  %v3042_v59 = vsub.f32 2.0, %v2978_v29  ;;  %v3934_v40 = vmul.f32 %v3870_v31, %v9262_v42  ;;  %v3658_v17 = vsel %vm3657_vm1, %v7512_v43, %v3656_v47  ;;  %v2446_v23 = vpop.xlane.xlu1 %2445  ;;  %v2548_v29 = vpop.xlane.xlu0 %2547  ;;  %v9264_v47 = vld [vmem:[#allocation24_spill] sm:$0xff] }
 0x7d7   : > { %5264 = vrsqrt.f32 %v2871_v25  ;;  %v2874_v51 = vmax.f32 %v7541_v37, 1e-24  ;;  %v3843_v61 = vmul.f32 %v3437_v57, %v9263_v58  ;;  %v3660_v28 = vand.u32 2147483648, %v7512_v43 }
 0x7d8   : > { %v3642_v24 = vmul.f32 %v5255_v12, %v7539_v44  ;;  %v3015_v33 = vsub.f32 2.0, %v2951_v60  ;;  %v7641_v49 = vsel %vm3966_vm11, %v3936_v50, 0.0  ;;  %vm3659_vm2 = vcmp.eq.f32.partialorder %v7512_v43, 0.0  ;;  %v9265_v60 = vld [vmem:[#allocation47_spill] sm:$0xff] }
 0x7d9   : > { %vm3643_vm3 = vcmp.eq.f32.partialorder %v7539_v44, inf  ;;  %5266 = vrsqrt.f32 %v2873_v53  ;;  %v3661_v25 = vsel %vm3659_vm2, %v3660_v28, %v3658_v17  ;;  %vm3645_vm4 = vcmp.eq.f32.partialorder %v7539_v44, 0.0  ;;  %2537 = vadd.xlane.f32.xlu1 %v9264_v47  ;;  %v9266_v28 = vld [vmem:[#allocation76_spill] sm:$0xff] }
 0x7da   : > { %v3646_v37 = vand.u32 2147483648, %v7539_v44  ;;  %v7647_v31 = vmax.f32 %v3042_v59, 0.0  ;;  %v5257_v12 = vpop.eup %5256  ;;  %v7651_v57 = vsel %vm3966_vm11, %v3934_v40, 0.0  ;;  %5268 = vrsqrt.f32 %v2874_v51  ;;  %v7654_v11 = vpop.xlane.xlu1 %2509 }
 0x7db   : > { %v2875_v43 = vmax.f32 %v7579_v48, 1e-24  ;;  %v2876_v50 = vmax.f32 %v2748_v4, 1e-24  ;;  %v3907_v6 = vmul.f32 %v3843_v61, %v9265_v60  ;;  %v3644_v59 = vsel %vm3643_vm3, %v7539_v44, %v3642_v24  ;;  %v9267_v24 = vld [vmem:[#allocation58_spill] sm:$0xff] }
 0x7dc   : > { %v5259_v53 = vpop.eup %5258  ;;  %v7660_v42 = vmax.f32 %v3015_v33, 0.0  ;;  %v2757_v17 = vmul.f32 2.0, %v2446_v23  ;;  %v3875_v40 = vmul.f32 %v3661_v25, %v9266_v28  ;;  %vm3440_vm5 = vcmp.eq.f32.partialorder %v7577_v16, inf  ;;  %v2552_v25 = vpop.xlane.xlu0 %2551 }
 0x7dd   : > { %v5261_v58 = vpop.eup %5260  ;;  %vm3442_vm6 = vcmp.eq.f32.partialorder %v7577_v16, 0.0  ;;  %v2791_v48 = vmul.f32 2.0, %v2514_v21  ;;  %v3439_v51 = vmul.f32 %v5257_v12, %v7577_v16  ;;  %5270 = vrsqrt.f32 %v7647_v31  ;;  %2539 = vadd.xlane.f32.xlu1 %v9267_v24  ;;  %v9268_v12 = vld [vmem:[#allocation33_spill] sm:$0xff] }
 0x7de   : > { %v5263_v4 = vpop.eup %5262  ;;  %v3425_v61 = vmul.f32 %v5261_v58, %v7600_v39  ;;  %v2808_v47 = vmul.f32 2.0, %v2548_v29  ;;  %v3647_v33 = vsel %vm3645_vm4, %v3646_v37, %v3644_v59  ;;  %vm3426_vm7 = vcmp.eq.f32.partialorder %v7600_v39, inf  ;;  %v2452_v21 = vpop.xlane.xlu1 %2451 }
 0x7df   : > { %v3429_v23 = vand.u32 2147483648, %v7600_v39  ;;  %5272 = vrsqrt.f32 %v2876_v50  ;;  %vm3428_vm8 = vcmp.eq.f32.partialorder %v7600_v39, 0.0  ;;  %v2949_v29 = vmul.f32 %v9268_v12, %v2757_v17  ;;  %v9271_v12 = vld [vmem:[#allocation77_spill] sm:$0xff] }
 0x7e0   : > { %v3427_v60 = vsel %vm3426_vm7, %v7600_v39, %v3425_v61  ;;  %5274 = vrsqrt.f32 %v7660_v42  ;;  %v3663_v44 = vmul.f32 %v5263_v4, %v7594_v38  ;;  %v2983_v59 = vmul.f32 %v7332_v18, %v2791_v48 }
 0x7e1   : > { %v7677_v58 = vpop.eup %5264  ;;  %v3430_v37 = vsel %vm3428_vm8, %v3429_v23, %v3427_v60  ;;  %v2760_v28 = vmul.f32 2.0, %v2452_v21  ;;  %v3441_v50 = vsel %vm3440_vm5, %v7577_v16, %v3439_v51  ;;  %v3000_v24 = vmul.f32 %v5259_v53, %v2808_v47  ;;  %2541 = vadd.xlane.f32.xlu1 %v9269_v32  ;;  %v2556_v21 = vpop.xlane.xlu0 %2555 }
 0x7e2   : > { %v3842_v61 = vmul.f32 %v3430_v37, %v7181_v56  ;;  %v3013_v39 = vsub.f32 2.0, %v2949_v29  ;;  %v3978_v17 = vsel %vm3966_vm11, %v3907_v6, 0.0  ;;  %v3873_v4 = vmul.f32 %v3647_v33, %v9271_v12  ;;  %v2516_v18 = vpop.xlane.xlu1 %2515  ;;  %v5372_v56 = vld [vmem:[%s8959_s3 + $0x28] sm:$0xff] }
 0x7e3   : > { %v7686_v19 = vpop.eup %5266  ;;  %v3443_v23 = vand.u32 2147483648, %v7577_v16  ;;  %5276 = vrsqrt.f32 %v2875_v43  ;;  %vm3664_vm9 = vcmp.eq.f32.partialorder %v7594_v38, inf  ;;  %v2810_v48 = vmul.f32 2.0, %v2552_v25  ;;  %v9272_v43 = vld [vmem:[#allocation13_spill] sm:$0xff]  ;;  %v9274_v25 = vld [vmem:[#allocation39_spill] sm:$0xff] }
 0x7e4   : > { %9270 = vst [vmem:[#allocation31_spill] sm:$0xff] %v7686_v19  ;;  %v3906_v53 = vmul.f32 %v5372_v56, %v3842_v61  ;;  %v7695_v51 = vmax.f32 %v3013_v39, 0.0  ;;  %v5269_v32 = vpop.eup %5268  ;;  %v3665_v47 = vsel %vm3664_vm9, %v7594_v38, %v3663_v44  ;;  %v3047_v33 = vsub.f32 2.0, %v2983_v59  ;;  %v9273_v29 = vld [vmem:[#allocation61_spill] sm:$0xff] }
 0x7e5   : > { %v3444_v6 = vsel %vm3442_vm6, %v3443_v23, %v3441_v50  ;;  %v2952_v60 = vmul.f32 %v9272_v43, %v2760_v28  ;;  %v3939_v37 = vmul.f32 %v3875_v40, %v9273_v29  ;;  %v3667_v12 = vand.u32 2147483648, %v7594_v38  ;;  %2543 = vadd.xlane.f32.xlu1 %v9274_v25  ;;  %v9275_v43 = vld [vmem:[#allocation59_spill] sm:$0xff] }
 0x7e6   : > { %v3976_v19 = vsel %vm3966_vm11, %v3906_v53, 0.0  ;;  %v3064_v61 = vsub.f32 2.0, %v3000_v24  ;;  %v3937_v39 = vmul.f32 %v3873_v4, %v7133_v46  ;;  %vm3666_vm10 = vcmp.eq.f32.partialorder %v7594_v38, 0.0  ;;  %v2448_v44 = vpop.xlane.xlu1 %2447 }
 0x7e7   : > { %v3977_v16 = vadd.f32 %v3976_v19, %v7631_v2  ;;  %5278 = vrsqrt.f32 %v7695_v51  ;;  %v5271_v59 = vpop.eup %5270  ;;  %v3844_v28 = vmul.f32 %v3444_v6, %v7150_v52  ;;  %v3668_v40 = vsel %vm3666_vm10, %v3667_v12, %v3665_v47 }
 0x7e8   : > { %v3002_v50 = vmul.f32 %v5269_v32, %v2810_v48  ;;  %v2812_v23 = vmul.f32 2.0, %v2556_v21  ;;  %v7712_v24 = vmax.f32 %v3047_v33, 0.0  ;;  %v2789_v46 = vmul.f32 2.0, %v7654_v11 }
 0x7e9   : > { %v5273_v56 = vpop.eup %5272  ;;  %v7710_v53 = vadd.f32 %v3978_v17, %v3977_v16  ;;  %v3016_v4 = vsub.f32 2.0, %v2952_v60  ;;  %v7716_v19 = vsel %vm3966_vm11, %v3939_v37, 0.0  ;;  %v7718_v2 = vmax.f32 %v3064_v61, 0.0  ;;  %2545 = vadd.xlane.f32.xlu1 %v9275_v43 }
 0x7ea   : > { %v5275_v38 = vpop.eup %5274  ;;  %v9276_v52 = vsub.f32 2.0, %v7605_v35  ;;  %v7727_v17 = vadd.f32 %v7454_v27, %v7536_v13  ;;  %v7730_v32 = vsel %vm3966_vm11, %v3937_v39, 0.0  ;;  %v3876_v11 = vmul.f32 %v3668_v40, %v7164_v8  ;;  %v2512_v47 = vpop.xlane.xlu1 %2511  ;;  %v5373_v35 = vld [vmem:[%s8959_s3 + $0x38] sm:$0xff] }
 0x7eb   : > { %v3649_v6 = vmul.f32 %v5271_v59, %v7647_v31  ;;  %vm3650_vm12 = vcmp.eq.f32.partialorder %v7647_v31, inf  ;;  %v3908_v33 = vmul.f32 %v5373_v35, %v3844_v28  ;;  %v3066_v21 = vsub.f32 2.0, %v3002_v50 }
 0x7ec   : > { %v7723_v48 = vadd.f32 0.2, %v9276_v52  ;;  %v3004_v60 = vmul.f32 %v5273_v56, %v2812_v23  ;;  %v2758_v29 = vmul.f32 2.0, %v2448_v44  ;;  %v3460_v13 = vmul.f32 %v5275_v38, %v7660_v42 }
 0x7ed   : > { %v7738_v27 = vpop.eup %5276  ;;  %5280 = vrsqrt.f32 %v7712_v24  ;;  %v2981_v8 = vmul.f32 %v7307_v0, %v2789_v46  ;;  %v7743_v37 = vmax.f32 %v3016_v4, 0.0  ;;  %vm3652_vm13 = vcmp.eq.f32.partialorder %v7647_v31, 0.0  ;;  %2549 = vadd.xlane.f32.xlu1 %v7158_v22  ;;  %v9277_v0 = vld [vmem:[#allocation40_spill] sm:$0xff] }
 0x7ee   : > { %v3653_v12 = vand.u32 2147483648, %v7647_v31  ;;  %5282 = vrsqrt.f32 %v7718_v2  ;;  %v3940_v25 = vmul.f32 %v3876_v11, %v7169_v54  ;;  %v3651_v39 = vsel %vm3650_vm12, %v7647_v31, %v3649_v6  ;;  %v2458_v59 = vpop.xlane.xlu1 %2457  ;;  %v9278_v11 = vld [vmem:[#allocation55_spill] sm:$0xff] }
 0x7ef   : > { %v2792_v16 = vmul.f32 2.0, %v2516_v18  ;;  %v2950_v44 = vmul.f32 %v9277_v0, %v2758_v29  ;;  %v3980_v28 = vsel %vm3966_vm11, %v3908_v33, 0.0  ;;  %vm3461_vm14 = vcmp.eq.f32.partialorder %v7660_v42, inf }
 0x7f0   : > { %v3068_v40 = vsub.f32 2.0, %v3004_v60  ;;  %v2763_v50 = vmul.f32 2.0, %v2458_v59  ;;  %v3462_v56 = vsel %vm3461_vm14, %v7660_v42, %v3460_v13  ;;  %v7758_v22 = vmax.f32 %v3066_v21, 0.0 }
 0x7f1   : > { %v5279_v23 = vpop.eup %5278  ;;  %v3045_v54 = vsub.f32 2.0, %v2981_v8  ;;  %5284 = vrsqrt.f32 %v7743_v37  ;;  %v3654_v18 = vsel %vm3652_vm13, %v3653_v12, %v3651_v39  ;;  %vm3463_vm15 = vcmp.eq.f32.partialorder %v7660_v42, 0.0  ;;  %2553 = vadd.xlane.f32.xlu1 %v7147_v45 }
 0x7f2   : > { %v3464_v46 = vand.u32 2147483648, %v7660_v42  ;;  %v3014_v4 = vsub.f32 2.0, %v2950_v44  ;;  %v7767_v38 = vsel %vm3966_vm11, %v3940_v25, 0.0  ;;  %v3446_v43 = vmul.f32 %v5279_v23, %v7695_v51  ;;  %v2454_v35 = vpop.xlane.xlu1 %2453  ;;  %v9279_v23 = vld [vmem:[#allocation46_spill] sm:$0xff] }
 0x7f3   : > { %v2984_v52 = vmul.f32 %v7367_v20, %v2792_v16  ;;  %v2955_v6 = vmul.f32 %v9278_v11, %v2763_v50  ;;  %v7772_v31 = vmax.f32 %v3068_v40, 0.0  ;;  %v2790_v60 = vmul.f32 2.0, %v2512_v47  ;;  %v7807_v50 = vld [vmem:[%s8958_s2 + $0xb8] sm:$0xff] }
 0x7f4   : > { %v3465_v33 = vsel %vm3463_vm15, %v3464_v46, %v3462_v56  ;;  %v7774_v21 = vmax.f32 %v3014_v4, 0.0  ;;  %v3874_v42 = vmul.f32 %v3654_v18, %v7183_v55  ;;  %5286 = vrsqrt.f32 %v7758_v22  ;;  %v7826_v11 = vld [vmem:[%s8959_s3 + $0xb8] sm:$0xff] }
 0x7f5   : > { %v7778_v45 = vmax.f32 %v3045_v54, 0.0  ;;  %v3019_v29 = vsub.f32 2.0, %v2955_v6  ;;  %vm3685_vm0 = vcmp.eq.f32.partialorder %v7712_v24, inf  ;;  %vm3447_vm1 = vcmp.eq.f32.partialorder %v7695_v51, inf }
 0x7f6   : > { %5288 = vrsqrt.f32 %v7774_v21  ;;  %v2761_v20 = vmul.f32 2.0, %v2454_v35  ;;  %v3847_v8 = vmul.f32 %v3465_v33, %v7209_v34  ;;  %v3688_v12 = vand.u32 2147483648, %v7712_v24  ;;  %v2460_v25 = vpop.xlane.xlu1 %2459  ;;  %v5374_v34 = vld [vmem:[%s8959_s3 + $0x128] sm:$0xff] }
 0x7f7   : > { %v5281_v13 = vpop.eup %5280  ;;  %v3448_v47 = vsel %vm3447_vm1, %v7695_v51, %v3446_v43  ;;  %v3048_v55 = vsub.f32 2.0, %v2984_v52  ;;  %vm3687_vm2 = vcmp.eq.f32.partialorder %v7712_v24, 0.0  ;;  %5290 = vrsqrt.f32 %v7772_v31  ;;  %v7821_v52 = vld [vmem:[%s8959_s3 + $0xa0] sm:$0xff] }
 0x7f8   : > { %v7786_v39 = vpop.eup %5282  ;;  %vm3449_vm3 = vcmp.eq.f32.partialorder %v7695_v51, 0.0  ;;  %v3450_v16 = vand.u32 2147483648, %v7695_v51  ;;  %v2982_v0 = vmul.f32 %v7320_v26, %v2790_v60  ;;  %v7796_v44 = vmul.f32 %v5374_v34, %v3874_v42 }
 0x7f9   : > { %v7799_v59 = vadd.f32 %v3980_v28, %v7710_v53  ;;  %5292 = vrsqrt.f32 %v7778_v45  ;;  %v7802_v40 = vmax.f32 %v3019_v29, 0.0  ;;  %v3684_v26 = vmul.f32 %v5281_v13, %v7712_v24  ;;  %v5375_v53 = vld [vmem:[%s8959_s3 + $0x50] sm:$0xff] }
 0x7fa   : > { %v3451_v51 = vsel %vm3449_vm3, %v3450_v16, %v3448_v47  ;;  %v2953_v56 = vmul.f32 %v9279_v23, %v2761_v20  ;;  %v2764_v54 = vmul.f32 2.0, %v2460_v25  ;;  %v3911_v28 = vmul.f32 %v5375_v53, %v3847_v8  ;;  %v2456_v43 = vpop.xlane.xlu1 %2455  ;;  %v9280_v8 = vld [vmem:[#allocation17_spill] sm:$0xff]  ;;  %v9281_v23 = vld [vmem:[#allocation51_spill] sm:$0xff] }
 0x7fb   : > { %v5285_v18 = vpop.eup %5284  ;;  %v7815_v4 = vmax.f32 %v3048_v55, 0.0  ;;  %5294 = vrsqrt.f32 %v7802_v40  ;;  %v3046_v6 = vsub.f32 2.0, %v2982_v0  ;;  %v4147_v35 = vsel %vm3966_vm11, %v7821_v52, 0.0  ;;  %v5376_v53 = vld [vmem:[%s8959_s3 + $0x40] sm:$0xff] }
 0x7fc   : > { %v3156_v33 = vsub.f32 2.0, %v7807_v50  ;;  %v7833_v60 = vsel %vm3966_vm11, %v7826_v11, 0.0  ;;  %v3845_v42 = vmul.f32 %v3451_v51, %v7246_v41  ;;  %vm3468_vm4 = vcmp.eq.f32.partialorder %v7743_v37, inf }
 0x7fd   : > { %vm3470_vm5 = vcmp.eq.f32.partialorder %v7743_v37, 0.0  ;;  %v3017_v29 = vsub.f32 2.0, %v2953_v56  ;;  %v3686_v20 = vsel %vm3685_vm0, %v7712_v24, %v3684_v26  ;;  %v3467_v13 = vmul.f32 %v5285_v18, %v7743_v37 }
 0x7fe   : > { %v2956_v47 = vmul.f32 %v9280_v8, %v2764_v54  ;;  %v2762_v55 = vmul.f32 2.0, %v2456_v43  ;;  %v7843_v25 = vpop.eup %5286  ;;  %v7846_v16 = vsel %vm3966_vm11, %v3911_v28, 0.0  ;;  %v3471_v41 = vand.u32 2147483648, %v7743_v37  ;;  %v2466_v34 = vpop.xlane.xlu1 %2465 }
 0x7ff   : > { %5296 = vrsqrt.f32 %v7815_v4  ;;  %v7850_v0 = vmax.f32 %v3017_v29, 0.0  ;;  %v7852_v51 = vmax.f32 %v3046_v6, 0.0  ;;  %v2767_v54 = vmul.f32 2.0, %v2466_v34 }
 0x800   : > { %v5289_v50 = vpop.eup %5288  ;;  %v3020_v26 = vsub.f32 2.0, %v2956_v47  ;;  %v2954_v56 = vmul.f32 %v9281_v23, %v2762_v55  ;;  %v3689_v18 = vsel %vm3687_vm2, %v3688_v12, %v3686_v20  ;;  %v3909_v28 = vmul.f32 %v5376_v53, %v3845_v42  ;;  %v9283_v47 = vld [vmem:[#allocation68_spill] sm:$0xff] }
 0x801   : > { %vm3671_vm6 = vcmp.eq.f32.partialorder %v7778_v45, inf  ;;  %v3453_v43 = vmul.f32 %v5289_v50, %v7774_v21  ;;  %5298 = vrsqrt.f32 %v7850_v0  ;;  %v7863_v6 = vpop.eup %5290  ;;  %v3469_v29 = vsel %vm3468_vm4, %v7743_v37, %v3467_v13  ;;  %v3090_v37 = vld [vmem:[%s8958_s2 + $0xa8] sm:$0xff] }
 0x802   : > { %9282 = vst [vmem:[#allocation53_spill] sm:$0xff] %v7863_v6  ;;  %vm3454_vm7 = vcmp.eq.f32.partialorder %v7774_v21, inf  ;;  %vm3456_vm8 = vcmp.eq.f32.partialorder %v7774_v21, 0.0  ;;  %v3457_v24 = vand.u32 2147483648, %v7774_v21  ;;  %v7872_v20 = vmax.f32 %v3020_v26, 0.0  ;;  %v2462_v34 = vpop.xlane.xlu1 %2461  ;;  %v9284_v26 = vld [vmem:[#allocation82_spill] sm:$0xff] }
 0x803   : > { %v5293_v12 = vpop.eup %5292  ;;  %v3455_v42 = vsel %vm3454_vm7, %v7774_v21, %v3453_v43  ;;  %v3018_v8 = vsub.f32 2.0, %v2954_v56  ;;  %v2959_v55 = vmul.f32 %v9283_v47, %v2767_v54  ;;  %v7876_v50 = vmul.f32 %v3689_v18, %v7215_v14 }
 0x804   : > { %v3458_v23 = vsel %vm3456_vm8, %v3457_v24, %v3455_v42  ;;  %5300 = vrsqrt.f32 %v7852_v51  ;;  %v2765_v13 = vmul.f32 2.0, %v2462_v34  ;;  %v3982_v61 = vsel %vm3966_vm11, %v3909_v28, 0.0  ;;  %v5377_v28 = vld [vmem:[%s8959_s3 + $0x48] sm:$0xff] }
 0x805   : > { %v5295_v53 = vpop.eup %5294  ;;  %vm3673_vm9 = vcmp.eq.f32.partialorder %v7778_v45, 0.0  ;;  %v3846_v43 = vmul.f32 %v3458_v23, %v9284_v26  ;;  %5302 = vrsqrt.f32 %v7872_v20  ;;  %v3670_v56 = vmul.f32 %v5293_v12, %v7778_v45  ;;  %v9285_v34 = vld [vmem:[#allocation34_spill] sm:$0xff]  ;;  %v9286_v12 = vld [vmem:[#allocation81_spill] sm:$0xff] }
 0x806   : > { %v3472_v14 = vsel %vm3470_vm5, %v3471_v41, %v3469_v29  ;;  %v3488_v54 = vmul.f32 %v5295_v53, %v7802_v40  ;;  %v7889_v18 = vadd.f32 %v4147_v35, %v7727_v17  ;;  %v7894_v42 = vmax.f32 %v3018_v8, 0.0  ;;  %v2468_v26 = vpop.xlane.xlu1 %2467 }
 0x807   : > { %v3910_v24 = vmul.f32 %v5377_v28, %v3846_v43  ;;  %v3023_v47 = vsub.f32 2.0, %v2959_v55  ;;  %v2957_v23 = vmul.f32 %v9285_v34, %v2765_v13  ;;  %v3983_v41 = vadd.f32 %v3982_v61, %v7799_v59  ;;  %v9287_v34 = vld [vmem:[#allocation36_spill] sm:$0xff] }
 0x808   : > { %vm3489_vm10 = vcmp.eq.f32.partialorder %v7802_v40, inf  ;;  %v2768_v17 = vmul.f32 2.0, %v2468_v26  ;;  %v7902_v35 = vadd.f32 0.2, %v3156_v33  ;;  %v3848_v53 = vmul.f32 %v3472_v14, %v9286_v12 }
 0x809   : > { %v5297_v29 = vpop.eup %5296  ;;  %v3984_v8 = vsel %vm3966_vm11, %v3910_v24, 0.0  ;;  %v3490_v55 = vsel %vm3489_vm10, %v7802_v40, %v3488_v54  ;;  %5304 = vrsqrt.f32 %v7894_v42  ;;  %v3672_v13 = vsel %vm3671_vm6, %v7778_v45, %v3670_v56  ;;  %v5378_v56 = vld [vmem:[%s8959_s3 + $0x58] sm:$0xff] }
 0x80a   : > { %v3985_v43 = vadd.f32 %v3984_v8, %v3983_v41  ;;  %v3492_v61 = vand.u32 2147483648, %v7802_v40  ;;  %v3154_v59 = vsub.f32 2.0, %v3090_v37  ;;  %vm3491_vm12 = vcmp.eq.f32.partialorder %v7802_v40, 0.0  ;;  %v2464_v26 = vpop.xlane.xlu1 %2463  ;;  %v9289_v8 = vld [vmem:[#allocation86_spill] sm:$0xff] }
 0x80b   : > { %v5299_v28 = vpop.eup %5298  ;;  %v7913_v33 = vmax.f32 %v3023_v47, 0.0  ;;  %v3021_v14 = vsub.f32 2.0, %v2957_v23  ;;  %v2960_v24 = vmul.f32 %v9287_v34, %v2768_v17  ;;  %v2766_v46 = vmul.f32 2.0, %v2464_v26 }
 0x80c   : > { %v3987_v54 = vadd.f32 %v7846_v16, %v3985_v43  ;;  %v3493_v12 = vsel %vm3491_vm12, %v3492_v61, %v3490_v55  ;;  %v3474_v21 = vmul.f32 %v5299_v28, %v7850_v0  ;;  %v3912_v37 = vmul.f32 %v5378_v56, %v3848_v53  ;;  %v9290_v28 = vld [vmem:[#allocation62_spill] sm:$0xff] }
 0x80d   : > { %vm3475_vm13 = vcmp.eq.f32.partialorder %v7850_v0, inf  ;;  %v3478_v40 = vand.u32 2147483648, %v7850_v0  ;;  %5306 = vrsqrt.f32 %v7913_v33  ;;  %v9288_v23 = vand.u32 2147483648, %v7778_v45  ;;  %v7939_v45 = vld [vmem:[%s8959_s3 + $0xa8] sm:$0xff] }
 0x80e   : > { %v5301_v47 = vpop.eup %5300  ;;  %v3476_v41 = vsel %vm3475_vm13, %v7850_v0, %v3474_v21  ;;  %vm3477_vm14 = vcmp.eq.f32.partialorder %v7850_v0, 0.0  ;;  %v7932_v17 = vmax.f32 %v3021_v14, 0.0  ;;  %v3851_v55 = vmul.f32 %v3493_v12, %v9289_v8  ;;  %v2474_v26 = vpop.xlane.xlu1 %2473 }
 0x80f   : > { %v7928_v16 = vsel %vm3673_vm9, %v9288_v23, %v3672_v13  ;;  %v5303_v53 = vpop.eup %5302  ;;  %v3479_v43 = vsel %vm3477_vm14, %v3478_v40, %v3476_v41  ;;  %v3024_v61 = vsub.f32 2.0, %v2960_v24  ;;  %v2958_v34 = vmul.f32 %v9290_v28, %v2766_v46  ;;  %v5379_v23 = vld [vmem:[%s8959_s3 + $0x70] sm:$0xff] }
 0x810   : > { %v7942_v13 = vmul.f32 %v5297_v29, %v7815_v4  ;;  %5308 = vrsqrt.f32 %v7932_v17  ;;  %v7945_v0 = vadd.f32 0.2, %v3154_v59  ;;  %v4149_v21 = vsel %vm3966_vm11, %v7939_v45, 0.0 }
 0x811   : > { %v3988_v14 = vsel %vm3966_vm11, %v3912_v37, 0.0  ;;  %v7951_v46 = vmul.f32 %v5301_v47, %v7852_v51  ;;  %v7953_v24 = vmax.f32 %v3024_v61, 0.0  ;;  %v3022_v12 = vsub.f32 2.0, %v2958_v34  ;;  %v5380_v34 = vld [vmem:[%s8959_s3 + $0x60] sm:$0xff] }
 0x812   : > { %v3849_v56 = vmul.f32 %v3479_v43, %v7378_v10  ;;  %v3495_v29 = vmul.f32 %v5303_v53, %v7872_v20  ;;  %vm3496_vm15 = vcmp.eq.f32.partialorder %v7872_v20, inf  ;;  %v2771_v40 = vmul.f32 2.0, %v2474_v26  ;;  %v2470_v47 = vpop.xlane.xlu1 %2469 }
 0x813   : > { %v5305_v59 = vpop.eup %5304  ;;  %v3915_v41 = vmul.f32 %v5379_v23, %v3851_v55  ;;  %vm3498_vm0 = vcmp.eq.f32.partialorder %v7872_v20, 0.0  ;;  %v3499_v37 = vand.u32 2147483648, %v7872_v20  ;;  %5310 = vrsqrt.f32 %v7953_v24  ;;  %v9291_v55 = vld [vmem:[#allocation37_spill] sm:$0xff] }
 0x814   : > { %v3481_v10 = vmul.f32 %v5305_v59, %v7894_v42  ;;  %vm3482_vm1 = vcmp.eq.f32.partialorder %v7894_v42, inf  ;;  %vm3484_vm2 = vcmp.eq.f32.partialorder %v7894_v42, 0.0  ;;  %v4150_v53 = vadd.f32 %v4149_v21, %v7889_v18 }
 0x815   : > { %v3485_v8 = vand.u32 2147483648, %v7894_v42  ;;  %v7969_v43 = vmax.f32 %v3022_v12, 0.0  ;;  %v2963_v61 = vmul.f32 %v9291_v55, %v2771_v40  ;;  %v2769_v28 = vmul.f32 2.0, %v2470_v47 }
 0x816   : > { %v3913_v26 = vmul.f32 %v5380_v34, %v3849_v56  ;;  %v3497_v59 = vsel %vm3496_vm15, %v7872_v20, %v3495_v29  ;;  %v3483_v23 = vsel %vm3482_vm1, %v7894_v42, %v3481_v10  ;;  %vm3517_vm3 = vcmp.eq.f32.partialorder %v7913_v33, inf  ;;  %v2476_v47 = vpop.xlane.xlu1 %2475  ;;  %v9292_v10 = vld [vmem:[#allocation15_spill] sm:$0xff] }
 0x817   : > { %v5307_v18 = vpop.eup %5306  ;;  %v3994_v21 = vsel %vm3966_vm11, %v3915_v41, 0.0  ;;  %v3486_v12 = vsel %vm3484_vm2, %v3485_v8, %v3483_v23  ;;  %v3520_v40 = vand.u32 2147483648, %v7913_v33  ;;  %5312 = vrsqrt.f32 %v7969_v43 }
 0x818   : > { %v3989_v55 = vadd.f32 %v3988_v14, %v3987_v54  ;;  %v3850_v56 = vmul.f32 %v3486_v12, %v7402_v62  ;;  %vm3519_vm4 = vcmp.eq.f32.partialorder %v7913_v33, 0.0  ;;  %vm3503_vm5 = vcmp.eq.f32.partialorder %v7932_v17, inf  ;;  %v5381_v62 = vld [vmem:[%s8959_s3 + $0x68] sm:$0xff] }
 0x819   : > { %v7987_v42 = vadd.f32 %v7554_v7, %v4150_v53  ;;  %v3500_v29 = vsel %vm3498_vm0, %v3499_v37, %v3497_v59  ;;  %v3027_v41 = vsub.f32 2.0, %v2963_v61  ;;  %v2961_v8 = vmul.f32 %v9292_v10, %v2769_v28  ;;  %v3095_v7 = vld [vmem:[%s8958_s2 + $0xd0] sm:$0xff] }
 0x81a   : > { %v2772_v34 = vmul.f32 2.0, %v2476_v47  ;;  %v5309_v23 = vpop.eup %5308  ;;  %v3990_v6 = vsel %vm3966_vm11, %v3913_v26, 0.0  ;;  %v3914_v54 = vmul.f32 %v5381_v62, %v3850_v56  ;;  %v3516_v14 = vmul.f32 %v5307_v18, %v7913_v33  ;;  %v2472_v28 = vpop.xlane.xlu1 %2471  ;;  %v9293_v12 = vld [vmem:[#allocation38_spill] sm:$0xff] }
 0x81b   : > { %vm3505_vm6 = vcmp.eq.f32.partialorder %v7932_v17, 0.0  ;;  %v3502_v20 = vmul.f32 %v5309_v23, %v7932_v17  ;;  %v3506_v37 = vand.u32 2147483648, %v7932_v17  ;;  %v8003_v53 = vmax.f32 %v3027_v41, 0.0 }
 0x81c   : > { %v3025_v61 = vsub.f32 2.0, %v2961_v8  ;;  %v3852_v26 = vmul.f32 %v3500_v29, %v7400_v5  ;;  %v3992_v59 = vsel %vm3966_vm11, %v3914_v54, 0.0  ;;  %v2964_v18 = vmul.f32 %v9293_v12, %v2772_v34  ;;  %v5382_v54 = vld [vmem:[%s8959_s3 + $0x78] sm:$0xff]  ;;  %v5383_v12 = vld [vmem:[%s8959_s3 + $0x80] sm:$0xff] }
 0x81d   : > { %v2770_v47 = vmul.f32 2.0, %v2472_v28  ;;  %v5311_v56 = vpop.eup %5310  ;;  %v3991_v10 = vadd.f32 %v3990_v6, %v3989_v55  ;;  %v3504_v62 = vsel %vm3503_vm5, %v7932_v17, %v3502_v20  ;;  %5314 = vrsqrt.f32 %v8003_v53  ;;  %v9294_v20 = vld [vmem:[#allocation18_spill] sm:$0xff] }
 0x81e   : > { %v3159_v23 = vsub.f32 2.0, %v3095_v7  ;;  %v3518_v41 = vsel %vm3517_vm3, %v7913_v33, %v3516_v14  ;;  %v3507_v5 = vsel %vm3505_vm6, %v3506_v37, %v3504_v62  ;;  %vm3524_vm7 = vcmp.eq.f32.partialorder %v7953_v24, inf  ;;  %v2482_v34 = vpop.xlane.xlu1 %2481  ;;  %v8031_v28 = vld [vmem:[%s8959_s3 + $0xd0] sm:$0xff] }
 0x81f   : > { %vm3526_vm8 = vcmp.eq.f32.partialorder %v7953_v24, 0.0  ;;  %v3993_v29 = vadd.f32 %v3992_v59, %v3991_v10  ;;  %v3853_v6 = vmul.f32 %v3507_v5, %v7436_v9  ;;  %v3523_v55 = vmul.f32 %v5311_v56, %v7953_v24  ;;  %v9295_v5 = vld [vmem:[#allocation91_spill] sm:$0xff] }
 0x820   : > { %v8021_v8 = vmax.f32 %v3025_v61, 0.0  ;;  %v3916_v14 = vmul.f32 %v5382_v54, %v3852_v26  ;;  %v3527_v17 = vand.u32 2147483648, %v7953_v24  ;;  %v3028_v7 = vsub.f32 2.0, %v2964_v18 }
 0x821   : > { %v2962_v37 = vmul.f32 %v9294_v20, %v2770_v47  ;;  %v5313_v9 = vpop.eup %5312  ;;  %v3521_v61 = vsel %vm3519_vm4, %v3520_v40, %v3518_v41  ;;  %v8036_v59 = vadd.f32 0.2, %v3159_v23  ;;  %v8040_v26 = vsel %vm3966_vm11, %v8031_v28, 0.0  ;;  %v8051_v40 = vld [vmem:[%s8958_s2 + $0xc0] sm:$0xff] }
 0x822   : > { %5316 = vrsqrt.f32 %v8021_v8  ;;  %v3917_v18 = vmul.f32 %v5383_v12, %v3853_v6  ;;  %v3509_v47 = vmul.f32 %v5313_v9, %v7969_v43  ;;  %vm3510_vm9 = vcmp.eq.f32.partialorder %v7969_v43, inf  ;;  %v2478_v41 = vpop.xlane.xlu1 %2477 }
 0x823   : > { %v3513_v33 = vand.u32 2147483648, %v7969_v43  ;;  %v3995_v56 = vadd.f32 %v3994_v21, %v3993_v29  ;;  %v3525_v10 = vsel %vm3524_vm7, %v7953_v24, %v3523_v55  ;;  %v8056_v62 = vmax.f32 %v3028_v7, 0.0 }
 0x824   : > { %v3026_v23 = vsub.f32 2.0, %v2962_v37  ;;  %v3855_v6 = vmul.f32 %v3521_v61, %v9295_v5  ;;  %v3511_v54 = vsel %vm3510_vm9, %v7969_v43, %v3509_v47  ;;  %vm3512_vm10 = vcmp.eq.f32.partialorder %v7969_v43, 0.0  ;;  %v9296_v43 = vld [vmem:[#allocation43_spill] sm:$0xff] }
 0x825   : > { %v2775_v20 = vmul.f32 2.0, %v2482_v34  ;;  %v3996_v9 = vsel %vm3966_vm11, %v3916_v14, 0.0  ;;  %v3514_v12 = vsel %vm3512_vm10, %v3513_v33, %v3511_v54  ;;  %5318 = vrsqrt.f32 %v8056_v62 }
 0x826   : > { %v3157_v21 = vsub.f32 2.0, %v8051_v40  ;;  %v3998_v29 = vsel %vm3966_vm11, %v3917_v18, 0.0  ;;  %v3528_v55 = vsel %vm3526_vm8, %v3527_v17, %v3525_v10  ;;  %v3854_v7 = vmul.f32 %v3514_v12, %v7456_v3  ;;  %v2484_v5 = vpop.xlane.xlu1 %2483  ;;  %v5384_v18 = vld [vmem:[%s8959_s3 + $0x90] sm:$0xff]  ;;  %v5385_v3 = vld [vmem:[%s8959_s3 + $0x88] sm:$0xff] }
 0x827   : > { %v8068_v37 = vmax.f32 %v3026_v23, 0.0  ;;  %v5315_v61 = vpop.eup %5314  ;;  %v3997_v47 = vadd.f32 %v3996_v9, %v3995_v56  ;;  %v2967_v34 = vmul.f32 %v9296_v43, %v2775_v20  ;;  %v4154_v14 = vadd.f32 %v7833_v60, %v7987_v42  ;;  %v9297_v10 = vld [vmem:[#allocation94_spill] sm:$0xff]  ;;  %v8085_v42 = vld [vmem:[%s8959_s3 + $0xc0] sm:$0xff] }
 0x828   : > { %v2773_v33 = vmul.f32 2.0, %v2478_v41  ;;  %v3919_v54 = vmul.f32 %v5384_v18, %v3855_v6  ;;  %v3918_v24 = vmul.f32 %v5385_v3, %v3854_v7  ;;  %v3544_v17 = vmul.f32 %v5315_v61, %v8003_v53  ;;  %v9298_v41 = vld [vmem:[#allocation21_spill] sm:$0xff]  ;;  %v5386_v3 = vld [vmem:[%s8959_s3 + $0x98] sm:$0xff] }
 0x829   : > { %5320 = vrsqrt.f32 %v8068_v37  ;;  %v3999_v56 = vadd.f32 %v3998_v29, %v3997_v47  ;;  %v3856_v23 = vmul.f32 %v3528_v55, %v9297_v10  ;;  %v3031_v60 = vsub.f32 2.0, %v2967_v34 }
 0x82a   : > { %v2965_v6 = vmul.f32 %v9298_v41, %v2773_v33  ;;  %v4000_v20 = vsel %vm3966_vm11, %v3918_v24, 0.0  ;;  %vm3545_vm12 = vcmp.eq.f32.partialorder %v8003_v53, inf  ;;  %vm3547_vm13 = vcmp.eq.f32.partialorder %v8003_v53, 0.0  ;;  %v2480_v47 = vpop.xlane.xlu1 %2479 }
 0x82b   : > { %v4155_v9 = vsel %vm3966_vm11, %v8085_v42, 0.0  ;;  %v4001_v29 = vadd.f32 %v4000_v20, %v3999_v56  ;;  %v3548_v55 = vand.u32 2147483648, %v8003_v53  ;;  %v8094_v7 = vmax.f32 %v3031_v60, 0.0 }
 0x82c   : > { %v5317_v12 = vpop.eup %5316  ;;  %v3029_v61 = vsub.f32 2.0, %v2965_v6  ;;  %v4002_v43 = vsel %vm3966_vm11, %v3919_v54, 0.0  ;;  %v3546_v34 = vsel %vm3545_vm12, %v8003_v53, %v3544_v17  ;;  %v2776_v18 = vmul.f32 2.0, %v2484_v5 }
 0x82d   : > { %v3530_v33 = vmul.f32 %v5317_v12, %v8021_v8  ;;  %v3920_v24 = vmul.f32 %v5386_v3, %v3856_v23  ;;  %vm3531_vm14 = vcmp.eq.f32.partialorder %v8021_v8, inf  ;;  %v3534_v56 = vand.u32 2147483648, %v8021_v8  ;;  %v9299_v23 = vld [vmem:[#allocation22_spill] sm:$0xff] }
 0x82e   : > { %5322 = vrsqrt.f32 %v8094_v7  ;;  %v4003_v10 = vadd.f32 %v4002_v43, %v4001_v29  ;;  %vm3533_vm15 = vcmp.eq.f32.partialorder %v8021_v8, 0.0  ;;  %v8107_v54 = vmax.f32 %v3029_v61, 0.0  ;;  %v2490_v20 = vpop.xlane.xlu1 %2489  ;;  %v8125_v3 = vld [vmem:[%s8959_s3 + $0xc8] sm:$0xff] }
 0x82f   : > { %v3532_v60 = vsel %vm3531_vm14, %v8021_v8, %v3530_v33  ;;  %v5319_v17 = vpop.eup %5318  ;;  %v3549_v5 = vsel %vm3547_vm13, %v3548_v55, %v3546_v34  ;;  %vm3552_vm0 = vcmp.eq.f32.partialorder %v8056_v62, inf  ;;  %v2968_v6 = vmul.f32 %v9299_v23, %v2776_v18 }
 0x830   : > { %v3535_v41 = vsel %vm3533_vm15, %v3534_v56, %v3532_v60  ;;  %v3551_v29 = vmul.f32 %v5319_v17, %v8056_v62  ;;  %vm3554_vm1 = vcmp.eq.f32.partialorder %v8056_v62, 0.0  ;;  %5324 = vrsqrt.f32 %v8107_v54 }
 0x831   : > { %v3857_v12 = vmul.f32 %v3535_v41, %v7723_v48  ;;  %v4004_v8 = vsel %vm3966_vm11, %v3920_v24, 0.0  ;;  %v3555_v61 = vand.u32 2147483648, %v8056_v62  ;;  %v4156_v53 = vadd.f32 %v4155_v9, %v4154_v14  ;;  %v5387_v41 = vld [vmem:[%s8959_s3 + $0xb0] sm:$0xff] }
 0x832   : > { %v3032_v55 = vsub.f32 2.0, %v2968_v6  ;;  %v3859_v34 = vmul.f32 %v3549_v5, %v7543_v15  ;;  %v4005_v18 = vadd.f32 %v4004_v8, %v4003_v10  ;;  %v3553_v48 = vsel %vm3552_vm0, %v8056_v62, %v3551_v29  ;;  %v2486_v9 = vpop.xlane.xlu1 %2485  ;;  %v8138_v62 = vld [vmem:[%s8958_s2 + $0xd8] sm:$0xff] }
 0x833   : > { %v5321_v43 = vpop.eup %5320  ;;  %v3921_v33 = vmul.f32 %v3857_v12, %v7821_v52  ;;  %v3556_v56 = vsel %vm3554_vm1, %v3555_v61, %v3553_v48  ;;  %v4157_v14 = vsel %vm3966_vm11, %v8125_v3, 0.0  ;;  %vm3538_vm2 = vcmp.eq.f32.partialorder %v8068_v37, inf }
 0x834   : > { %v3537_v24 = vmul.f32 %v5321_v43, %v8068_v37  ;;  %v8128_v60 = vmax.f32 %v3032_v55, 0.0  ;;  %v3541_v52 = vand.u32 2147483648, %v8068_v37  ;;  %v2774_v10 = vmul.f32 2.0, %v2480_v47  ;;  %v8155_v55 = vld [vmem:[%s8959_s3 + $0xd8] sm:$0xff]  ;;  %v9300_v43 = vld [vmem:[#allocation41_spill] sm:$0xff] }
 0x835   : > { %v4006_v15 = vsel %vm3966_vm11, %v3921_v33, 0.0  ;;  %vm3540_vm3 = vcmp.eq.f32.partialorder %v8068_v37, 0.0  ;;  %v3923_v23 = vmul.f32 %v5387_v41, %v3859_v34  ;;  %v3860_v6 = vmul.f32 %v3556_v56, %v7902_v35 }
 0x836   : > { %v4007_v17 = vadd.f32 %v4006_v15, %v4005_v18  ;;  %v3539_v5 = vsel %vm3538_vm2, %v8068_v37, %v3537_v24  ;;  %5326 = vrsqrt.f32 %v8128_v60  ;;  %v4158_v29 = vadd.f32 %v4157_v14, %v4156_v53  ;;  %v2492_v35 = vpop.xlane.xlu1 %2491  ;;  %v9301_v15 = vld [vmem:[#allocation48_spill] sm:$0xff] }
 0x837   : > { %v3542_v12 = vsel %vm3540_vm3, %v3541_v52, %v3539_v5  ;;  %vm3692_vm4 = vcmp.eq.f32.partialorder %v7815_v4, inf  ;;  %v3221_v61 = vadd.f32 0.2, %v3157_v21  ;;  %v3160_v37 = vsub.f32 2.0, %v8138_v62 }
 0x838   : > { %v5323_v8 = vpop.eup %5322  ;;  %v3858_v47 = vmul.f32 %v3542_v12, %v7945_v0  ;;  %v2966_v34 = vmul.f32 %v9300_v43, %v2774_v10  ;;  %vm3678_vm5 = vcmp.eq.f32.partialorder %v7852_v51, inf  ;;  %vm3573_vm6 = vcmp.eq.f32.partialorder %v8094_v7, inf }
 0x839   : > { %vm3575_vm7 = vcmp.eq.f32.partialorder %v8094_v7, 0.0  ;;  %v4161_v0 = vsel %vm3966_vm11, %v8155_v55, 0.0  ;;  %v2779_v40 = vmul.f32 2.0, %v2490_v20  ;;  %v3572_v53 = vmul.f32 %v5323_v8, %v8094_v7 }
 0x83a   : > { %v3922_v21 = vmul.f32 %v3858_v47, %v7939_v45  ;;  %v3576_v33 = vand.u32 2147483648, %v8094_v7  ;;  %v3030_v18 = vsub.f32 2.0, %v2966_v34  ;;  %v5325_v48 = vpop.eup %5324  ;;  %v4010_v56 = vsel %vm3966_vm11, %v3923_v23, 0.0  ;;  %v3094_v45 = vld [vmem:[%s8958_s2 + $0xc8] sm:$0xff]  ;;  %v2488_v41 = vpop.xlane.xlu1 %2487  ;;  %v8189_v34 = vld [vmem:[%s8958_s2 + $0xf0] sm:$0xff] }
 0x83b   : > { %v3924_v24 = vmul.f32 %v3860_v6, %v7826_v11  ;;  %v4160_v14 = vadd.f32 %v8040_v26, %v4158_v29  ;;  %v2971_v52 = vmul.f32 %v9301_v15, %v2779_v40  ;;  %v3558_v20 = vmul.f32 %v5325_v48, %v8107_v54 }
 0x83c   : > { %v4008_v62 = vsel %vm3966_vm11, %v3922_v21, 0.0  ;;  %v8175_v10 = vmax.f32 %v3030_v18, 0.0  ;;  %v2777_v5 = vmul.f32 2.0, %v2486_v9  ;;  %vm3559_vm8 = vcmp.eq.f32.partialorder %v8107_v54, inf }
 0x83d   : > { %v4009_v12 = vadd.f32 %v4008_v62, %v4007_v17  ;;  %v3562_v11 = vand.u32 2147483648, %v8107_v54  ;;  %v3035_v26 = vsub.f32 2.0, %v2971_v52  ;;  %v3574_v23 = vsel %vm3573_vm6, %v8094_v7, %v3572_v53  ;;  %v9302_v53 = vld [vmem:[#allocation20_spill] sm:$0xff] }
 0x83e   : > { %v3560_v6 = vsel %vm3559_vm8, %v8107_v54, %v3558_v20  ;;  %vm3561_vm9 = vcmp.eq.f32.partialorder %v8107_v54, 0.0  ;;  %5328 = vrsqrt.f32 %v8175_v10  ;;  %v4012_v29 = vsel %vm3966_vm11, %v3924_v24, 0.0  ;;  %v8196_v54 = vld [vmem:[%s8959_s3 + $0xe0] sm:$0xff]  ;;  %v2518_v48 = vpop.xlane.xlu1 %2517  ;;  %v8219_v20 = vld [vmem:[%s8959_s3 + $0xe8] sm:$0xff] }
 0x83f   : > { %v4011_v9 = vadd.f32 %v4010_v56, %v4009_v12  ;;  %v3563_v8 = vsel %vm3561_vm9, %v3562_v11, %v3560_v6  ;;  %v3158_v17 = vsub.f32 2.0, %v3094_v45  ;;  %v8191_v40 = vmax.f32 %v3035_v26, 0.0  ;;  %v9303_v6 = vld [vmem:[#allocation52_spill] sm:$0xff] }
 0x840   : > { %v5327_v47 = vpop.eup %5326  ;;  %v3861_v43 = vmul.f32 %v3563_v8, %v3221_v61  ;;  %v4162_v21 = vadd.f32 %v4161_v0, %v4160_v14  ;;  %v2969_v18 = vmul.f32 %v9302_v53, %v2777_v5  ;;  %v3693_v61 = vsel %vm3692_vm4, %v7815_v4, %v7942_v13 }
 0x841   : > { %v3577_v56 = vsel %vm3575_vm7, %v3576_v33, %v3574_v23  ;;  %v4013_v24 = vadd.f32 %v4012_v29, %v4011_v9  ;;  %v4163_v15 = vsel %vm3966_vm11, %v8196_v54, 0.0  ;;  %v3679_v0 = vsel %vm3678_vm5, %v7852_v51, %v7951_v46 }
 0x842   : > { %v3925_v14 = vmul.f32 %v3861_v43, %v8085_v42  ;;  %v3224_v52 = vadd.f32 0.2, %v3160_v37  ;;  %v3579_v62 = vmul.f32 %v5327_v47, %v8128_v60  ;;  %vm3694_vm10 = vcmp.eq.f32.partialorder %v7815_v4, 0.0  ;;  %v3097_v37 = vld [vmem:[%s8958_s2 + $0xe0] sm:$0xff]  ;;  %v2520_v12 = vpop.xlane.xlu1 %2519 }
 0x843   : > { %v3222_v13 = vadd.f32 0.2, %v3158_v17  ;;  %v3163_v7 = vsub.f32 2.0, %v8189_v34  ;;  %5330 = vrsqrt.f32 %v8191_v40  ;;  %v3033_v33 = vsub.f32 2.0, %v2969_v18 }
 0x844   : > { %vm3680_vm12 = vcmp.eq.f32.partialorder %v7852_v51, 0.0  ;;  %v3863_v46 = vmul.f32 %v3577_v56, %v8036_v59  ;;  %v4014_v42 = vsel %vm3966_vm11, %v3925_v14, 0.0  ;;  %v4164_v45 = vadd.f32 %v4163_v15, %v4162_v21  ;;  %v8235_v59 = vld [vmem:[%s8959_s3 + $0xf0] sm:$0xff]  ;;  %v8253_v15 = vld [vmem:[%s8959_s3 + $0xf8] sm:$0xff]  ;;  %v9304_v14 = vld [vmem:[#allocation25_spill] sm:$0xff] }
 0x845   : > { %v2780_v5 = vmul.f32 2.0, %v2492_v35  ;;  %v4015_v11 = vadd.f32 %v4014_v42, %v4013_v24  ;;  %vm3580_vm13 = vcmp.eq.f32.partialorder %v8128_v60, inf  ;;  %vm3582_vm14 = vcmp.eq.f32.partialorder %v8128_v60, 0.0 }
 0x846   : > { %v8229_v26 = vmax.f32 %v3033_v33, 0.0  ;;  %v3581_v23 = vsel %vm3580_vm13, %v8128_v60, %v3579_v62  ;;  %v4165_v35 = vsel %vm3966_vm11, %v8219_v20, 0.0  ;;  %v2778_v9 = vmul.f32 2.0, %v2488_v41  ;;  %v2522_v18 = vpop.xlane.xlu1 %2521 }
 0x847   : > { %v2972_v29 = vmul.f32 %v9303_v6, %v2780_v5  ;;  %v3583_v8 = vand.u32 2147483648, %v8128_v60  ;;  %v4167_v17 = vsel %vm3966_vm11, %v8235_v59, 0.0  ;;  %v3161_v47 = vsub.f32 2.0, %v3097_v37 }
 0x848   : > { %5332 = vrsqrt.f32 %v8229_v26  ;;  %v5329_v43 = vpop.eup %5328  ;;  %v3927_v34 = vmul.f32 %v3863_v46, %v8031_v28  ;;  %vm3566_vm15 = vcmp.eq.f32.partialorder %v8175_v10, inf  ;;  %v4166_v53 = vadd.f32 %v4165_v35, %v4164_v45  ;;  %v3100_v35 = vld [vmem:[%s8958_s2 + $0xf8] sm:$0xff] }
 0x849   : > { %v3036_v21 = vsub.f32 2.0, %v2972_v29  ;;  %v3584_v56 = vsel %vm3582_vm14, %v3583_v8, %v3581_v23  ;;  %v3565_v41 = vmul.f32 %v5329_v43, %v8175_v10  ;;  %v3569_v24 = vand.u32 2147483648, %v8175_v10 }
 0x84a   : > { %v2970_v62 = vmul.f32 %v9304_v14, %v2778_v9  ;;  %v4169_v28 = vsel %vm3966_vm11, %v8253_v15, 0.0  ;;  %v4168_v46 = vadd.f32 %v4167_v17, %v4166_v53  ;;  %v2793_v42 = vmul.f32 2.0, %v2518_v48  ;;  %v2524_v48 = vpop.xlane.xlu1 %2523 }
 0x84b   : > { %v8258_v33 = vmax.f32 %v3036_v21, 0.0  ;;  %v3681_v60 = vand.u32 2147483648, %v7852_v51  ;;  %v3567_v37 = vsel %vm3566_vm15, %v8175_v10, %v3565_v41  ;;  %vm3568_vm0 = vcmp.eq.f32.partialorder %v8175_v10, 0.0  ;;  %v9306_v21 = vld [vmem:[#allocation87_spill] sm:$0xff]  ;;  %v3098_v51 = vld [vmem:[%s8958_s2 + $0xe8] sm:$0xff] }
 0x84c   : > { %v3034_v45 = vsub.f32 2.0, %v2970_v62  ;;  %v9305_v5 = vand.u32 2147483648, %v7815_v4  ;;  %v3864_v6 = vmul.f32 %v3584_v56, %v3224_v52  ;;  %v3570_v29 = vsel %vm3568_vm0, %v3569_v24, %v3567_v37  ;;  %v9308_v62 = vld [vmem:[#allocation75_spill] sm:$0xff] }
 0x84d   : > { %5334 = vrsqrt.f32 %v8258_v33  ;;  %v5331_v9 = vpop.eup %5330  ;;  %v8275_v10 = vsel %vm3680_vm12, %v3681_v60, %v3679_v0  ;;  %v3862_v8 = vmul.f32 %v3570_v29, %v3222_v13  ;;  %v8277_v17 = vadd.f32 0.2, %v3163_v7  ;;  %v9307_v0 = vld [vmem:[#allocation60_spill] sm:$0xff] }
 0x84e   : > { %v8267_v23 = vsel %vm3694_vm10, %v9305_v5, %v3693_v61  ;;  %v4170_v4 = vadd.f32 %v4169_v28, %v4168_v46  ;;  %v4018_v61 = vsel %vm3966_vm11, %v3927_v34, 0.0  ;;  %v3225_v52 = vadd.f32 0.2, %v3161_v47  ;;  %v8293_v47 = vpop.xlane.xlu1 %2525  ;;  %v9309_v5 = vld [vmem:[#allocation44_spill] sm:$0xff] }
 0x84f   : > { %v8280_v43 = vmax.f32 %v3034_v45, 0.0  ;;  %v2985_v53 = vmul.f32 %v9306_v21, %v2793_v42  ;;  %v3926_v56 = vmul.f32 %v3862_v8, %v8125_v3  ;;  %vm3601_vm1 = vcmp.eq.f32.partialorder %v8191_v40, inf }
 0x850   : > { %v3164_v41 = vsub.f32 2.0, %v3100_v35  ;;  %v4172_v13 = vadd.f32 %v9307_v0, %v4170_v4  ;;  %v3928_v7 = vmul.f32 %v3864_v6, %v8155_v55  ;;  %v3600_v34 = vmul.f32 %v5331_v9, %v8191_v40  ;;  %v9310_v4 = vld [vmem:[#allocation35_spill] sm:$0xff] }
 0x851   : > { %vm3603_vm2 = vcmp.eq.f32.partialorder %v8191_v40, 0.0  ;;  %5336 = vrsqrt.f32 %v8280_v43  ;;  %v4016_v24 = vsel %vm3966_vm11, %v3926_v56, 0.0  ;;  %v3604_v14 = vand.u32 2147483648, %v8191_v40 }
 0x852   : > { %v5333_v3 = vpop.eup %5332  ;;  %v4174_v28 = vadd.f32 %v9308_v62, %v4172_v13  ;;  %v2794_v46 = vmul.f32 2.0, %v2520_v12  ;;  %v4017_v42 = vadd.f32 %v4016_v24, %v4015_v11  ;;  %v3162_v55 = vsub.f32 2.0, %v3098_v51  ;;  %v8308_v9 = vpop.xlane.xlu1 %2527 }
 0x853   : > { %v3586_v60 = vmul.f32 %v5333_v3, %v8229_v26  ;;  %v3049_v37 = vsub.f32 2.0, %v2985_v53  ;;  %vm3587_vm3 = vcmp.eq.f32.partialorder %v8229_v26, inf  ;;  %vm3589_vm4 = vcmp.eq.f32.partialorder %v8229_v26, 0.0  ;;  %v9311_v53 = vld [vmem:[#allocation88_spill] sm:$0xff] }
 0x854   : > { %v3590_v45 = vand.u32 2147483648, %v8229_v26  ;;  %v4176_v6 = vadd.f32 %v9309_v5, %v4174_v28  ;;  %v4020_v29 = vsel %vm3966_vm11, %v3928_v7, 0.0  ;;  %v4019_v35 = vadd.f32 %v4018_v61, %v4017_v42 }
 0x855   : > { %v3602_v12 = vsel %vm3601_vm1, %v8191_v40, %v3600_v34  ;;  %v3588_v11 = vsel %vm3587_vm3, %v8229_v26, %v3586_v60  ;;  %v2986_v56 = vmul.f32 %v9311_v53, %v2794_v46  ;;  %v2795_v51 = vmul.f32 2.0, %v2522_v18  ;;  %v9312_v26 = vld [vmem:[#allocation63_spill] sm:$0xff]  ;;  %v9313_v18 = vld [vmem:[#allocation89_spill] sm:$0xff] }
 0x856   : > { %v3591_v8 = vsel %vm3589_vm4, %v3590_v45, %v3588_v11  ;;  %v4178_v21 = vadd.f32 %v9310_v4, %v4176_v6  ;;  %v4021_v3 = vadd.f32 %v4020_v29, %v4019_v35  ;;  %v3228_v24 = vadd.f32 0.2, %v3164_v41  ;;  %v8322_v46 = vpop.xlane.xlu1 %2529  ;;  %v9314_v60 = vld [vmem:[#allocation79_spill] sm:$0xff]  ;;  %v9315_v29 = vld [vmem:[#allocation54_spill] sm:$0xff] }
 0x857   : > { %v5335_v0 = vpop.eup %5334  ;;  %v3865_v13 = vmul.f32 %v3591_v8, %v3225_v52  ;;  %v8312_v7 = vmax.f32 %v3049_v37, 0.0  ;;  %vm3608_vm5 = vcmp.eq.f32.partialorder %v8258_v33, inf  ;;  %v3226_v34 = vadd.f32 0.2, %v3162_v55  ;;  %v9316_v53 = vld [vmem:[#allocation67_spill] sm:$0xff] }
 0x858   : > { %v3607_v61 = vmul.f32 %v5335_v0, %v8258_v33  ;;  %v4180_v62 = vadd.f32 %v9312_v26, %v4178_v21  ;;  %v3605_v28 = vsel %vm3603_vm2, %v3604_v14, %v3602_v12  ;;  %vm3610_vm6 = vcmp.eq.f32.partialorder %v8258_v33, 0.0  ;;  %v9317_v0 = vld [vmem:[#allocation90_spill] sm:$0xff] }
 0x859   : > { %v3929_v42 = vmul.f32 %v3865_v13, %v8196_v54  ;;  %v2987_v52 = vmul.f32 %v9313_v18, %v2795_v51  ;;  %v3050_v45 = vsub.f32 2.0, %v2986_v56  ;;  %v2796_v5 = vmul.f32 2.0, %v2524_v48 }
 0x85a   : > { %v3609_v41 = vsel %vm3608_vm5, %v8258_v33, %v3607_v61  ;;  %v4182_v37 = vadd.f32 %v9314_v60, %v4180_v62  ;;  %v3611_v40 = vand.u32 2147483648, %v8258_v33  ;;  %vm3594_vm7 = vcmp.eq.f32.partialorder %v8280_v43, inf  ;;  %v8337_v4 = vpop.xlane.xlu1 %2531  ;;  %v9320_v60 = vld [vmem:[#allocation70_spill] sm:$0xff] }
 0x85b   : > { %v5337_v55 = vpop.eup %5336  ;;  %v4022_v6 = vsel %vm3966_vm11, %v3929_v42, 0.0  ;;  %5338 = vrsqrt.f32 %v8312_v7  ;;  %vm3596_vm8 = vcmp.eq.f32.partialorder %v8280_v43, 0.0  ;;  %v3867_v12 = vmul.f32 %v3605_v28, %v8277_v17  ;;  %v5388_v17 = vld [vmem:[%s8959_s3 + $0x150] sm:$0xff] }
 0x85c   : > { %v4023_v54 = vadd.f32 %v4022_v6, %v4021_v3  ;;  %v3593_v14 = vmul.f32 %v5337_v55, %v8280_v43  ;;  %v4184_v35 = vadd.f32 %v9315_v29, %v4182_v37  ;;  %v3612_v48 = vsel %vm3610_vm6, %v3611_v40, %v3609_v41  ;;  %v9318_v3 = vld [vmem:[#allocation64_spill] sm:$0xff]  ;;  %v9319_v42 = vld [vmem:[#allocation71_spill] sm:$0xff]  ;;  %v9322_v55 = vld [vmem:[#allocation85_spill] sm:$0xff] }
 0x85d   : > { %v3597_v11 = vand.u32 2147483648, %v8280_v43  ;;  %v3051_v8 = vsub.f32 2.0, %v2987_v52  ;;  %v8341_v51 = vmax.f32 %v3050_v45, 0.0  ;;  %v2988_v13 = vmul.f32 %v9317_v0, %v2796_v5  ;;  %v9321_v45 = vld [vmem:[#allocation84_spill] sm:$0xff] }
 0x85e   : > { %v3595_v21 = vsel %vm3594_vm7, %v8280_v43, %v3593_v14  ;;  %v4186_v56 = vadd.f32 %v9316_v53, %v4184_v35  ;;  %v3943_v33 = vmul.f32 %v5388_v17, %v7876_v50  ;;  %v3877_v61 = vmul.f32 %v7928_v16, %v9318_v3  ;;  %v8362_v5 = vpop.xlane.xlu1 %2533  ;;  %v8404_v3 = vld [vmem:[%s8959_s3 + $0x160] sm:$0xff] }
 0x85f   : > { %v3598_v26 = vsel %vm3596_vm8, %v3597_v11, %v3595_v21  ;;  %v8350_v62 = vmax.f32 %v3051_v8, 0.0  ;;  %v3868_v28 = vmul.f32 %v3612_v48, %v3228_v24  ;;  %v3052_v52 = vsub.f32 2.0, %v2988_v13  ;;  %v5390_v8 = vld [vmem:[%s8959_s3 + $0x158] sm:$0xff] }
 0x860   : > { %v3866_v43 = vmul.f32 %v3598_v26, %v3226_v34  ;;  %v4188_v18 = vadd.f32 %v9319_v42, %v4186_v56  ;;  %v8355_v41 = vmul.f32 %v7786_v39, %v7718_v2  ;;  %v3880_v37 = vmul.f32 %v8267_v23, %v9320_v60  ;;  %v3113_v34 = vld [vmem:[%s8958_s2 + $0x160] sm:$0xff] }
 0x861   : > { %v3878_v50 = vmul.f32 %v8275_v10, %v9321_v45  ;;  %v3931_v16 = vmul.f32 %v3867_v12, %v8235_v59  ;;  %5340 = vrsqrt.f32 %v8341_v51  ;;  %v8370_v39 = vmax.f32 %v3052_v52, 0.0  ;;  %v3115_v10 = vld [vmem:[%s8958_s2 + $0x170] sm:$0xff]  ;;  %v9323_v12 = vld [vmem:[#allocation80_spill] sm:$0xff] }
 0x862   : > { %v3930_v24 = vmul.f32 %v3866_v43, %v8219_v20  ;;  %v4190_v6 = vadd.f32 %v9322_v55, %v4188_v18  ;;  %v8374_v23 = vsel %vm3966_vm11, %v7796_v44, 0.0  ;;  %v8377_v59 = vsel %vm3966_vm11, %v3943_v33, 0.0  ;;  %v3114_v20 = vld [vmem:[%s8958_s2 + $0x168] sm:$0xff]  ;;  %v5389_v44 = vld [vmem:[%s8959_s3 + $0x140] sm:$0xff] }
 0x863   : > { %5342 = vrsqrt.f32 %v8350_v62  ;;  %v2797_v40 = vmul.f32 2.0, %v8293_v47  ;;  %v3941_v14 = vmul.f32 %v5389_v44, %v3877_v61  ;;  %v3932_v29 = vmul.f32 %v3868_v28, %v8253_v15  ;;  %v5391_v47 = vld [vmem:[%s8959_s3 + $0x148] sm:$0xff]  ;;  %v9325_v28 = vld [vmem:[#allocation92_spill] sm:$0xff] }
 0x864   : > { %v4024_v35 = vsel %vm3966_vm11, %v3930_v24, 0.0  ;;  %v4192_v48 = vadd.f32 %v9323_v12, %v4190_v6  ;;  %v3944_v21 = vmul.f32 %v5390_v8, %v3880_v37  ;;  %v3942_v53 = vmul.f32 %v5391_v47, %v3878_v50  ;;  %v9324_v61 = vld [vmem:[#allocation74_spill] sm:$0xff] }
 0x865   : > { %v5339_v11 = vpop.eup %5338  ;;  %v4025_v56 = vadd.f32 %v4024_v35, %v4023_v54  ;;  %v3177_v0 = vsub.f32 2.0, %v3113_v34  ;;  %v4026_v13 = vsel %vm3966_vm11, %v3931_v16, 0.0  ;;  %v3178_v15 = vsub.f32 2.0, %v3114_v20  ;;  %v8409_v54 = vpop.xlane.xlu1 %2535  ;;  %v3116_v16 = vld [vmem:[%s8958_s2 + $0x178] sm:$0xff]  ;;  %v9326_v34 = vld [vmem:[#allocation93_spill] sm:$0xff]  ;;  %v8444_v35 = vld [vmem:[%s8959_s3 + $0x170] sm:$0xff] }
 0x866   : > { %v3179_v17 = vsub.f32 2.0, %v3115_v10  ;;  %5344 = vrsqrt.f32 %v8370_v39  ;;  %v4194_v26 = vadd.f32 %v9324_v61, %v4192_v48  ;;  %v2989_v43 = vmul.f32 %v9325_v28, %v2797_v40 }
 0x867   : > { %v4027_v33 = vadd.f32 %v4026_v13, %v4025_v56  ;;  %v2798_v42 = vmul.f32 2.0, %v8308_v9  ;;  %v8412_v18 = vsel %vm3966_vm11, %v3941_v14, 0.0  ;;  %v4028_v52 = vsel %vm3966_vm11, %v3932_v29, 0.0  ;;  %v8424_v9 = vld [vmem:[%s8959_s3 + $0x168] sm:$0xff]  ;;  %v8460_v13 = vld [vmem:[%s8959_s3 + $0x178] sm:$0xff] }
 0x868   : > { %v4195_v60 = vsel %vm3966_vm11, %v8404_v3, 0.0  ;;  %v3698_v37 = vmul.f32 %v5339_v11, %v8312_v7  ;;  %v8419_v45 = vsel %vm3966_vm11, %v3944_v21, 0.0  ;;  %v3053_v24 = vsub.f32 2.0, %v2989_v43 }
 0x869   : > { %v4029_v50 = vadd.f32 %v4028_v52, %v4027_v33  ;;  %v2990_v55 = vmul.f32 %v9326_v34, %v2798_v42  ;;  %v8431_v6 = vsel %vm3966_vm11, %v3942_v53, 0.0  ;;  %v3241_v20 = vadd.f32 0.2, %v3177_v0 }
 0x86a   : > { %v8433_v10 = vadd.f32 0.2, %v3178_v15  ;;  %v4197_v40 = vsel %vm3966_vm11, %v8424_v9, 0.0  ;;  %v4196_v14 = vadd.f32 %v4195_v60, %v4194_v26  ;;  %vm3699_vm9 = vcmp.eq.f32.partialorder %v8312_v7, inf }
 0x86b   : > { %v4031_v44 = vadd.f32 %v7627_v63, %v4029_v50  ;;  %v8439_v29 = vadd.f32 0.2, %v3179_v17  ;;  %v5341_v12 = vpop.eup %5340  ;;  %v3700_v48 = vsel %vm3699_vm9, %v8312_v7, %v3698_v37  ;;  %v4199_v11 = vsel %vm3966_vm11, %v8444_v35, 0.0  ;;  %v3117_v63 = vld [vmem:[%s8958_s2 + $0x180] sm:$0xff]  ;;  %v8462_v17 = vpop.xlane.xlu1 %2537 }
 0x86c   : > { %v8452_v8 = vmax.f32 %v3053_v24, 0.0  ;;  %v2799_v21 = vmul.f32 2.0, %v8322_v46  ;;  %v3702_v56 = vand.u32 2147483648, %v8312_v7  ;;  %v3180_v0 = vsub.f32 2.0, %v3116_v16 }
 0x86d   : > { %v5343_v47 = vpop.eup %5342  ;;  %v4033_v53 = vadd.f32 %v7651_v57, %v4031_v44  ;;  %v3054_v15 = vsub.f32 2.0, %v2990_v55  ;;  %vm3701_vm10 = vcmp.eq.f32.partialorder %v8312_v7, 0.0  ;;  %vm3706_vm12 = vcmp.eq.f32.partialorder %v8341_v51, inf  ;;  %v9327_v7 = vld [vmem:[#allocation95_spill] sm:$0xff] }
 0x86e   : > { %vm3708_vm13 = vcmp.eq.f32.partialorder %v8341_v51, 0.0  ;;  %v4201_v57 = vsel %vm3966_vm11, %v8460_v13, 0.0  ;;  %v3703_v33 = vsel %vm3701_vm10, %v3702_v56, %v3700_v48  ;;  %v4198_v61 = vadd.f32 %v4197_v40, %v4196_v14 }
 0x86f   : > { %v4035_v46 = vadd.f32 %v7549_v1, %v4033_v53  ;;  %v3181_v26 = vsub.f32 2.0, %v3117_v63  ;;  %v3705_v43 = vmul.f32 %v5341_v12, %v8341_v51  ;;  %v3712_v42 = vmul.f32 %v5343_v47, %v8350_v62  ;;  %v8479_v1 = vld [vmem:[%s8959_s3 + $0x180] sm:$0xff]  ;;  %v8494_v12 = vpop.xlane.xlu1 %2539 }
 0x870   : > { %v5345_v28 = vpop.eup %5344  ;;  %5346 = vrsqrt.f32 %v8452_v8  ;;  %v2991_v52 = vmul.f32 %v9327_v7, %v2799_v21  ;;  %v3709_v37 = vand.u32 2147483648, %v8341_v51  ;;  %v3244_v50 = vadd.f32 0.2, %v3180_v0 }
 0x871   : > { %v4037_v60 = vadd.f32 %v7641_v49, %v4035_v46  ;;  %v8481_v16 = vmax.f32 %v3054_v15, 0.0  ;;  %v3881_v24 = vmul.f32 %v3703_v33, %v3241_v20  ;;  %vm3713_vm14 = vcmp.eq.f32.partialorder %v8350_v62, inf  ;;  %v3118_v49 = vld [vmem:[%s8958_s2 + $0x188] sm:$0xff] }
 0x872   : > { %vm3715_vm15 = vcmp.eq.f32.partialorder %v8350_v62, 0.0  ;;  %v4203_v34 = vsel %vm3966_vm11, %v8479_v1, 0.0  ;;  %v4200_v40 = vadd.f32 %v4199_v11, %v4198_v61  ;;  %v3716_v44 = vand.u32 2147483648, %v8350_v62 }
 0x873   : > { %v4039_v55 = vadd.f32 %v7730_v32, %v4037_v60  ;;  %v8492_v14 = vadd.f32 0.2, %v3181_v26  ;;  %v3707_v20 = vsel %vm3706_vm12, %v8341_v51, %v3705_v43  ;;  %v3714_v48 = vsel %vm3713_vm14, %v8350_v62, %v3712_v42  ;;  %v8505_v32 = vld [vmem:[%s8959_s3 + $0x188] sm:$0xff] }
 0x874   : > { %v3719_v63 = vmul.f32 %v5345_v28, %v8370_v39  ;;  %v3055_v21 = vsub.f32 2.0, %v2991_v52  ;;  %v3182_v53 = vsub.f32 2.0, %v3118_v49  ;;  %5348 = vrsqrt.f32 %v8481_v16  ;;  %v9328_v28 = vld [vmem:[#allocation96_spill] sm:$0xff] }
 0x875   : > { %v4041_v47 = vadd.f32 %v8374_v23, %v4039_v55  ;;  %v2800_v11 = vmul.f32 2.0, %v8337_v4  ;;  %v3945_v56 = vmul.f32 %v3881_v24, %v8404_v3  ;;  %vm3720_vm0 = vcmp.eq.f32.partialorder %v8370_v39, inf  ;;  %v3119_v4 = vld [vmem:[%s8958_s2 + $0x190] sm:$0xff] }
 0x876   : > { %v4205_v0 = vsel %vm3966_vm11, %v8505_v32, 0.0  ;;  %v2801_v15 = vmul.f32 2.0, %v8362_v5  ;;  %v3710_v46 = vsel %vm3708_vm13, %v3709_v37, %v3707_v20  ;;  %v3717_v33 = vsel %vm3715_vm15, %v3716_v44, %v3714_v48  ;;  %v8546_v44 = vld [vmem:[%s8959_s3 + $0x190] sm:$0xff] }
 0x877   : > { %v4043_v23 = vadd.f32 %v7716_v19, %v4041_v47  ;;  %v4202_v61 = vadd.f32 %v4201_v57, %v4200_v40  ;;  %v3721_v3 = vsel %vm3720_vm0, %v8370_v39, %v3719_v63  ;;  %v8523_v26 = vmax.f32 %v3055_v21, 0.0  ;;  %v8531_v57 = vpop.xlane.xlu1 %2541 }
 0x878   : > { %v2992_v43 = vmul.f32 %v9328_v28, %v2800_v11  ;;  %v2802_v5 = vmul.f32 2.0, %v8409_v54  ;;  %vm3722_vm1 = vcmp.eq.f32.partialorder %v8370_v39, 0.0  ;;  %v3723_v51 = vand.u32 2147483648, %v8370_v39 }
 0x879   : > { %v4045_v19 = vadd.f32 %v7767_v38, %v4043_v23  ;;  %v2993_v62 = vmul.f32 %v7482_v30, %v2801_v15  ;;  %v3882_v7 = vmul.f32 %v3710_v46, %v8433_v10  ;;  %v8534_v52 = vadd.f32 0.2, %v3182_v53  ;;  %v9329_v23 = vld [vmem:[#allocation23_spill] sm:$0xff] }
 0x87a   : > { %v5347_v42 = vpop.eup %5346  ;;  %v3183_v60 = vsub.f32 2.0, %v3119_v4  ;;  %v3056_v37 = vsub.f32 2.0, %v2992_v43  ;;  %v4054_v54 = vsel %vm3966_vm11, %v3945_v56, 0.0  ;;  %v3883_v38 = vmul.f32 %v3717_v33, %v8439_v29  ;;  %v3121_v4 = vld [vmem:[%s8958_s2 + $0x1a0] sm:$0xff]  ;;  %v8590_v43 = vld [vmem:[%s8959_s3 + $0x198] sm:$0xff] }
 0x87b   : > { %v4047_v24 = vadd.f32 %v8412_v18, %v4045_v19  ;;  %v3724_v49 = vsel %vm3722_vm1, %v3723_v51, %v3721_v3  ;;  %v4204_v55 = vadd.f32 %v4203_v34, %v4202_v61  ;;  %5350 = vrsqrt.f32 %v8523_v26  ;;  %v3120_v18 = vld [vmem:[%s8958_s2 + $0x198] sm:$0xff]  ;;  %v2544_v53 = vpop.xlane.xlu1 %2543 }
 0x87c   : > { %v3057_v30 = vsub.f32 2.0, %v2993_v62  ;;  %v2994_v39 = vmul.f32 %v7498_v36, %v2802_v5  ;;  %v3726_v10 = vmul.f32 %v5347_v42, %v8452_v8  ;;  %v8551_v29 = vmax.f32 %v3056_v37, 0.0 }
 0x87d   : > { %v4049_v40 = vadd.f32 %v8431_v6, %v4047_v24  ;;  %v2803_v34 = vmul.f32 2.0, %v8462_v17  ;;  %v3946_v20 = vmul.f32 %v3882_v7, %v8424_v9  ;;  %v3884_v36 = vmul.f32 %v3724_v49, %v3244_v50 }
 0x87e   : > { %v8555_v48 = vadd.f32 0.2, %v3183_v60  ;;  %v4207_v6 = vsel %vm3966_vm11, %v8546_v44, 0.0  ;;  %v5349_v63 = vpop.eup %5348  ;;  %v3947_v47 = vmul.f32 %v3883_v38, %v8444_v35  ;;  %vm3727_vm2 = vcmp.eq.f32.partialorder %v8452_v8, inf }
 0x87f   : > { %v4051_v21 = vadd.f32 %v8377_v59, %v4049_v40  ;;  %vm3729_vm3 = vcmp.eq.f32.partialorder %v8452_v8, 0.0  ;;  %v4206_v11 = vadd.f32 %v4205_v0, %v4204_v55  ;;  %v3184_v17 = vsub.f32 2.0, %v3120_v18  ;;  %v2546_v7 = vpop.xlane.xlu1 %2545 }
 0x880   : > { %v8563_v56 = vmax.f32 %v3057_v30, 0.0  ;;  %v3058_v9 = vsub.f32 2.0, %v2994_v39  ;;  %v3728_v15 = vsel %vm3727_vm2, %v8452_v8, %v3726_v10  ;;  %5352 = vrsqrt.f32 %v8551_v29  ;;  %v9330_v39 = vld [vmem:[#allocation66_spill] sm:$0xff] }
 0x881   : > { %v4053_v50 = vadd.f32 %v8419_v45, %v4051_v21  ;;  %v2995_v59 = vmul.f32 %v9329_v23, %v2803_v34  ;;  %v4056_v35 = vsel %vm3966_vm11, %v3946_v20, 0.0  ;;  %v3948_v46 = vmul.f32 %v3884_v36, %v8460_v13  ;;  %v3122_v13 = vld [vmem:[%s8958_s2 + $0x1a8] sm:$0xff] }
 0x882   : > { %v3730_v33 = vand.u32 2147483648, %v8452_v8  ;;  %v3733_v0 = vmul.f32 %v5349_v63, %v8481_v16  ;;  %v4058_v61 = vsel %vm3966_vm11, %v3947_v47, 0.0  ;;  %vm3734_vm4 = vcmp.eq.f32.partialorder %v8481_v16, inf  ;;  %v3123_v8 = vld [vmem:[%s8958_s2 + $0x1b0] sm:$0xff] }
 0x883   : > { %vm3736_vm5 = vcmp.eq.f32.partialorder %v8481_v16, 0.0  ;;  %v3737_v45 = vand.u32 2147483648, %v8481_v16  ;;  %v8585_v28 = vadd.f32 %v4207_v6, %v4206_v11  ;;  %5354 = vrsqrt.f32 %v8563_v56  ;;  %v9331_v63 = vld [vmem:[#allocation19_spill] sm:$0xff] }
 0x884   : > { %v3731_v3 = vsel %vm3729_vm3, %v3730_v33, %v3728_v15  ;;  %v8593_v5 = vmax.f32 %v3058_v9, 0.0  ;;  %v8595_v19 = vadd.f32 0.2, %v3184_v17  ;;  %v8599_v51 = vsel %vm3966_vm11, %v8590_v43, 0.0  ;;  %v2550_v9 = vpop.xlane.xlu1 %2549 }
 0x885   : > { %v3059_v62 = vsub.f32 2.0, %v2995_v59  ;;  %v2804_v42 = vmul.f32 2.0, %v8494_v12  ;;  %v5351_v60 = vpop.eup %5350  ;;  %v4060_v37 = vsel %vm3966_vm11, %v3948_v46, 0.0  ;;  %v3735_v24 = vsel %vm3734_vm4, %v8481_v16, %v3733_v0  ;;  %v9332_v16 = vld [vmem:[#allocation16_spill] sm:$0xff] }
 0x886   : > { %v3185_v38 = vsub.f32 2.0, %v3121_v4  ;;  %v3186_v49 = vsub.f32 2.0, %v3122_v13  ;;  %v4055_v55 = vadd.f32 %v4054_v54, %v4053_v50  ;;  %v3885_v30 = vmul.f32 %v3731_v3, %v8492_v14 }
 0x887   : > { %v2996_v40 = vmul.f32 %v9330_v39, %v2804_v42  ;;  %v2805_v10 = vmul.f32 2.0, %v8531_v57  ;;  %5356 = vrsqrt.f32 %v8593_v5  ;;  %v3187_v12 = vsub.f32 2.0, %v3123_v8 }
 0x888   : > { %v2806_v18 = vmul.f32 2.0, %v2544_v53  ;;  %v2807_v34 = vmul.f32 2.0, %v2546_v7  ;;  %v3738_v20 = vsel %vm3736_vm5, %v3737_v45, %v3735_v24  ;;  %v3740_v36 = vmul.f32 %v5351_v60, %v8523_v26 }
 0x889   : > { %v8616_v6 = vmax.f32 %v3059_v62, 0.0  ;;  %v2997_v54 = vmul.f32 %v9331_v63, %v2805_v10  ;;  %vm3741_vm6 = vcmp.eq.f32.partialorder %v8523_v26, inf  ;;  %vm3743_vm7 = vcmp.eq.f32.partialorder %v8523_v26, 0.0 }
 0x88a   : > { %v3744_v14 = vand.u32 2147483648, %v8523_v26  ;;  %v3060_v57 = vsub.f32 2.0, %v2996_v40  ;;  %v5353_v21 = vpop.eup %5352  ;;  %v4057_v47 = vadd.f32 %v4056_v35, %v4055_v55  ;;  %v3949_v53 = vmul.f32 %v3885_v30, %v8479_v1  ;;  %v3124_v1 = vld [vmem:[%s8958_s2 + $0x1b8] sm:$0xff]  ;;  %v2554_v40 = vpop.xlane.xlu1 %2553 }
 0x88b   : > { %v8623_v11 = vadd.f32 0.2, %v3185_v38  ;;  %v2998_v17 = vmul.f32 %v9332_v16, %v2806_v18  ;;  %v3886_v50 = vmul.f32 %v3738_v20, %v8534_v52  ;;  %v8627_v15 = vadd.f32 0.2, %v3186_v49 }
 0x88c   : > { %v8629_v23 = vadd.f32 0.2, %v3187_v12  ;;  %v2999_v59 = vmul.f32 %v7677_v58, %v2807_v34  ;;  %v3742_v46 = vsel %vm3741_vm6, %v8523_v26, %v3740_v36  ;;  %vm3748_vm8 = vcmp.eq.f32.partialorder %v8551_v29, inf  ;;  %v9333_v26 = vld [vmem:[#allocation31_spill] sm:$0xff] }
 0x88d   : > { %5358 = vrsqrt.f32 %v8616_v6  ;;  %v3061_v35 = vsub.f32 2.0, %v2997_v54  ;;  %v5355_v33 = vpop.eup %5354  ;;  %v3747_v52 = vmul.f32 %v5353_v21, %v8551_v29  ;;  %vm3750_vm9 = vcmp.eq.f32.partialorder %v8551_v29, 0.0 }
 0x88e   : > { %v8640_v0 = vmax.f32 %v3060_v57, 0.0  ;;  %v2809_v45 = vmul.f32 2.0, %v2550_v9  ;;  %v4059_v58 = vadd.f32 %v4058_v61, %v4057_v47  ;;  %v4062_v4 = vsel %vm3966_vm11, %v3949_v53, 0.0 }
 0x88f   : > { %v3751_v13 = vand.u32 2147483648, %v8551_v29  ;;  %v3062_v3 = vsub.f32 2.0, %v2998_v17  ;;  %v3950_v8 = vmul.f32 %v3886_v50, %v8505_v32  ;;  %v3745_v62 = vsel %vm3743_vm7, %v3744_v14, %v3742_v46  ;;  %v8682_v14 = vld [vmem:[%s8959_s3 + $0x1a8] sm:$0xff] }
 0x890   : > { %v3188_v42 = vsub.f32 2.0, %v3124_v1  ;;  %v3063_v7 = vsub.f32 2.0, %v2999_v59  ;;  %v3754_v60 = vmul.f32 %v5355_v33, %v8563_v56  ;;  %vm3755_vm10 = vcmp.eq.f32.partialorder %v8563_v56, inf  ;;  %v8713_v1 = vld [vmem:[%s8959_s3 + $0x1b8] sm:$0xff] }
 0x891   : > { %vm3757_vm12 = vcmp.eq.f32.partialorder %v8563_v56, 0.0  ;;  %v8650_v24 = vmax.f32 %v3061_v35, 0.0  ;;  %v5357_v61 = vpop.eup %5356  ;;  %v3749_v38 = vsel %vm3748_vm8, %v8551_v29, %v3747_v52  ;;  %v3758_v32 = vand.u32 2147483648, %v8563_v56 }
 0x892   : > { %5360 = vrsqrt.f32 %v8640_v0  ;;  %v3001_v49 = vmul.f32 %v9333_v26, %v2809_v45  ;;  %v4061_v55 = vadd.f32 %v4060_v37, %v4059_v58  ;;  %v3887_v30 = vmul.f32 %v3745_v62, %v8555_v48  ;;  %v3313_v48 = vld [vmem:[%s8959_s3 + $0x1a0] sm:$0xff] }
 0x893   : > { %vm3762_vm13 = vcmp.eq.f32.partialorder %v8593_v5, inf  ;;  %v8660_v39 = vmax.f32 %v3062_v3, 0.0  ;;  %v4064_v10 = vsel %vm3966_vm11, %v3950_v8, 0.0  ;;  %vm3764_vm14 = vcmp.eq.f32.partialorder %v8593_v5, 0.0  ;;  %v8730_v8 = vld [vmem:[%s8959_s3 + $0x1c8] sm:$0xff] }
 0x894   : > { %v3765_v12 = vand.u32 2147483648, %v8593_v5  ;;  %v8665_v18 = vadd.f32 0.2, %v3188_v42  ;;  %v8667_v34 = vmax.f32 %v3063_v7, 0.0  ;;  %v3752_v37 = vsel %vm3750_vm9, %v3751_v13, %v3749_v38 }
 0x895   : > { %v3756_v20 = vsel %vm3755_vm10, %v8563_v56, %v3754_v60  ;;  %v3761_v36 = vmul.f32 %v5357_v61, %v8593_v5  ;;  %5362 = vrsqrt.f32 %v8650_v24  ;;  %v3065_v63 = vsub.f32 2.0, %v3001_v49  ;;  %v8718_v56 = vld [vmem:[%s8959_s3 + $0x1c0] sm:$0xff] }
 0x896   : > { %v2811_v54 = vmul.f32 2.0, %v2554_v40  ;;  %v4210_v29 = vadd.f32 %v8599_v51, %v8585_v28  ;;  %v4211_v57 = vsel %vm3966_vm11, %v3313_v48, 0.0  ;;  %v4063_v47 = vadd.f32 %v4062_v4, %v4061_v55  ;;  %v8697_v28 = vld [vmem:[%s8959_s3 + $0x1b0] sm:$0xff] }
 0x897   : > { %v5359_v21 = vpop.eup %5358  ;;  %v3951_v53 = vmul.f32 %v3887_v30, %v8546_v44  ;;  %5364 = vrsqrt.f32 %v8660_v39  ;;  %v4213_v16 = vsel %vm3966_vm11, %v8682_v14, 0.0  ;;  %v3888_v17 = vmul.f32 %v3752_v37, %v8595_v19 }
 0x898   : > { %5366 = vrsqrt.f32 %v8667_v34  ;;  %v3003_v9 = vmul.f32 %v7738_v27, %v2811_v54  ;;  %v4212_v51 = vadd.f32 %v4211_v57, %v4210_v29  ;;  %v3759_v44 = vsel %vm3757_vm12, %v3758_v32, %v3756_v20  ;;  %v3125_v54 = vld [vmem:[%s8958_s2 + $0x1c0] sm:$0xff] }
 0x899   : > { %v3763_v50 = vsel %vm3762_vm13, %v8593_v5, %v3761_v36  ;;  %vm3769_vm15 = vcmp.eq.f32.partialorder %v8616_v6, inf  ;;  %v4215_v19 = vsel %vm3966_vm11, %v8697_v28, 0.0  ;;  %v3768_v27 = vmul.f32 %v5359_v21, %v8616_v6  ;;  %v8747_v5 = vld [vmem:[%s8959_s3 + $0x1d0] sm:$0xff] }
 0x89a   : > { %v8708_v59 = vmax.f32 %v3065_v63, 0.0  ;;  %v3067_v46 = vsub.f32 2.0, %v3003_v9  ;;  %v4214_v35 = vadd.f32 %v4213_v16, %v4212_v51  ;;  %v4065_v33 = vadd.f32 %v4064_v10, %v4063_v47  ;;  %v3127_v9 = vld [vmem:[%s8958_s2 + $0x1d0] sm:$0xff]  ;;  %v3129_v51 = vld [vmem:[%s8958_s2 + $0x1e0] sm:$0xff] }
 0x89b   : > { %vm3771_vm0 = vcmp.eq.f32.partialorder %v8616_v6, 0.0  ;;  %v3772_v52 = vand.u32 2147483648, %v8616_v6  ;;  %v4217_v45 = vsel %vm3966_vm11, %v8713_v1, 0.0  ;;  %v4066_v4 = vsel %vm3966_vm11, %v3951_v53, 0.0  ;;  %v3126_v53 = vld [vmem:[%s8958_s2 + $0x1c8] sm:$0xff] }
 0x89c   : > { %v5361_v58 = vpop.eup %5360  ;;  %v3952_v13 = vmul.f32 %v3888_v17, %v8590_v43  ;;  %v3889_v3 = vmul.f32 %v3759_v44, %v8623_v11  ;;  %v4216_v62 = vadd.f32 %v4215_v19, %v4214_v35  ;;  %v3766_v42 = vsel %vm3764_vm14, %v3765_v12, %v3763_v50  ;;  %v3131_v44 = vld [vmem:[%s8958_s2 + $0x1f0] sm:$0xff]  ;;  %v8814_v19 = vld [vmem:[%s8959_s3 + $0x1e8] sm:$0xff] }
 0x89d   : > { %vm3776_vm1 = vcmp.eq.f32.partialorder %v8640_v0, inf  ;;  %vm3778_vm2 = vcmp.eq.f32.partialorder %v8640_v0, 0.0  ;;  %v4219_v7 = vsel %vm3966_vm11, %v8718_v56, 0.0  ;;  %v3770_v43 = vsel %vm3769_vm15, %v8616_v6, %v3768_v27  ;;  %v8781_v6 = vld [vmem:[%s8959_s3 + $0x1e0] sm:$0xff]  ;;  %v8819_v27 = vld [vmem:[%s8959_s3 + $0x1f0] sm:$0xff] }
 0x89e   : > { %5368 = vrsqrt.f32 %v8708_v59  ;;  %v8742_v11 = vmax.f32 %v3067_v46, 0.0  ;;  %v4218_v60 = vadd.f32 %v4217_v45, %v4216_v62  ;;  %v8749_v38 = vadd.f32 %v4066_v4, %v4065_v33 }
 0x89f   : > { %v5363_v61 = vpop.eup %5362  ;;  %v3775_v32 = vmul.f32 %v5361_v58, %v8640_v0  ;;  %v3779_v26 = vand.u32 2147483648, %v8640_v0  ;;  %v4221_v49 = vsel %vm3966_vm11, %v8730_v8, 0.0  ;;  %v8756_v55 = vsel %vm3966_vm11, %v3952_v13, 0.0  ;;  %v8833_v13 = vld [vmem:[%s8959_s3 + $0x1f8] sm:$0xff] }
 0x8a0   : > { %v8758_v30 = vmul.f32 %v3889_v3, %v3313_v48  ;;  %v8761_v40 = vmul.f32 %v3766_v42, %v8627_v15  ;;  %v4220_v10 = vadd.f32 %v4219_v7, %v4218_v60  ;;  %vm3804_vm3 = vcmp.eq.f32.partialorder %v7718_v2, inf  ;;  %v8776_v15 = vld [vmem:[%s8959_s3 + $0x1d8] sm:$0xff] }
 0x8a1   : > { %v5365_v12 = vpop.eup %5364  ;;  %v3773_v37 = vsel %vm3771_vm0, %v3772_v52, %v3770_v43  ;;  %vm3783_vm4 = vcmp.eq.f32.partialorder %v8650_v24, inf  ;;  %vm3785_vm5 = vcmp.eq.f32.partialorder %v8650_v24, 0.0  ;;  %v4223_v20 = vsel %vm3966_vm11, %v8747_v5, 0.0 }
 0x8a2   : > { %v5367_v36 = vpop.eup %5366  ;;  %v3786_v48 = vand.u32 2147483648, %v8650_v24  ;;  %vm3790_vm6 = vcmp.eq.f32.partialorder %v8660_v39, inf  ;;  %5370 = vrsqrt.f32 %v8742_v11  ;;  %v4222_v63 = vadd.f32 %v4221_v49, %v4220_v10 }
 0x8a3   : > { %v3777_v29 = vsel %vm3776_vm1, %v8640_v0, %v3775_v32  ;;  %v3782_v57 = vmul.f32 %v5363_v61, %v8650_v24  ;;  %vm3792_vm7 = vcmp.eq.f32.partialorder %v8660_v39, 0.0  ;;  %v3793_v21 = vand.u32 2147483648, %v8660_v39 }
 0x8a4   : > { %v4225_v47 = vsel %vm3966_vm11, %v8776_v15, 0.0  ;;  %v3891_v16 = vmul.f32 %v3773_v37, %v8629_v23  ;;  %vm3797_vm8 = vcmp.eq.f32.partialorder %v8667_v34, inf  ;;  %vm3799_vm9 = vcmp.eq.f32.partialorder %v8667_v34, 0.0 }
 0x8a5   : > { %v4224_v17 = vadd.f32 %v4223_v20, %v4222_v63  ;;  %v3789_v50 = vmul.f32 %v5365_v12, %v8660_v39  ;;  %v3796_v23 = vmul.f32 %v5367_v36, %v8667_v34  ;;  %v4227_v46 = vsel %vm3966_vm11, %v8781_v6, 0.0 }
 0x8a6   : > { %v3189_v35 = vsub.f32 2.0, %v3125_v54  ;;  %v3780_v33 = vsel %vm3778_vm2, %v3779_v26, %v3777_v29  ;;  %v4229_v45 = vsel %vm3966_vm11, %v8814_v19, 0.0  ;;  %v3190_v58 = vsub.f32 2.0, %v3126_v53 }
 0x8a7   : > { %v4226_v52 = vadd.f32 %v4225_v47, %v4224_v17  ;;  %v3784_v4 = vsel %vm3783_vm4, %v8650_v24, %v3782_v57  ;;  %v3191_v3 = vsub.f32 2.0, %v3127_v9  ;;  %v3193_v62 = vsub.f32 2.0, %v3129_v51 }
 0x8a8   : > { %v3195_v42 = vsub.f32 2.0, %v3131_v44  ;;  %v5369_v7 = vpop.eup %5368  ;;  %v3800_v0 = vand.u32 2147483648, %v8667_v34  ;;  %v4231_v60 = vsel %vm3966_vm11, %v8819_v27, 0.0  ;;  %v4233_v61 = vsel %vm3966_vm11, %v8833_v13, 0.0 }
 0x8a9   : > { %v4228_v43 = vadd.f32 %v4227_v46, %v4226_v52  ;;  %v3892_v32 = vmul.f32 %v3780_v33, %v8665_v18  ;;  %v3791_v26 = vsel %vm3790_vm6, %v8660_v39, %v3789_v50  ;;  %v3798_v49 = vsel %vm3797_vm8, %v8667_v34, %v3796_v23 }
 0x8aa   : > { %v3253_v10 = vadd.f32 0.2, %v3189_v35  ;;  %v3787_v12 = vsel %vm3785_vm5, %v3786_v48, %v3784_v4  ;;  %v3254_v20 = vadd.f32 0.2, %v3190_v58  ;;  %v3805_v36 = vsel %vm3804_vm3, %v7718_v2, %v8355_v41 }
 0x8ab   : > { %v4230_v37 = vadd.f32 %v4229_v45, %v4228_v43  ;;  %v3810_v18 = vmul.f32 %v5369_v7, %v8708_v59  ;;  %v3255_v63 = vadd.f32 0.2, %v3191_v3  ;;  %v3257_v54 = vadd.f32 0.2, %v3193_v62 }
 0x8ac   : > { %v3259_v29 = vadd.f32 0.2, %v3195_v42  ;;  %v5371_v57 = vpop.eup %5370  ;;  %v3794_v53 = vsel %vm3792_vm7, %v3793_v21, %v3791_v26  ;;  %v3801_v24 = vsel %vm3799_vm9, %v3800_v0, %v3798_v49  ;;  %vm3806_vm10 = vcmp.eq.f32.partialorder %v7718_v2, 0.0  ;;  %v9336_v42 = vld [vmem:[#allocation69_spill] sm:$0xff] }
 0x8ad   : > { %v4232_v47 = vadd.f32 %v4231_v60, %v4230_v37  ;;  %v9334_v48 = vand.u32 2147483648, %v7718_v2  ;;  %vm3811_vm12 = vcmp.eq.f32.partialorder %v8708_v59, inf  ;;  %vm3813_vm13 = vcmp.eq.f32.partialorder %v8708_v59, 0.0 }
 0x8ae   : > { %v3814_v41 = vand.u32 2147483648, %v8708_v59  ;;  %v3817_v51 = vmul.f32 %v7843_v25, %v7758_v22  ;;  %vm3818_vm14 = vcmp.eq.f32.partialorder %v7758_v22, inf  ;;  %v3954_v39 = vmul.f32 %v8761_v40, %v8682_v14  ;;  %v9335_v14 = vld [vmem:[#allocation53_spill] sm:$0xff] }
 0x8af   : > { %v3808_v17 = vsel %vm3806_vm10, %v9334_v48, %v3805_v36  ;;  %v4234_v9 = vadd.f32 %v4233_v61, %v4232_v47  ;;  %v3812_v34 = vsel %vm3811_vm12, %v8708_v59, %v3810_v18  ;;  %vm3820_vm15 = vcmp.eq.f32.partialorder %v7758_v22, 0.0 }
 0x8b0   : > { %v3824_v2 = vmul.f32 %v5371_v57, %v8742_v11  ;;  %v4069_v21 = vadd.f32 %v8756_v55, %v8749_v38  ;;  %v3893_v44 = vmul.f32 %v3787_v12, %v3253_v10  ;;  %v3894_v50 = vmul.f32 %v3794_v53, %v3254_v20  ;;  %v9339_v12 = vld [vmem:[#allocation78_spill] sm:$0xff] }
 0x8b1   : > { %4235 = vadd.xlane.f32.xlu0 %v4234_v9  ;;  %v3955_v23 = vmul.f32 %v3891_v16, %v8697_v28  ;;  %v4070_v25 = vsel %vm3966_vm11, %v8758_v30, 0.0  ;;  %v3821_v46 = vand.u32 2147483648, %v7758_v22  ;;  %vm3825_vm0 = vcmp.eq.f32.partialorder %v8742_v11, inf }
 0x8b2   : > { %v3831_v40 = vmul.f32 %v9335_v14, %v7772_v31  ;;  %v4071_v35 = vadd.f32 %v4070_v25, %v4069_v21  ;;  %v3819_v33 = vsel %vm3818_vm14, %v7758_v22, %v3817_v51  ;;  %v3895_v52 = vmul.f32 %v3801_v24, %v3255_v63 }
 0x8b3   : > { %v3956_v38 = vmul.f32 %v3892_v32, %v8713_v1  ;;  %v4072_v55 = vsel %vm3966_vm11, %v3954_v39, 0.0  ;;  %v3815_v28 = vsel %vm3813_vm13, %v3814_v41, %v3812_v34  ;;  %vm3827_vm1 = vcmp.eq.f32.partialorder %v8742_v11, 0.0  ;;  %v9337_v32 = vld [vmem:[#allocation83_spill] sm:$0xff] }
 0x8b4   : > { %vm3832_vm2 = vcmp.eq.f32.partialorder %v7772_v31, inf  ;;  %v4073_v30 = vadd.f32 %v4072_v55, %v4071_v35  ;;  %v3826_v16 = vsel %vm3825_vm0, %v8742_v11, %v3824_v2  ;;  %v3957_v45 = vmul.f32 %v3893_v44, %v8718_v56 }
 0x8b5   : > { %v3958_v58 = vmul.f32 %v3894_v50, %v8730_v8  ;;  %v4074_v4 = vsel %vm3966_vm11, %v3955_v23, 0.0  ;;  %v3822_v1 = vsel %vm3820_vm15, %v3821_v46, %v3819_v33  ;;  %v3828_v3 = vand.u32 2147483648, %v8742_v11 }
 0x8b6   : > { %v3833_v59 = vsel %vm3832_vm2, %v7772_v31, %v3831_v40  ;;  %v4075_v62 = vadd.f32 %v4074_v4, %v4073_v30  ;;  %v3896_v7 = vmul.f32 %v3808_v17, %v9336_v42  ;;  %v3897_v0 = vmul.f32 %v3815_v28, %v3257_v54 }
 0x8b7   : > { %v3959_v43 = vmul.f32 %v3895_v52, %v8747_v5  ;;  %v4076_v60 = vsel %vm3966_vm11, %v3956_v38, 0.0  ;;  %v3829_v56 = vsel %vm3827_vm1, %v3828_v3, %v3826_v16  ;;  %v3835_v8 = vand.u32 2147483648, %v7772_v31  ;;  %v3965_v52 = vld [vmem:[#allocation6] sm:$0x1]  ;;  %v4107_v38 = vld [vmem:[#allocation7] sm:$0x1] }
 0x8b8   : > { %v4077_v61 = vadd.f32 %v4076_v60, %v4075_v62  ;;  %vm3834_vm3 = vcmp.eq.f32.partialorder %v7772_v31, 0.0  ;;  %v4078_v22 = vsel %vm3966_vm11, %v3957_v45, 0.0  ;;  %v4080_v11 = vsel %vm3966_vm11, %v3958_v58, 0.0 }
 0x8b9   : > { %v9338_v26 = vsub.f32 2.0, %v9337_v32  ;;  %v3836_v10 = vsel %vm3834_vm3, %v3835_v8, %v3833_v59  ;;  %v3898_v37 = vmul.f32 %v3822_v1, %v9339_v12  ;;  %v3899_v5 = vmul.f32 %v3829_v56, %v3259_v29 }
 0x8ba   : > { %v4079_v20 = vadd.f32 %v4078_v22, %v4077_v61  ;;  %v3960_v36 = vmul.f32 %v3896_v7, %v8776_v15  ;;  %v3961_v18 = vmul.f32 %v3897_v0, %v8781_v6  ;;  %v4082_v63 = vsel %vm3966_vm11, %v3959_v43, 0.0 }
 0x8bb   : > { %v3260_v49 = vadd.f32 0.2, %v9338_v26  ;;  %v3962_v47 = vmul.f32 %v3898_v37, %v8814_v19  ;;  %v3963_v53 = vmul.f32 %v3899_v5, %v8819_v27 }
 0x8bc   : > { %v4081_v54 = vadd.f32 %v4080_v11, %v4079_v20  ;;  %v4084_v24 = vsel %vm3966_vm11, %v3960_v36, 0.0  ;;  %v4086_v48 = vsel %vm3966_vm11, %v3961_v18, 0.0 }
 0x8bd   : > { %v3900_v31 = vmul.f32 %v3836_v10, %v3260_v49  ;;  %v4088_v15 = vsel %vm3966_vm11, %v3962_v47, 0.0  ;;  %v4090_v6 = vsel %vm3966_vm11, %v3963_v53, 0.0 }
 0x8be   : > { %v4083_v57 = vadd.f32 %v4082_v63, %v4081_v54 }
 0x8bf   : > { %v3964_v29 = vmul.f32 %v3900_v31, %v8833_v13 }
 0x8c0   : > { %v4085_v17 = vadd.f32 %v4084_v24, %v4083_v57 }
 0x8c1   : > { %v4092_v39 = vsel %vm3966_vm11, %v3964_v29, 0.0  ;;  %vm4105_vm11 = vcmask 0  }
 0x8c2   : > { %v4087_v41 = vadd.f32 %v4086_v48, %v4085_v17 }
 0x8c4   : > { %v4089_v9 = vadd.f32 %v4088_v15, %v4087_v41 }
 0x8c6   : > { %v4091_v51 = vadd.f32 %v4090_v6, %v4089_v9 }
 0x8c8   : > { %v4093_v34 = vadd.f32 %v4092_v39, %v4091_v51 }
 0x8ca   : > { %4094 = vadd.xlane.f32.xlu1 %v4093_v34 }
 0x93e   : > { %v4236_v19 = vpop.xlane.xlu0 %4235 }
 0x93f   : > { %v4237_v27 = vrot.slane %v4236_v19, 4 }
 0x941   : > { %v4238_v2 = vadd.f32 %v4237_v27, %v4236_v19 }
 0x943   : > { %v4239_v21 = vrot.slane %v4238_v2, 2 }
 0x945   : > { %v4240_v25 = vadd.f32 %v4239_v21, %v4238_v2 }
 0x947   : > { %v4241_v14 = vrot.slane %v4240_v25, 1 }
 0x949   : > { %v4242_v33 = vadd.f32 %v4241_v14, %v4240_v25 }
 0x957   : > { %v4095_v44 = vpop.xlane.xlu1 %4094 }
 0x958   : > { %v4096_v50 = vrot.slane %v4095_v44, 4 }
 0x95a   : > { %v4097_v23 = vadd.f32 %v4096_v50, %v4095_v44 }
 0x95c   : > { %v4098_v46 = vrot.slane %v4097_v23, 2 }
 0x95e   : > { %v4099_v13 = vadd.f32 %v4098_v46, %v4097_v23 }
 0x960   : > { %v4100_v40 = vrot.slane %v4099_v13, 1 }
 0x962   : > { %v4101_v35 = vadd.f32 %v4100_v40, %v4099_v13 }
 0x964   : > { %4989 = vpush %v4101_v35 }
 0x965   : > { %4991 = vpush %v4242_v33 }
 0x995   : > { %s4990_s15 = spop %4989 }
 0x996   : > { %v4103_v55 = vstv %s4990_s15  ;;  %s4992_s16 = spop %4991 }
 0x997   : > { %v4104_v28 = vadd.f32 %v4103_v55, %v3965_v52  ;;  %v4244_v30 = vstv %s4992_s16 }
 0x998   : > { %v4245_v16 = vadd.f32 %v4244_v30, %v4107_v38 }
 0x999   : > { %4106 = vst.msk [vmem:[#allocation6] sm:$0x1] %vm4105_vm11, %v4104_v28 }
 0x99a   : > { %4246 = vst.msk [vmem:[#allocation7] sm:$0x1] %vm4105_vm11, %v4245_v16 }
 0x99b PF: > { %4250 = sbr.rel (!%p1360_p6) target bundleno = 2615 (0xa37), region = 64  ;;  %v4259_v45 = vld [vmem:[#allocation8] sm:$0x1] (%p1360_p6)  ;;  %v5458_v58 = vmov (%p1360_p6), 0   ;;  %v4271_v3 = vld [vmem:[#allocation9] sm:$0x1] (%p1360_p6)  ;;  %v4256_v7 = vlaneseq (%p1360_p6) }
 0x99c   : > { %5392 = vset.pattern.permute.xlu0 (%p1360_p6), %v5458_v58  ;;  %5393 = vset.pattern.permute.xlu1 (%p1360_p6), %v5458_v58 }
 0x99d   : > { %4262 = vperm.xlu0 (%p1360_p6), %5392, %v4259_v45   ;;  %v4266_v43 = vshrl.u32 (%p1360_p6), %v4256_v7, 7  ;;  %v4257_v56 = vand.u32 (%p1360_p6), 127, %v4256_v7 }
 0x99f   : > { %v4267_v60 = vsub.s32 (%p1360_p6), 0, %v4266_v43  ;;  %vm4258_vm4 = vcmp.eq.s32.totalorder (%p1360_p6), %v4257_v56, 0  ;;  %vm4270_vm5 = vcmp.eq.s32.totalorder (%p1360_p6), %v4257_v56, 1  ;;  %vm4283_vm6 = vcmp.eq.s32.totalorder (%p1360_p6), %v4257_v56, 2 }
 0x9a0   : > { %v4251_v59 = vld [vmem:[#allocation6] sm:$0x1] (%p1360_p6) }
 0x9a1   : > { %v4252_v4 = vld [vmem:[#allocation7] sm:$0x1] (%p1360_p6)  ;;  %4274 = vperm.xlu0 (%p1360_p6), %5392, %v4271_v3  }
 0x9a2   : > { %v4253_v1 = vmax.f32 %v4252_v4, 1.0 }
 0x9a4   : > { %5394 = vrcp.f32 %v4253_v1 }
 0x9ae   : > { %v5395_v62 = vpop.eup %5394 }
 0x9af   : > { %v4255_v42 = vmul.f32 %v5395_v62, %v4251_v59 }
 0x9b1   : > { %4286 = vperm.xlu1 %5393, %v4255_v42  }
 0xa1c   : > { %v4263_v0 = vpop.permute.xlu0 %4262 }
 0xa1d   : > { %v4268_v61 = vrot.slane %v4263_v0, %v4267_v60 }
 0xa1f   : > { %v4269_v11 = vsel %vm4258_vm4, %v4268_v61, 0.0 }
 0xa20   : > { %v4275_v8 = vpop.permute.xlu0 %4274 }
 0xa21   : > { %v4280_v22 = vrot.slane %v4275_v8, %v4267_v60 }
 0xa23   : > { %v4281_v32 = vsel %vm4270_vm5, %v4280_v22, 0.0 }
 0xa24   : > { %v4282_v10 = vadd.f32 %v4281_v32, %v4269_v11 }
 0xa30   : > { %v4287_v26 = vpop.permute.xlu1 %4286 }
 0xa31   : > { %v4292_v49 = vrot.slane %v4287_v26, %v4267_v60 }
 0xa33   : > { %v4293_v12 = vsel %vm4283_vm6, %v4292_v49, 0.0 }
 0xa34   : > { %v4294_v37 = vadd.f32 %v4293_v12, %v4282_v10 }
 0xa36   : > { %4295 = vst [vmem:[#allocation10] sm:$0x1] %v4294_v37 }
 0xa37 PF: > { %p8921_p8 = scmp.eq.s32.totalorder %s4411_s24, 1  ;;  %s5459_s17 = smov [#allocation10]  }
 0xa38   : > { %s4303_s18 = sshll.u32 %s5459_s17, 4  ;;  %s4304_s18 = int_to_ptr.vmem [resolvable:$true] %s4303_s18 }
 0xa39   : > { %s5396_s19 = scalar_lea.vmem %s4304_s18, 16  ;;  %s5402_s20 = scalar_lea.vmem %s4304_s18, 32 }
 0xa3a   : > { %p5397_p9 = scmp.ne.s32.totalorder %s4304_s18, %s5396_s19  ;;  %p5403_p12 = scmp.lt.s32.totalorder %s4304_s18, %s4304_s18 }
 0xa3b   : > { %p5404_p13 = scmp.lt.s32.totalorder %s5402_s20, %s5396_s19 }
 0xa3c   : > { %p5398_p10 = pnand %p5397_p9, %p8921_p8 }
 0xa3d   : > { %p5405_p0 = por %p5404_p13, %p5403_p12 }
 0xa3e   : > { %p5399_p11 = pneg %p5398_p10 }
 0xa40   : > { %p5406_p1 = pnand %p5405_p0, %p5399_p11 }
 0xa42   : > { %5409 = shalt.err (!%p5406_p1)
}
 0xa43   : > { %s5410_s27 = scalar_lea.hbm %s8962_s6, 16 }
 0xa44   : > { %p5411_p2 = scmp.ne.s32.totalorder %s8962_s6, %s5410_s27  ;;  %p5416_p5 = scmp.lt.u32.totalorder %s5410_s27, %s8962_s6 }
 0xa46   : > { %p5412_p3 = pnand %p5411_p2, %p8921_p8 }
 0xa48   : > { %p5413_p4 = pneg %p5412_p3 }
 0xa4a   : > { %p5418_p6 = pnand %p5416_p5, %p5413_p4 }
 0xa4c   : > { %5421 = shalt.err (!%p5418_p6)
}
 0xa4d   : > { %4994 = dma.vmem_to_hbm [thread:$0]  (%p8921_p8), %s4304_s18, 16, %s8962_s6, [#allocation11]  }
 0xa4e   : > { %5435 = dma.done.wait (%p8921_p8), [#allocation11], 16  }
 0xa4f   : > { %5437 = vsyncadd (%p8921_p8), [#allocation11], 4294967280 }
 0xa50 PF: > { %s17_s23 = sadd.s32 1, %s5448_s23   ;;  %s9341_s21 = smov %s5444_s22 }
 0xa51   : > { %p14_p7 = scmp.ge.s32.totalorder %s17_s23, 4   ;;  %s9342_s22 = smov %s9344_s25 }
 0xa53   :  { %16 = sbr.rel (!%p14_p7) target bundleno = 2 (0x2), region = 106 }
 0xa5a   :  { %4316 = vsyncpa [#allocation11], 1 }
 0xa5b   :  { %4318 = vsyncpa [#allocation11 + $0x1], 1 }

</bundles_post_ra>
